<compile_context>
chip_gen: v7x
topology: tpu7x:2x2x1
jax: 0.10.0
libtpu: 0.0.40
codegen_flags: <defaults>
</compile_context>

<pallas_src>
import jax
import jax.numpy as jnp
from jax import lax
from jax.experimental import pallas as pl
from jax.experimental.pallas import tpu as pltpu

KSIZE = 5
PAD = 2


def _partial_bsconv_kernel(x_ref, w_ref, o_ref, xpad_ref, patch_ref):
    """One image per grid step; H*W is the (lane) minor axis everywhere.

    x_ref     : (1, C, H*W)        NCHW activations, spatial flattened
    w_ref     : (Cout, K_total)    fused weights:
                                     cols [k*Cr + c]    dw tap k of chan c folded
                                                        through the pointwise conv
                                     cols [25*Cr + j]   pass-through chan Cr+j
                                     col  [K_total-1]   folded depthwise bias
    o_ref     : (1, Cout, H*W)     output (NCHW, spatial flattened)
    xpad_ref  : VMEM (Cr, H+2P, W+2P) f32  zero-padded depthwise group
    patch_ref : VMEM (K_total, H*W)   f32  im2col slab (incl. ones-row)
    """
    _, C, HW = x_ref.shape
    Cr, Hp, Wp = xpad_ref.shape
    H, W = Hp - 2 * PAD, Wp - 2 * PAD
    n_dw = KSIZE * KSIZE * Cr
    n_other = C - Cr

    # Zero only the PAD-wide halo strips; the interior is fully overwritten below.
    xpad_ref[:, :PAD, :] = jnp.zeros((Cr, PAD, Wp), jnp.float32)
    xpad_ref[:, PAD + H:, :] = jnp.zeros((Cr, PAD, Wp), jnp.float32)
    xpad_ref[:, PAD:PAD + H, :PAD] = jnp.zeros((Cr, H, PAD), jnp.float32)
    xpad_ref[:, PAD:PAD + H, PAD + W:] = jnp.zeros((Cr, H, PAD), jnp.float32)

    # Interior: depthwise channel group (slice the ref directly, no full-tile copy).
    xg = x_ref[0, :Cr, :].astype(jnp.float32)                    # (Cr, HW)
    xpad_ref[:, PAD:PAD + H, PAD:PAD + W] = xg.reshape(Cr, H, W)

    # im2col slab: 25 shifted copies of the depthwise group ...
    for kh in range(KSIZE):
        for kw in range(KSIZE):
            k = kh * KSIZE + kw
            patch_ref[k * Cr:(k + 1) * Cr, :] = (
                xpad_ref[:, kh:kh + H, kw:kw + W].reshape(Cr, HW))
    # ... the untouched channel group straight through ...
    if n_other > 0:
        patch_ref[n_dw:n_dw + n_other, :] = x_ref[0, Cr:, :].astype(jnp.float32)
    # ... and a ones-row that carries the folded depthwise bias through the MXU.
    patch_ref[n_dw + n_other:n_dw + n_other + 1, :] = jnp.ones((1, HW), jnp.float32)

    # Single fused MXU matmul: (Cout, K_total) @ (K_total, HW) -> (Cout, HW).
    acc = jnp.dot(w_ref[...].astype(jnp.float32), patch_ref[...],
                  preferred_element_type=jnp.float32)

    # Lane-dense store (HW is a multiple of 128 for typical SR feature maps;
    # otherwise it silently falls back to masked stores -- still correct).
    o_ref[0, :, :] = acc.astype(o_ref.dtype)


def _vmem_limit_bytes():
    """Scoped-VMEM limit: ~3/4 of physical VMEM, capped at 96 MiB.

    -> ~96 MiB on v5e/v6e (128 MiB physical), ~48 MiB on v7x (64 MiB physical).
    """
    try:
        cap = int(pltpu.get_tpu_info().vmem_capacity_bytes)
    except Exception:
        cap = 64 << 20          # conservative fallback (v7x per-core VMEM)
    return int(min((cap * 3) // 4, 96 << 20))


def partial_bsconv_u(x_nchw, w_dw, b_dw, w_pw):
    """Forward pass of PartialBSConvU.

    x_nchw : (B, C, H, W)     activations (NCHW, matching the PyTorch module)
    w_dw   : (Cr, 1, K, K)    depthwise conv weight (PyTorch layout)
    b_dw   : (Cr,)            depthwise conv bias
    w_pw   : (Cout, C, 1, 1)  pointwise conv weight (PyTorch layout)
    returns (B, Cout, H, W)
    """
    B, C, H, W = x_nchw.shape
    Cr = w_dw.shape[0]
    Cout = w_pw.shape[0]
    KK = KSIZE * KSIZE
    HW = H * W
    Hp, Wp = H + 2 * PAD, W + 2 * PAD
    K_total = KK * Cr + (C - Cr) + 1

    # Fold depthwise taps + bias through the pointwise conv (tiny, done once):
    #   out[co,m] = sum_{k,c<Cr} wpw[co,c]*wdw[c,k] * shift_k(xpad)[c,m]
    #             + sum_{j}      wpw[co,Cr+j]       * x[Cr+j,m]
    #             + sum_{c<Cr}   wpw[co,c]*bdw[c]   * 1
    wdw_taps = jnp.transpose(w_dw[:, 0].reshape(Cr, KK)).astype(jnp.float32)   # (KK, Cr)
    wpw_mat = w_pw[:, :, 0, 0].astype(jnp.float32)                             # (Cout, C)
    w_fused = (wpw_mat[:, None, :Cr] * wdw_taps[None, :, :]).reshape(Cout, KK * Cr)
    b_col = (wpw_mat[:, :Cr] @ b_dw.astype(jnp.float32))[:, None]              # (Cout, 1)
    w_allT = jnp.concatenate([w_fused, wpw_mat[:, Cr:], b_col], axis=1)        # (Cout, K_total)

    # NCHW kept end-to-end; only free reshapes on the HBM side (no transposes).
    x_flat = x_nchw.reshape(B, C, HW)

    # Generation-aware scoped-VMEM limit + (8,128)-padding-aware footprint check.
    def _ru(n, m):
        return -(-n // m) * m
    vmem_limit = _vmem_limit_bytes()
    est_bytes = 4 * (
        2 * _ru(C, 8) * _ru(HW, 128)             # input block (double-buffered)
        + 2 * _ru(Cout, 8) * _ru(HW, 128)        # output block (double-buffered)
        + 2 * _ru(Cout, 8) * _ru(K_total, 128)   # fused weights
        + Cr * _ru(Hp, 8) * _ru(Wp, 128)         # padded depthwise scratch
        + 4 * _ru(K_total, 8) * _ru(HW, 128)     # im2col slab + temporaries headroom
    )
    if est_bytes > vmem_limit:
        # TODO(synk): add a spatial (H) grid axis with PAD-row halo-overlapping
        # input blocks so very large H*W also fits v7x's 64 MiB VMEM.
        raise ValueError(
            f"per-step VMEM footprint ~{est_bytes >> 20} MiB exceeds the scoped "
            f"limit {vmem_limit >> 20} MiB; spatial tiling needed for this H*W")

    out = pl.pallas_call(
        _partial_bsconv_kernel,
        out_shape=jax.ShapeDtypeStruct((B, Cout, HW), x_nchw.dtype),
        grid_spec=pltpu.PrefetchScalarGridSpec(
            num_scalar_prefetch=0,
            grid=(B,),                       # one image per step: >=2 steps at B>=2
            in_specs=[
                pl.BlockSpec((1, C, HW), lambda b: (b, 0, 0)),
                pl.BlockSpec((Cout, K_total), lambda b: (0, 0)),
            ],
            out_specs=pl.BlockSpec((1, Cout, HW), lambda b: (b, 0, 0)),
            scratch_shapes=[
                pltpu.VMEM((Cr, Hp, Wp), jnp.float32),
                pltpu.VMEM((K_total, HW), jnp.float32),
            ],
        ),
        compiler_params=pltpu.CompilerParams(
            dimension_semantics=("parallel",),
            vmem_limit_bytes=vmem_limit,
        ),
    )(x_flat, w_allT)

    return out.reshape(B, Cout, H, W)


def _reference(x_nchw, w_dw, b_dw, w_pw):
    """Pure-JAX (lax.conv) reference matching the PyTorch module."""
    Cr = w_dw.shape[0]
    fea1 = x_nchw[:, :Cr]
    fea2 = x_nchw[:, Cr:]
    dn = lax.conv_dimension_numbers(fea1.shape, w_dw.shape, ("NCHW", "OIHW", "NCHW"))
    fea1 = lax.conv_general_dilated(
        fea1, w_dw, window_strides=(1, 1), padding=((PAD, PAD), (PAD, PAD)),
        dimension_numbers=dn, feature_group_count=Cr)
    fea1 = fea1 + b_dw[None, :, None, None]
    fea = jnp.concatenate([fea1, fea2], axis=1)
    dn2 = lax.conv_dimension_numbers(fea.shape, w_pw.shape, ("NCHW", "OIHW", "NCHW"))
    return lax.conv_general_dilated(
        fea, w_pw, window_strides=(1, 1), padding=((0, 0), (0, 0)),
        dimension_numbers=dn2)


if __name__ == "__main__":
    # Module config: in_channels=4, out_channels=8, kernel_size=5, padding=2, scale=2
    B, C, H, W = 2, 4, 16, 16
    Cout = 8
    scale = 2
    Cr = C // scale            # remaining_channels = 2

    key = jax.random.PRNGKey(0)
    k0, k1, k2, k3 = jax.random.split(key, 4)
    x = jax.random.normal(k0, (B, C, H, W), jnp.float32)
    w_dw = jax.random.normal(k1, (Cr, 1, KSIZE, KSIZE), jnp.float32) * 0.1
    b_dw = jax.random.normal(k2, (Cr,), jnp.float32) * 0.1
    w_pw = jax.random.normal(k3, (Cout, C, 1, 1), jnp.float32) * 0.1

    out = partial_bsconv_u(x, w_dw, b_dw, w_pw)
    jax.block_until_ready(out)

    ref = _reference(x, w_dw, b_dw, w_pw)
    assert out.shape == (B, Cout, H, W)
    assert jnp.allclose(out, ref, atol=1e-4, rtol=1e-4), "mismatch vs reference"

    print("KERNEL_OK")
</pallas_src>

<mosaic_0001>
module attributes {stable_mosaic.version = 11 : i64} {
  func.func @_partial_bsconv_kernel(%arg0: i32, %arg1: memref<1x4x256xf32, #tpu.memory_space<vmem>>, %arg2: memref<8x53xf32, #tpu.memory_space<vmem>>, %arg3: memref<1x8x256xf32, #tpu.memory_space<vmem>>, %arg4: memref<2x20x20xf32, #tpu.memory_space<vmem>>, %arg5: memref<53x256xf32, #tpu.memory_space<vmem>>) attributes {dimension_semantics = [#tpu.dimension_semantics<parallel>], iteration_bounds = array<i64: 2>, scalar_prefetch = 0 : i64, scratch_operands = 2 : i64, tpu.core_type = #tpu.core_type<tc>, window_params = [{transform_indices = @transform_0, window_bounds = array<i64: 1, 4, 256>}, {pipeline_mode = #tpu.pipeline_mode<synchronous>, transform_indices = @transform_1, window_bounds = array<i64: 8, 53>}, {transform_indices = @transform_2, window_bounds = array<i64: 1, 8, 256>}]} {
    %cst = arith.constant 0.000000e+00 : f32
    %0 = vector.broadcast %cst : f32 to vector<2x2x20xf32>
    %c0 = arith.constant 0 : index
    %c0_0 = arith.constant 0 : index
    %c0_1 = arith.constant 0 : index
    %1 = vector.load %arg4[%c0, %c0_0, %c0_1] : memref<2x20x20xf32, #tpu.memory_space<vmem>>, vector<2x2x20xf32>
    tpu.vector_store %arg4[%c0, %c0_0, %c0_1], %0 {strides = array<i32>} : memref<2x20x20xf32, #tpu.memory_space<vmem>>, vector<2x2x20xf32>,
    %cst_2 = arith.constant 0.000000e+00 : f32
    %2 = vector.broadcast %cst_2 : f32 to vector<2x2x20xf32>
    %c0_3 = arith.constant 0 : index
    %c18 = arith.constant 18 : index
    %c0_4 = arith.constant 0 : index
    %3 = vector.load %arg4[%c0_3, %c18, %c0_4] : memref<2x20x20xf32, #tpu.memory_space<vmem>>, vector<2x2x20xf32>
    tpu.vector_store %arg4[%c0_3, %c18, %c0_4], %2 {strides = array<i32>} : memref<2x20x20xf32, #tpu.memory_space<vmem>>, vector<2x2x20xf32>,
    %cst_5 = arith.constant 0.000000e+00 : f32
    %4 = vector.broadcast %cst_5 : f32 to vector<2x16x2xf32>
    %c0_6 = arith.constant 0 : index
    %c2 = arith.constant 2 : index
    %c0_7 = arith.constant 0 : index
    %5 = vector.load %arg4[%c0_6, %c2, %c0_7] : memref<2x20x20xf32, #tpu.memory_space<vmem>>, vector<2x16x2xf32>
    tpu.vector_store %arg4[%c0_6, %c2, %c0_7], %4 {strides = array<i32>} : memref<2x20x20xf32, #tpu.memory_space<vmem>>, vector<2x16x2xf32>,
    %cst_8 = arith.constant 0.000000e+00 : f32
    %6 = vector.broadcast %cst_8 : f32 to vector<2x16x2xf32>
    %c0_9 = arith.constant 0 : index
    %c2_10 = arith.constant 2 : index
    %c18_11 = arith.constant 18 : index
    %7 = vector.load %arg4[%c0_9, %c2_10, %c18_11] : memref<2x20x20xf32, #tpu.memory_space<vmem>>, vector<2x16x2xf32>
    tpu.vector_store %arg4[%c0_9, %c2_10, %c18_11], %6 {strides = array<i32>} : memref<2x20x20xf32, #tpu.memory_space<vmem>>, vector<2x16x2xf32>,
    %c0_12 = arith.constant 0 : index
    %c0_13 = arith.constant 0 : index
    %c0_14 = arith.constant 0 : index
    %8 = vector.load %arg1[%c0_12, %c0_13, %c0_14] : memref<1x4x256xf32, #tpu.memory_space<vmem>>, vector<1x2x256xf32>
    %9 = vector.shape_cast %8 : vector<1x2x256xf32> to vector<2x256xf32>
    %10 = vector.shape_cast %9 : vector<2x256xf32> to vector<2x16x16xf32>
    %c0_15 = arith.constant 0 : index
    %c2_16 = arith.constant 2 : index
    %c2_17 = arith.constant 2 : index
    %11 = vector.load %arg4[%c0_15, %c2_16, %c2_17] : memref<2x20x20xf32, #tpu.memory_space<vmem>>, vector<2x16x16xf32>
    tpu.vector_store %arg4[%c0_15, %c2_16, %c2_17], %10 {strides = array<i32>} : memref<2x20x20xf32, #tpu.memory_space<vmem>>, vector<2x16x16xf32>,
    %c0_18 = arith.constant 0 : index
    %c0_19 = arith.constant 0 : index
    %c0_20 = arith.constant 0 : index
    %12 = vector.load %arg4[%c0_18, %c0_19, %c0_20] : memref<2x20x20xf32, #tpu.memory_space<vmem>>, vector<2x16x16xf32>
    %13 = vector.shape_cast %12 : vector<2x16x16xf32> to vector<2x256xf32>
    %c0_21 = arith.constant 0 : index
    %c0_22 = arith.constant 0 : index
    %14 = vector.load %arg5[%c0_21, %c0_22] : memref<53x256xf32, #tpu.memory_space<vmem>>, vector<2x256xf32>
    tpu.vector_store %arg5[%c0_21, %c0_22], %13 {strides = array<i32>} : memref<53x256xf32, #tpu.memory_space<vmem>>, vector<2x256xf32>,
    %c0_23 = arith.constant 0 : index
    %c0_24 = arith.constant 0 : index
    %c1 = arith.constant 1 : index
    %15 = vector.load %arg4[%c0_23, %c0_24, %c1] : memref<2x20x20xf32, #tpu.memory_space<vmem>>, vector<2x16x16xf32>
    %16 = vector.shape_cast %15 : vector<2x16x16xf32> to vector<2x256xf32>
    %c2_25 = arith.constant 2 : index
    %c0_26 = arith.constant 0 : index
    %17 = vector.load %arg5[%c2_25, %c0_26] : memref<53x256xf32, #tpu.memory_space<vmem>>, vector<2x256xf32>
    tpu.vector_store %arg5[%c2_25, %c0_26], %16 {strides = array<i32>} : memref<53x256xf32, #tpu.memory_space<vmem>>, vector<2x256xf32>,
    %c0_27 = arith.constant 0 : index
    %c0_28 = arith.constant 0 : index
    %c2_29 = arith.constant 2 : index
    %18 = vector.load %arg4[%c0_27, %c0_28, %c2_29] : memref<2x20x20xf32, #tpu.memory_space<vmem>>, vector<2x16x16xf32>
    %19 = vector.shape_cast %18 : vector<2x16x16xf32> to vector<2x256xf32>
    %c4 = arith.constant 4 : index
    %c0_30 = arith.constant 0 : index
    %20 = vector.load %arg5[%c4, %c0_30] : memref<53x256xf32, #tpu.memory_space<vmem>>, vector<2x256xf32>
    tpu.vector_store %arg5[%c4, %c0_30], %19 {strides = array<i32>} : memref<53x256xf32, #tpu.memory_space<vmem>>, vector<2x256xf32>,
    %c0_31 = arith.constant 0 : index
    %c0_32 = arith.constant 0 : index
    %c3 = arith.constant 3 : index
    %21 = vector.load %arg4[%c0_31, %c0_32, %c3] : memref<2x20x20xf32, #tpu.memory_space<vmem>>, vector<2x16x16xf32>
    %22 = vector.shape_cast %21 : vector<2x16x16xf32> to vector<2x256xf32>
    %c6 = arith.constant 6 : index
    %c0_33 = arith.constant 0 : index
    %23 = vector.load %arg5[%c6, %c0_33] : memref<53x256xf32, #tpu.memory_space<vmem>>, vector<2x256xf32>
    tpu.vector_store %arg5[%c6, %c0_33], %22 {strides = array<i32>} : memref<53x256xf32, #tpu.memory_space<vmem>>, vector<2x256xf32>,
    %c0_34 = arith.constant 0 : index
    %c0_35 = arith.constant 0 : index
    %c4_36 = arith.constant 4 : index
    %24 = vector.load %arg4[%c0_34, %c0_35, %c4_36] : memref<2x20x20xf32, #tpu.memory_space<vmem>>, vector<2x16x16xf32>
    %25 = vector.shape_cast %24 : vector<2x16x16xf32> to vector<2x256xf32>
    %c8 = arith.constant 8 : index
    %c0_37 = arith.constant 0 : index
    %26 = vector.load %arg5[%c8, %c0_37] : memref<53x256xf32, #tpu.memory_space<vmem>>, vector<2x256xf32>
    tpu.vector_store %arg5[%c8, %c0_37], %25 {strides = array<i32>} : memref<53x256xf32, #tpu.memory_space<vmem>>, vector<2x256xf32>,
    %c0_38 = arith.constant 0 : index
    %c1_39 = arith.constant 1 : index
    %c0_40 = arith.constant 0 : index
    %27 = vector.load %arg4[%c0_38, %c1_39, %c0_40] : memref<2x20x20xf32, #tpu.memory_space<vmem>>, vector<2x16x16xf32>
    %28 = vector.shape_cast %27 : vector<2x16x16xf32> to vector<2x256xf32>
    %c10 = arith.constant 10 : index
    %c0_41 = arith.constant 0 : index
    %29 = vector.load %arg5[%c10, %c0_41] : memref<53x256xf32, #tpu.memory_space<vmem>>, vector<2x256xf32>
    tpu.vector_store %arg5[%c10, %c0_41], %28 {strides = array<i32>} : memref<53x256xf32, #tpu.memory_space<vmem>>, vector<2x256xf32>,
    %c0_42 = arith.constant 0 : index
    %c1_43 = arith.constant 1 : index
    %c1_44 = arith.constant 1 : index
    %30 = vector.load %arg4[%c0_42, %c1_43, %c1_44] : memref<2x20x20xf32, #tpu.memory_space<vmem>>, vector<2x16x16xf32>
    %31 = vector.shape_cast %30 : vector<2x16x16xf32> to vector<2x256xf32>
    %c12 = arith.constant 12 : index
    %c0_45 = arith.constant 0 : index
    %32 = vector.load %arg5[%c12, %c0_45] : memref<53x256xf32, #tpu.memory_space<vmem>>, vector<2x256xf32>
    tpu.vector_store %arg5[%c12, %c0_45], %31 {strides = array<i32>} : memref<53x256xf32, #tpu.memory_space<vmem>>, vector<2x256xf32>,
    %c0_46 = arith.constant 0 : index
    %c1_47 = arith.constant 1 : index
    %c2_48 = arith.constant 2 : index
    %33 = vector.load %arg4[%c0_46, %c1_47, %c2_48] : memref<2x20x20xf32, #tpu.memory_space<vmem>>, vector<2x16x16xf32>
    %34 = vector.shape_cast %33 : vector<2x16x16xf32> to vector<2x256xf32>
    %c14 = arith.constant 14 : index
    %c0_49 = arith.constant 0 : index
    %35 = vector.load %arg5[%c14, %c0_49] : memref<53x256xf32, #tpu.memory_space<vmem>>, vector<2x256xf32>
    tpu.vector_store %arg5[%c14, %c0_49], %34 {strides = array<i32>} : memref<53x256xf32, #tpu.memory_space<vmem>>, vector<2x256xf32>,
    %c0_50 = arith.constant 0 : index
    %c1_51 = arith.constant 1 : index
    %c3_52 = arith.constant 3 : index
    %36 = vector.load %arg4[%c0_50, %c1_51, %c3_52] : memref<2x20x20xf32, #tpu.memory_space<vmem>>, vector<2x16x16xf32>
    %37 = vector.shape_cast %36 : vector<2x16x16xf32> to vector<2x256xf32>
    %c16 = arith.constant 16 : index
    %c0_53 = arith.constant 0 : index
    %38 = vector.load %arg5[%c16, %c0_53] : memref<53x256xf32, #tpu.memory_space<vmem>>, vector<2x256xf32>
    tpu.vector_store %arg5[%c16, %c0_53], %37 {strides = array<i32>} : memref<53x256xf32, #tpu.memory_space<vmem>>, vector<2x256xf32>,
    %c0_54 = arith.constant 0 : index
    %c1_55 = arith.constant 1 : index
    %c4_56 = arith.constant 4 : index
    %39 = vector.load %arg4[%c0_54, %c1_55, %c4_56] : memref<2x20x20xf32, #tpu.memory_space<vmem>>, vector<2x16x16xf32>
    %40 = vector.shape_cast %39 : vector<2x16x16xf32> to vector<2x256xf32>
    %c18_57 = arith.constant 18 : index
    %c0_58 = arith.constant 0 : index
    %41 = vector.load %arg5[%c18_57, %c0_58] : memref<53x256xf32, #tpu.memory_space<vmem>>, vector<2x256xf32>
    tpu.vector_store %arg5[%c18_57, %c0_58], %40 {strides = array<i32>} : memref<53x256xf32, #tpu.memory_space<vmem>>, vector<2x256xf32>,
    %c0_59 = arith.constant 0 : index
    %c2_60 = arith.constant 2 : index
    %c0_61 = arith.constant 0 : index
    %42 = vector.load %arg4[%c0_59, %c2_60, %c0_61] : memref<2x20x20xf32, #tpu.memory_space<vmem>>, vector<2x16x16xf32>
    %43 = vector.shape_cast %42 : vector<2x16x16xf32> to vector<2x256xf32>
    %c20 = arith.constant 20 : index
    %c0_62 = arith.constant 0 : index
    %44 = vector.load %arg5[%c20, %c0_62] : memref<53x256xf32, #tpu.memory_space<vmem>>, vector<2x256xf32>
    tpu.vector_store %arg5[%c20, %c0_62], %43 {strides = array<i32>} : memref<53x256xf32, #tpu.memory_space<vmem>>, vector<2x256xf32>,
    %c0_63 = arith.constant 0 : index
    %c2_64 = arith.constant 2 : index
    %c1_65 = arith.constant 1 : index
    %45 = vector.load %arg4[%c0_63, %c2_64, %c1_65] : memref<2x20x20xf32, #tpu.memory_space<vmem>>, vector<2x16x16xf32>
    %46 = vector.shape_cast %45 : vector<2x16x16xf32> to vector<2x256xf32>
    %c22 = arith.constant 22 : index
    %c0_66 = arith.constant 0 : index
    %47 = vector.load %arg5[%c22, %c0_66] : memref<53x256xf32, #tpu.memory_space<vmem>>, vector<2x256xf32>
    tpu.vector_store %arg5[%c22, %c0_66], %46 {strides = array<i32>} : memref<53x256xf32, #tpu.memory_space<vmem>>, vector<2x256xf32>,
    %c0_67 = arith.constant 0 : index
    %c2_68 = arith.constant 2 : index
    %c2_69 = arith.constant 2 : index
    %48 = vector.load %arg4[%c0_67, %c2_68, %c2_69] : memref<2x20x20xf32, #tpu.memory_space<vmem>>, vector<2x16x16xf32>
    %49 = vector.shape_cast %48 : vector<2x16x16xf32> to vector<2x256xf32>
    %c24 = arith.constant 24 : index
    %c0_70 = arith.constant 0 : index
    %50 = vector.load %arg5[%c24, %c0_70] : memref<53x256xf32, #tpu.memory_space<vmem>>, vector<2x256xf32>
    tpu.vector_store %arg5[%c24, %c0_70], %49 {strides = array<i32>} : memref<53x256xf32, #tpu.memory_space<vmem>>, vector<2x256xf32>,
    %c0_71 = arith.constant 0 : index
    %c2_72 = arith.constant 2 : index
    %c3_73 = arith.constant 3 : index
    %51 = vector.load %arg4[%c0_71, %c2_72, %c3_73] : memref<2x20x20xf32, #tpu.memory_space<vmem>>, vector<2x16x16xf32>
    %52 = vector.shape_cast %51 : vector<2x16x16xf32> to vector<2x256xf32>
    %c26 = arith.constant 26 : index
    %c0_74 = arith.constant 0 : index
    %53 = vector.load %arg5[%c26, %c0_74] : memref<53x256xf32, #tpu.memory_space<vmem>>, vector<2x256xf32>
    tpu.vector_store %arg5[%c26, %c0_74], %52 {strides = array<i32>} : memref<53x256xf32, #tpu.memory_space<vmem>>, vector<2x256xf32>,
    %c0_75 = arith.constant 0 : index
    %c2_76 = arith.constant 2 : index
    %c4_77 = arith.constant 4 : index
    %54 = vector.load %arg4[%c0_75, %c2_76, %c4_77] : memref<2x20x20xf32, #tpu.memory_space<vmem>>, vector<2x16x16xf32>
    %55 = vector.shape_cast %54 : vector<2x16x16xf32> to vector<2x256xf32>
    %c28 = arith.constant 28 : index
    %c0_78 = arith.constant 0 : index
    %56 = vector.load %arg5[%c28, %c0_78] : memref<53x256xf32, #tpu.memory_space<vmem>>, vector<2x256xf32>
    tpu.vector_store %arg5[%c28, %c0_78], %55 {strides = array<i32>} : memref<53x256xf32, #tpu.memory_space<vmem>>, vector<2x256xf32>,
    %c0_79 = arith.constant 0 : index
    %c3_80 = arith.constant 3 : index
    %c0_81 = arith.constant 0 : index
    %57 = vector.load %arg4[%c0_79, %c3_80, %c0_81] : memref<2x20x20xf32, #tpu.memory_space<vmem>>, vector<2x16x16xf32>
    %58 = vector.shape_cast %57 : vector<2x16x16xf32> to vector<2x256xf32>
    %c30 = arith.constant 30 : index
    %c0_82 = arith.constant 0 : index
    %59 = vector.load %arg5[%c30, %c0_82] : memref<53x256xf32, #tpu.memory_space<vmem>>, vector<2x256xf32>
    tpu.vector_store %arg5[%c30, %c0_82], %58 {strides = array<i32>} : memref<53x256xf32, #tpu.memory_space<vmem>>, vector<2x256xf32>,
    %c0_83 = arith.constant 0 : index
    %c3_84 = arith.constant 3 : index
    %c1_85 = arith.constant 1 : index
    %60 = vector.load %arg4[%c0_83, %c3_84, %c1_85] : memref<2x20x20xf32, #tpu.memory_space<vmem>>, vector<2x16x16xf32>
    %61 = vector.shape_cast %60 : vector<2x16x16xf32> to vector<2x256xf32>
    %c32 = arith.constant 32 : index
    %c0_86 = arith.constant 0 : index
    %62 = vector.load %arg5[%c32, %c0_86] : memref<53x256xf32, #tpu.memory_space<vmem>>, vector<2x256xf32>
    tpu.vector_store %arg5[%c32, %c0_86], %61 {strides = array<i32>} : memref<53x256xf32, #tpu.memory_space<vmem>>, vector<2x256xf32>,
    %c0_87 = arith.constant 0 : index
    %c3_88 = arith.constant 3 : index
    %c2_89 = arith.constant 2 : index
    %63 = vector.load %arg4[%c0_87, %c3_88, %c2_89] : memref<2x20x20xf32, #tpu.memory_space<vmem>>, vector<2x16x16xf32>
    %64 = vector.shape_cast %63 : vector<2x16x16xf32> to vector<2x256xf32>
    %c34 = arith.constant 34 : index
    %c0_90 = arith.constant 0 : index
    %65 = vector.load %arg5[%c34, %c0_90] : memref<53x256xf32, #tpu.memory_space<vmem>>, vector<2x256xf32>
    tpu.vector_store %arg5[%c34, %c0_90], %64 {strides = array<i32>} : memref<53x256xf32, #tpu.memory_space<vmem>>, vector<2x256xf32>,
    %c0_91 = arith.constant 0 : index
    %c3_92 = arith.constant 3 : index
    %c3_93 = arith.constant 3 : index
    %66 = vector.load %arg4[%c0_91, %c3_92, %c3_93] : memref<2x20x20xf32, #tpu.memory_space<vmem>>, vector<2x16x16xf32>
    %67 = vector.shape_cast %66 : vector<2x16x16xf32> to vector<2x256xf32>
    %c36 = arith.constant 36 : index
    %c0_94 = arith.constant 0 : index
    %68 = vector.load %arg5[%c36, %c0_94] : memref<53x256xf32, #tpu.memory_space<vmem>>, vector<2x256xf32>
    tpu.vector_store %arg5[%c36, %c0_94], %67 {strides = array<i32>} : memref<53x256xf32, #tpu.memory_space<vmem>>, vector<2x256xf32>,
    %c0_95 = arith.constant 0 : index
    %c3_96 = arith.constant 3 : index
    %c4_97 = arith.constant 4 : index
    %69 = vector.load %arg4[%c0_95, %c3_96, %c4_97] : memref<2x20x20xf32, #tpu.memory_space<vmem>>, vector<2x16x16xf32>
    %70 = vector.shape_cast %69 : vector<2x16x16xf32> to vector<2x256xf32>
    %c38 = arith.constant 38 : index
    %c0_98 = arith.constant 0 : index
    %71 = vector.load %arg5[%c38, %c0_98] : memref<53x256xf32, #tpu.memory_space<vmem>>, vector<2x256xf32>
    tpu.vector_store %arg5[%c38, %c0_98], %70 {strides = array<i32>} : memref<53x256xf32, #tpu.memory_space<vmem>>, vector<2x256xf32>,
    %c0_99 = arith.constant 0 : index
    %c4_100 = arith.constant 4 : index
    %c0_101 = arith.constant 0 : index
    %72 = vector.load %arg4[%c0_99, %c4_100, %c0_101] : memref<2x20x20xf32, #tpu.memory_space<vmem>>, vector<2x16x16xf32>
    %73 = vector.shape_cast %72 : vector<2x16x16xf32> to vector<2x256xf32>
    %c40 = arith.constant 40 : index
    %c0_102 = arith.constant 0 : index
    %74 = vector.load %arg5[%c40, %c0_102] : memref<53x256xf32, #tpu.memory_space<vmem>>, vector<2x256xf32>
    tpu.vector_store %arg5[%c40, %c0_102], %73 {strides = array<i32>} : memref<53x256xf32, #tpu.memory_space<vmem>>, vector<2x256xf32>,
    %c0_103 = arith.constant 0 : index
    %c4_104 = arith.constant 4 : index
    %c1_105 = arith.constant 1 : index
    %75 = vector.load %arg4[%c0_103, %c4_104, %c1_105] : memref<2x20x20xf32, #tpu.memory_space<vmem>>, vector<2x16x16xf32>
    %76 = vector.shape_cast %75 : vector<2x16x16xf32> to vector<2x256xf32>
    %c42 = arith.constant 42 : index
    %c0_106 = arith.constant 0 : index
    %77 = vector.load %arg5[%c42, %c0_106] : memref<53x256xf32, #tpu.memory_space<vmem>>, vector<2x256xf32>
    tpu.vector_store %arg5[%c42, %c0_106], %76 {strides = array<i32>} : memref<53x256xf32, #tpu.memory_space<vmem>>, vector<2x256xf32>,
    %c0_107 = arith.constant 0 : index
    %c4_108 = arith.constant 4 : index
    %c2_109 = arith.constant 2 : index
    %78 = vector.load %arg4[%c0_107, %c4_108, %c2_109] : memref<2x20x20xf32, #tpu.memory_space<vmem>>, vector<2x16x16xf32>
    %79 = vector.shape_cast %78 : vector<2x16x16xf32> to vector<2x256xf32>
    %c44 = arith.constant 44 : index
    %c0_110 = arith.constant 0 : index
    %80 = vector.load %arg5[%c44, %c0_110] : memref<53x256xf32, #tpu.memory_space<vmem>>, vector<2x256xf32>
    tpu.vector_store %arg5[%c44, %c0_110], %79 {strides = array<i32>} : memref<53x256xf32, #tpu.memory_space<vmem>>, vector<2x256xf32>,
    %c0_111 = arith.constant 0 : index
    %c4_112 = arith.constant 4 : index
    %c3_113 = arith.constant 3 : index
    %81 = vector.load %arg4[%c0_111, %c4_112, %c3_113] : memref<2x20x20xf32, #tpu.memory_space<vmem>>, vector<2x16x16xf32>
    %82 = vector.shape_cast %81 : vector<2x16x16xf32> to vector<2x256xf32>
    %c46 = arith.constant 46 : index
    %c0_114 = arith.constant 0 : index
    %83 = vector.load %arg5[%c46, %c0_114] : memref<53x256xf32, #tpu.memory_space<vmem>>, vector<2x256xf32>
    tpu.vector_store %arg5[%c46, %c0_114], %82 {strides = array<i32>} : memref<53x256xf32, #tpu.memory_space<vmem>>, vector<2x256xf32>,
    %c0_115 = arith.constant 0 : index
    %c4_116 = arith.constant 4 : index
    %c4_117 = arith.constant 4 : index
    %84 = vector.load %arg4[%c0_115, %c4_116, %c4_117] : memref<2x20x20xf32, #tpu.memory_space<vmem>>, vector<2x16x16xf32>
    %85 = vector.shape_cast %84 : vector<2x16x16xf32> to vector<2x256xf32>
    %c48 = arith.constant 48 : index
    %c0_118 = arith.constant 0 : index
    %86 = vector.load %arg5[%c48, %c0_118] : memref<53x256xf32, #tpu.memory_space<vmem>>, vector<2x256xf32>
    tpu.vector_store %arg5[%c48, %c0_118], %85 {strides = array<i32>} : memref<53x256xf32, #tpu.memory_space<vmem>>, vector<2x256xf32>,
    %c0_119 = arith.constant 0 : index
    %c2_120 = arith.constant 2 : index
    %c0_121 = arith.constant 0 : index
    %87 = vector.load %arg1[%c0_119, %c2_120, %c0_121] : memref<1x4x256xf32, #tpu.memory_space<vmem>>, vector<1x2x256xf32>
    %88 = vector.shape_cast %87 : vector<1x2x256xf32> to vector<2x256xf32>
    %c50 = arith.constant 50 : index
    %c0_122 = arith.constant 0 : index
    %89 = vector.load %arg5[%c50, %c0_122] : memref<53x256xf32, #tpu.memory_space<vmem>>, vector<2x256xf32>
    tpu.vector_store %arg5[%c50, %c0_122], %88 {strides = array<i32>} : memref<53x256xf32, #tpu.memory_space<vmem>>, vector<2x256xf32>,
    %cst_123 = arith.constant 1.000000e+00 : f32
    %90 = vector.broadcast %cst_123 : f32 to vector<1x256xf32>
    %c52 = arith.constant 52 : index
    %c0_124 = arith.constant 0 : index
    %91 = vector.load %arg5[%c52, %c0_124] : memref<53x256xf32, #tpu.memory_space<vmem>>, vector<1x256xf32>
    tpu.vector_store %arg5[%c52, %c0_124], %90 {strides = array<i32>} : memref<53x256xf32, #tpu.memory_space<vmem>>, vector<1x256xf32>,
    %c0_125 = arith.constant 0 : index
    %c0_126 = arith.constant 0 : index
    %92 = vector.load %arg2[%c0_125, %c0_126] : memref<8x53xf32, #tpu.memory_space<vmem>>, vector<8x53xf32>
    %c0_127 = arith.constant 0 : index
    %c0_128 = arith.constant 0 : index
    %93 = vector.load %arg5[%c0_127, %c0_128] : memref<53x256xf32, #tpu.memory_space<vmem>>, vector<53x256xf32>
    %cst_129 = arith.constant dense<0.000000e+00> : vector<8x256xf32>
    %94 = tpu.matmul %92, %93, %cst_129 {dimension_numbers = #tpu.dot_dimension_numbers<[1], [0], [0], [1], [0, 0, 1, 1], [], []>} : vector<8x53xf32>, vector<53x256xf32>, vector<8x256xf32> -> vector<8x256xf32>
    %c0_130 = arith.constant 0 : index
    %c0_131 = arith.constant 0 : index
    %c0_132 = arith.constant 0 : index
    %95 = vector.load %arg3[%c0_130, %c0_131, %c0_132] : memref<1x8x256xf32, #tpu.memory_space<vmem>>, vector<1x8x256xf32>
    %96 = vector.shape_cast %95 : vector<1x8x256xf32> to vector<8x256xf32>
    %97 = vector.shape_cast %94 : vector<8x256xf32> to vector<1x8x256xf32>
    tpu.vector_store %arg3[%c0_130, %c0_131, %c0_132], %97 {strides = array<i32>} : memref<1x8x256xf32, #tpu.memory_space<vmem>>, vector<1x8x256xf32>,
    return
  }
  func.func @transform_0(%arg0: i32) -> (i32, i32, i32) {
    %c0_i32 = arith.constant 0 : i32
    %c0_i32_0 = arith.constant 0 : i32
    %c0_i32_1 = arith.constant 0 : i32
    return %arg0, %c0_i32, %c0_i32_0 : i32, i32, i32
  }
  func.func @transform_1(%arg0: i32) -> (i32, i32) {
    %c0_i32 = arith.constant 0 : i32
    %c0_i32_0 = arith.constant 0 : i32
    %c0_i32_1 = arith.constant 0 : i32
    return %c0_i32, %c0_i32_0 : i32, i32
  }
  func.func @transform_2(%arg0: i32) -> (i32, i32, i32) {
    %c0_i32 = arith.constant 0 : i32
    %c0_i32_0 = arith.constant 0 : i32
    %c0_i32_1 = arith.constant 0 : i32
    return %arg0, %c0_i32, %c0_i32_0 : i32, i32, i32
  }
}

</mosaic_0001>

<bundles_post_ra>
// kernel: tpu_custom_call.1
= control target key start
LH: loop header
LB: loop body
LE: loop exit
PB: predicated region body
PF: predicated region fallthrough
CT: control target
= control target key end

     0   :  { %7 = vsyncpa [#allocation5], 0  ;;  %s10037_s0 = inlined_call_operand.hbm [shape: f32[2,4,256], index: 0, kind: input, shape index: {}]   ;;  %s10038_s1 = inlined_call_operand.hbm [shape: f32[8,53], index: 1, kind: input, shape index: {}]   ;;  %s10039_s2 = inlined_call_operand.hbm [shape: f32[2,8,256], index: 2, kind: output, shape index: {}]  }
   0x1   :  { %9 = vsyncpa [#allocation5 + $0x1], 0 }
   0x2   :  { %10 = vsyncpa [#allocation8], 0 }
   0x3   :  { %11 = vsyncpa [#allocation6], 0 }
   0x4   :  { %13 = vsyncpa [#allocation6 + $0x1], 0  ;;  %s6477_s9 = smov 0   ;;  %s6479_s10 = smov 0  }
   0x5   :  { %s6481_s11 = smov 0   ;;  %s6483_s12 = smov 0  }
   0x6 LB: > { %s6498_s13 = sadd.s32 4294967295, %s6441_s12   ;;  %s6198_s14 = sadd.s32 4294967294, %s6441_s12   ;;  %s6441_s12 = sphi %s6483_s12, %s10390_s12   ;;  %s6437_s11 = sphi %s6481_s11, %s10389_s11   ;;  %s6433_s10 = sphi %s6479_s10, %s10388_s10   ;;  %s6429_s9 = sphi %s6477_s9, %s10387_s9  }
   0x7   : > { %p39_p0 = scmp.ne.s32.totalorder %s6433_s10, %s6429_s9  ;;  %p10040_p1 = scmp.eq.s32.totalorder %s6498_s13, 0 }
   0x8   : > { %p90_p3 = scmp.eq.s32.totalorder %s6198_s14, 1  ;;  %p6199_p5 = scmp.ge.s32.totalorder %s6441_s12, 1 }
   0x9   : > { %p6507_p4 = por %p10040_p1, %p39_p0  ;;  %p97_p7 = scmp.lt.s32.totalorder %s6441_s12, 3 }
   0xa   : > { %p6512_p6 = por %p90_p3, %p39_p0  ;;  %s6443_s18 = smov [#allocation7]  }
   0xb   : > { %s10133_s15 = scalar_select %p6507_p4, 1, 0 }
   0xc   : > { %s10134_s16 = scalar_select %p6512_p6, 1, 0 }
   0xd   : > { %p6517_p8 = pnand %p6199_p5, %p97_p7  ;;  %s110_s19 = sshll.u32 %s6443_s18, 4  ;;  %s111_s19 = int_to_ptr.vmem [resolvable:$true] %s110_s19 }
   0xe   : > { %s6525_s20 = sadd.s32 1, %s6441_s12   ;;  %s26_s24 = sadd.s32 1, %s6437_s11 }
   0xf   : > { %s10135_s17 = scalar_select %p6517_p8, 1, 0 }
  0x10   : > { %p6241_p10 = pneg %p6517_p8  ;;  %s23_s22 = ssub.s32 %s6441_s12, %s6525_s20 }
  0x11   : > { %p6535_p12 = scmp.eq.s32.totalorder %s23_s22, 0  ;;  %s6313_s27 = scalar_lea.hbm %s10038_s1, 128 }
  0x12   : > { %p6529_p11 = pnand %p6241_p10, %p10040_p1  ;;  %p6314_p0 = scmp.ne.s32.totalorder %s10038_s1, %s6313_s27 }
  0x13   : > { %s10137_s23 = scalar_select %p6535_p12, 1, 0 }
  0x14   : > { %p6315_p3 = pneg %p6529_p11  ;;  %p6320_p10 = scmp.lt.u32.totalorder %s6313_s27, %s10038_s1 }
  0x16   : > { %p6316_p5 = pnand %p6315_p3, %p6314_p0 }
  0x18   : > { %p6317_p7 = pneg %p6316_p5 }
  0x1a   : > { %p6322_p9 = pnand %p6320_p10, %p6317_p7 }
  0x1c   : > { %6325 = shalt.err (!%p6322_p9)
}
  0x1d   : > { %s6326_s4 = scalar_lea.vmem %s111_s19, 128  ;;  %p6334_p6 = scmp.lt.s32.totalorder %s111_s19, %s111_s19 }
  0x1e   : > { %p6327_p1 = scmp.ne.s32.totalorder %s111_s19, %s6326_s4  ;;  %p6335_p4 = scmp.lt.s32.totalorder %s6326_s4, %s6326_s4 }
  0x20   : > { %p6329_p2 = pnand %p6327_p1, %p6315_p3  ;;  %p6336_p8 = por %p6335_p4, %p6334_p6 }
  0x22   : > { %p6330_p13 = pneg %p6329_p2 }
  0x24   : > { %p6337_p12 = pnand %p6336_p8, %p6330_p13 }
  0x26   : > { %6340 = shalt.err (!%p6337_p12)
}
  0x27   : > { %6244 = dma.hbm_to_vmem [thread:$0]  (!%p6529_p11), %s10038_s1, 128, %s111_s19, [#allocation8]  }
  0x28   : > { %p10138_p1 = scmp.ne.s32.totalorder %s10137_s23, 0  ;;  %p34_p2 = scmp.eq.s32.totalorder %s6441_s12, 0 }
  0x29   : > { %p10139_p4 = scmp.ne.s32.totalorder %s6437_s11, %s6433_s10  ;;  %p10140_p6 = scmp.eq.s32.totalorder %s6498_s13, 1 }
  0x2a   : > { %s6561_s7 = scalar_select %p10138_p1, %s6437_s11, %s26_s24  }
  0x2b   : > { %p6569_p8 = por %p10140_p6, %p10139_p4  ;;  %p6254_p9 = scmp.lt.s32.totalorder %s6441_s12, 2 }
  0x2c   : > { %s121_s14 = sand.u32 1, %s6437_s11   ;;  %p10142_p12 = pmov %p10139_p4 }
  0x2d   : > { %s6202_s18 = sshll.u32 %s121_s14, 3  ;;  %s6219_s21 = sshll.u32 %s6441_s12, 7 }
  0x2e   : > { %p35_p13 = por %p34_p2, %p10142_p12  ;;  %s6582_s19 = scalar_lea.hbm %s10037_s0, %s6219_s21 }
  0x2f   : > { %s125_s23 = scalar_lea.vmem [#allocation4], %s6202_s18  ;;  %s122_s27 = scalar_lea.sflag [#allocation5], %s121_s14 }
  0x30   : > { %s133_s24 = sshll.u32 %s125_s23, 4  ;;  %p6584_p11 = pnand %p6254_p9, %p35_p13  ;;  %s6588_s24 = int_to_ptr.vmem [resolvable:$true] %s133_s24 }
  0x31   : > { %s6341_s28 = scalar_lea.hbm %s6582_s19, 128  ;;  %s6346_s3 = scalar_lea.hbm %s10037_s0, 256 }
  0x32   : > { %p6342_p0 = scmp.ne.s32.totalorder %s6582_s19, %s6341_s28  ;;  %p6343_p3 = pneg %p6584_p11 }
  0x33   : > { %p6347_p10 = scmp.lt.u32.totalorder %s6582_s19, %s10037_s0  ;;  %p6348_p1 = scmp.lt.u32.totalorder %s6346_s3, %s6341_s28 }
  0x34   : > { %p6344_p5 = pnand %p6343_p3, %p6342_p0  ;;  %p6350_p4 = scmp.lt.u32.totalorder %s6341_s28, %s6582_s19 }
  0x35   : > { %p6349_p2 = por %p6348_p1, %p6347_p10 }
  0x36   : > { %p6345_p7 = pneg %p6344_p5 }
  0x37   : > { %p6351_p6 = por %p6350_p4, %p6349_p2 }
  0x39   : > { %p6352_p9 = pnand %p6351_p6, %p6345_p7 }
  0x3b   : > { %6355 = shalt.err (!%p6352_p9)
}
  0x3c   : > { %s6356_s6 = scalar_lea.vmem %s6588_s24, 128  ;;  %s6444_s14 = smov [#allocation4]  }
  0x3d   : > { %p6357_p12 = scmp.ne.s32.totalorder %s6588_s24, %s6356_s6  ;;  %s6361_s18 = sshll.u32 %s6444_s14, 4  ;;  %s6362_s18 = int_to_ptr.vmem [resolvable:$false] %s6361_s18 }
  0x3e   : > { %s6363_s21 = scalar_lea.vmem %s6362_s18, 256  ;;  %p6364_p5 = scmp.lt.s32.totalorder %s6588_s24, %s6362_s18 }
  0x3f   : > { %p6359_p13 = pnand %p6357_p12, %p6343_p3  ;;  %p6365_p10 = scmp.lt.s32.totalorder %s6363_s21, %s6356_s6 }
  0x41   : > { %p6360_p0 = pneg %p6359_p13  ;;  %p6366_p1 = por %p6365_p10, %p6364_p5 }
  0x43   : > { %p6367_p2 = pnand %p6366_p1, %p6360_p0 }
  0x45   : > { %6370 = shalt.err (!%p6367_p2)
}
  0x46   : > { %6248 = dma.hbm_to_vmem [thread:$0]  (!%p6584_p11), %s6582_s19, 128, %s6588_s24, %s122_s27  }
  0x47   : > { %p10144_p7 = scmp.ne.s32.totalorder %s10135_s17, 0 }
  0x49   : > { %142 = sbr.rel (%p10144_p7) target bundleno = 2077 (0x81d), region = 28 }
  0x50   : > { %s6618_s22 = sand.u32 1, %s6433_s10   ;;  %p10145_p3 = scmp.ne.s32.totalorder %s10133_s15, 0 }
  0x51   : > { %s6206_s25 = sshll.u32 %s6618_s22, 3  ;;  %s145_s23 = scalar_lea.sflag [#allocation5], %s6618_s22 }
  0x52   : > { %s6622_s28 = scalar_lea.vmem [#allocation4], %s6206_s25 }
  0x53   : > { %6416 = dma.done.wait (%p10145_p3), %s145_s23, 128  }
  0x54   : > { %6418 = vsyncadd (%p10145_p3), %s145_s23, 4294967168  ;;  %p10146_p11 = scmp.eq.s32.totalorder %s6498_s13, 0 }
  0x56   : > { %6420 = dma.done.wait (%p10146_p11), [#allocation8], 128   ;;  %p10147_p4 = pmov %p10146_p11 }
  0x57   : > { %v188_v0 = vld [vmem:[%s6622_s28] sm:$0x33]  ;;  %s6445_s17 = smov 80   ;;  %s6446_s19 = smov 112   ;;  %vm178_vm0 = vcmask 15360   ;;  %vm183_vm1 = vcmask 162960   ;;  %v10043_v5 = vlaneseq }
  0x58   : > { %6422 = vsyncadd (%p10147_p4), [#allocation8], 4294967168  ;;  %200 = vrot.lane.b32.xlu1 %v188_v0, %s6445_s17  ;;  %192 = vrot.lane.b32.xlu0 %v188_v0, %s6446_s19  ;;  %s6447_s24 = smov 64   ;;  %s6448_s26 = smov 96   ;;  %v10046_v1 = vmov 0.0   ;;  %v190_v11 = vrot.slane %v188_v0, 4 }
  0x59   : > { %s6449_s15 = smov 32   ;;  %s6450_s27 = smov 48   ;;  %179 = vst.msk [vmem:[#allocation2 + $0x2] sm:$0xff] %vm178_vm0, %v10046_v1  ;;  %180 = vst.msk [vmem:[#allocation2 + $0xa] sm:$0xff] %vm178_vm0, %v10046_v1  ;;  %6094 = vmatprep.mubr.f32.mxu0 %v10046_v1  ;;  %v6453_v3 = vmov 1983009808  }
  0x5a   : > { %s6451_s29 = smov 16   ;;  %181 = vst.msk [vmem:[#allocation2 + $0x1a] sm:$0xff] %vm178_vm0, %v10046_v1  ;;  %182 = vst.msk [vmem:[#allocation2 + $0x22] sm:$0xff] %vm178_vm0, %v10046_v1  ;;  %v229_v4 = vunpack.c.l.s4 %v6453_v3  ;;  %v232_v8 = vshrl.u32 %v10043_v5, 7  ;;  %v6454_v15 = vmov 1934713408  }
  0x5b   : > { %184 = vst.msk [vmem:[#allocation2 + $0x2] sm:$0xff] %vm183_vm1, %v10046_v1  ;;  %185 = vst.msk [vmem:[#allocation2 + $0xa] sm:$0xff] %vm183_vm1, %v10046_v1  ;;  %v245_v16 = vunpack.c.l.s4 %v6454_v15  ;;  %vm173_vm2 = vcmask 156672   ;;  %s6455_s30 = smov 2   ;;  %vm351_vm3 = vcmask 146448   ;;  %s6456_s3 = smov 127  }
  0x5c   : > { %204 = vrot.lane.b32.xlu1 %v188_v0, %s6447_s24  ;;  %196 = vrot.lane.b32.xlu0 %v188_v0, %s6448_s26  ;;  %186 = vst.msk [vmem:[#allocation2 + $0x1a] sm:$0xff] %vm183_vm1, %v10046_v1  ;;  %187 = vst.msk [vmem:[#allocation2 + $0x22] sm:$0xff] %vm183_vm1, %v10046_v1  ;;  %v230_v7 = vunpack.c.0.s8 %v229_v4  ;;  %s6457_s4 = smov 126   ;;  %s6458_s5 = smov 125   ;;  %vm548_vm4 = vcmask 130048   ;;  %vm550_vm5 = vcmask 261120  }
  0x5d   : > { %v246_v26 = vunpack.c.0.s8 %v245_v16  ;;  %174 = vst.msk [vmem:[#allocation2] sm:$0x3] %vm173_vm2, %v10046_v1  ;;  %175 = vst.msk [vmem:[#allocation2 + $0x18] sm:$0x3] %vm173_vm2, %v10046_v1  ;;  %s6459_s6 = smov 124   ;;  %vm552_vm6 = vcmask 392192  }
  0x5e   : > { %v6650_v18 = vsub.s32 %v230_v7, %v232_v8  ;;  %176 = vst.msk [vmem:[#allocation2 + $0x12] sm:$0x3] %vm173_vm2, %v10046_v1  ;;  %177 = vst.msk [vmem:[#allocation2 + $0x2a] sm:$0x3] %vm173_vm2, %v10046_v1  ;;  %vm554_vm7 = vcmask 523264   ;;  %vm556_vm8 = vcmask 654336  }
  0x5f   : > { %v6660_v37 = vsub.s32 %v246_v26, %v232_v8  ;;  %vm558_vm9 = vcmask 785408   ;;  %vm560_vm10 = vcmask 916480   ;;  %vm6023_vm12 = vcmask 1044480   ;;  %s6208_s14 = sshll.u32 %s6618_s22, 4  ;;  %s6220_s25 = sshll.u32 %s6498_s13, 8 }
  0x60   : > { %212 = vrot.lane.b32.xlu1 %v188_v0, %s6449_s15  ;;  %208 = vrot.lane.b32.xlu0 %v188_v0, %s6450_s27  ;;  %vm6019_vm13 = vcmask 433152   ;;  %s172_s18 = scalar_lea.vmem [#allocation9], %s6208_s14  ;;  %s6461_s13 = smov [#allocation9]  }
  0x61   : > { %s6118_s21 = sshll.u32 %s172_s18, 4  ;;  %s9990_s21 = int_to_ptr.vmem [resolvable:$true] %s6118_s21 }
  0x64   : > { %216 = vrot.lane.b32.xlu0 %v188_v0, %s6451_s29 }
  0xca   : > { %v201_v2 = vpop.permute.xlu1 %200  ;;  %v193_v6 = vpop.permute.xlu0 %192 }
  0xcb   : > { %v202_v13 = vrot.slane %v201_v2, 4  ;;  %v194_v14 = vrot.slane %v193_v6, 4  ;;  %v235_v19 = vcombine.low %v193_v6, %v201_v2 }
  0xcd   : > { %v285_v25 = vcombine.low %v194_v14, %v202_v13  ;;  %v242_v29 = vrot.slane %v235_v19, %v6650_v18 }
  0xce   : > { %v205_v9 = vpop.permute.xlu1 %204  ;;  %v197_v10 = vpop.permute.xlu0 %196 }
  0xcf   : > { %v198_v12 = vrot.slane %v197_v10, 4  ;;  %v227_v17 = vcombine.low %v188_v0, %v197_v10  ;;  %v206_v23 = vrot.slane %v205_v9, 4  ;;  %v292_v36 = vrot.slane %v285_v25, %v6650_v18 }
  0xd1   : > { %v277_v20 = vcombine.low %v190_v11, %v198_v12  ;;  %v234_v27 = vrot.slane %v227_v17, %v6650_v18 }
  0xd2   : > { %v213_v21 = vpop.permute.xlu1 %212  ;;  %v209_v22 = vpop.permute.xlu0 %208 }
  0xd3   : > { %v214_v24 = vrot.slane %v213_v21, 4  ;;  %v252_v28 = vcombine.low %v205_v9, %v213_v21  ;;  %v284_v30 = vrot.slane %v277_v20, %v6650_v18  ;;  %v210_v33 = vrot.slane %v209_v22, 4 }
  0xd4   : > { %v243_v38 = vcombine.low %v234_v27, %v242_v29 }
  0xd5   : > { %v302_v32 = vcombine.low %v206_v23, %v214_v24  ;;  %v259_v39 = vrot.slane %v252_v28, %v6650_v18  ;;  %v293_v45 = vcombine.low %v284_v30, %v292_v36 }
  0xd6   : > { %v217_v31 = vpop.permute.xlu0 %216  ;;  %v250_v46 = vrot.slane %v243_v38, %v6660_v37 }
  0xd7   : > { %v218_v34 = vrot.slane %v217_v31, 4  ;;  %v260_v35 = vcombine.low %v209_v22, %v217_v31  ;;  %v309_v42 = vrot.slane %v302_v32, %v6650_v18  ;;  %v300_v50 = vrot.slane %v293_v45, %v6660_v37 }
  0xd9   : > { %v267_v40 = vrot.slane %v260_v35, %v6650_v18  ;;  %v310_v41 = vcombine.low %v210_v33, %v218_v34 }
  0xdb   : > { %v268_v43 = vcombine.low %v259_v39, %v267_v40  ;;  %v317_v44 = vrot.slane %v310_v41, %v6650_v18 }
  0xdd   : > { %v275_v47 = vrot.slane %v268_v43, %v6660_v37  ;;  %v318_v48 = vcombine.low %v309_v42, %v317_v44 }
  0xdf   : > { %v335_v49 = vcombine.low %v250_v46, %v275_v47  ;;  %v325_v51 = vrot.slane %v318_v48, %v6660_v37  ;;  %v6209_v53 = vcombine.high %v250_v46, %v275_v47 }
  0xe1   : > { %339 = vrot.lane.b32.xlu1 %v335_v49, %s6455_s30  ;;  %v336_v52 = vcombine.low %v300_v50, %v325_v51  ;;  %v6210_v54 = vcombine.high %v300_v50, %v325_v51 }
  0xe3   : > { %341 = vrot.lane.b32.xlu0 %v336_v52, %s6455_s30 }
  0xe5   : > { %343 = vrot.lane.b32.xlu1 %v6209_v53, %s6455_s30 }
  0xe7   : > { %345 = vrot.lane.b32.xlu0 %v6210_v54, %s6455_s30 }
 0x153   : > { %v340_v55 = vpop.permute.xlu1 %339 }
 0x154   : > { %352 = vst.msk [vmem:[#allocation2 + $0x2] sm:$0xff] %vm351_vm3, %v340_v55 }
 0x155   : > { %v342_v56 = vpop.permute.xlu0 %341 }
 0x156   : > { %353 = vst.msk [vmem:[#allocation2 + $0xa] sm:$0xff] %vm351_vm3, %v342_v56 }
 0x157   : > { %v344_v57 = vpop.permute.xlu1 %343 }
 0x158   : > { %354 = vst.msk [vmem:[#allocation2 + $0x1a] sm:$0xff] %vm351_vm3, %v344_v57 }
 0x159   : > { %v346_v58 = vpop.permute.xlu0 %345 }
 0x15a   : > { %355 = vst.msk [vmem:[#allocation2 + $0x22] sm:$0xff] %vm351_vm3, %v346_v58 }
 0x15b   : > { %v6670_v59 = vld [vmem:[#allocation2] sm:$0xff] }
 0x15c   : > { %579 = vrot.lane.b32.xlu1 %v6670_v59, %s6456_s3  ;;  %v360_v62 = vcombine.high %v6670_v59, %v10046_v1  ;;  %v1699_v36 = vld [vmem:[#allocation2 + $0x1] sm:$0xff]  ;;  %v367_v48 = vrot.slane %v6670_v59, %v6650_v18 }
 0x15d   : > { %v6674_v60 = vld [vmem:[#allocation2 + $0x8] sm:$0xff]  ;;  %v1496_v56 = vrot.slane %v1699_v36, %v6650_v18 }
 0x15e   : > { %581 = vrot.lane.b32.xlu0 %v6674_v60, %s6456_s3  ;;  %v6691_v2 = vrot.slane %v360_v62, %v6650_v18  ;;  %v6708_v7 = vld [vmem:[#allocation2 + $0x9] sm:$0xff]  ;;  %v426_v10 = vcombine.high %v6674_v60, %v10046_v1 }
 0x15f   : > { %v6678_v61 = vld [vmem:[#allocation2 + $0x18] sm:$0xff]  ;;  %v6712_v8 = vld [vmem:[#allocation2 + $0xa] sm:$0xff]  ;;  %v1555_v13 = vcombine.high %v6708_v7, %v10046_v1  ;;  %v2613_v58 = vld [vmem:[#allocation2 + $0x2] sm:$0xff] }
 0x160   : > { %583 = vrot.lane.b32.xlu1 %v6678_v61, %s6456_s3  ;;  %v375_v63 = vcombine.high %v6678_v61, %v10046_v1  ;;  %v2683_v14 = vcombine.high %v6712_v8, %v10046_v1  ;;  %v6733_v16 = vrot.slane %v426_v10, %v6650_v18  ;;  %v4180_v30 = vld [vmem:[#allocation2 + $0xb] sm:$0xff]  ;;  %v4179_v32 = vld [vmem:[#allocation2 + $0x3] sm:$0xff]  ;;  %v1701_v45 = vld [vmem:[#allocation2 + $0x19] sm:$0xff]  ;;  %v382_v47 = vrot.slane %v6678_v61, %v6650_v18 }
 0x161   : > { %v6686_v0 = vld [vmem:[#allocation2 + $0x20] sm:$0xff]  ;;  %v6747_v22 = vrot.slane %v1555_v13, %v6650_v18  ;;  %v3811_v34 = vcombine.high %v4180_v30, %v10046_v1  ;;  %v3745_v38 = vcombine.high %v4179_v32, %v10046_v1  ;;  %v1511_v52 = vrot.slane %v1701_v45, %v6650_v18 }
 0x162   : > { %585 = vrot.lane.b32.xlu0 %v6686_v0, %s6456_s3  ;;  %v6694_v3 = vrot.slane %v375_v63, %v6650_v18  ;;  %v6714_v9 = vld [vmem:[#allocation2 + $0x22] sm:$0xff]  ;;  %v441_v12 = vcombine.high %v6686_v0, %v10046_v1  ;;  %v6753_v24 = vrot.slane %v2683_v14, %v6650_v18  ;;  %v390_v49 = vcombine.low %v367_v48, %v382_v47  ;;  %v2615_v53 = vld [vmem:[#allocation2 + $0x1a] sm:$0xff] }
 0x163   : > { %v6718_v11 = vld [vmem:[#allocation2 + $0x21] sm:$0xff]  ;;  %v2698_v15 = vcombine.high %v6714_v9, %v10046_v1  ;;  %v6780_v40 = vrot.slane %v3811_v34, %v6650_v18  ;;  %v6786_v42 = vrot.slane %v3745_v38, %v6650_v18  ;;  %v391_v51 = vcombine.high %v367_v48, %v382_v47 }
 0x164   : > { %809 = vrot.lane.b32.xlu1 %v6670_v59, %s6457_s4  ;;  %v406_v4 = vcombine.low %v6691_v2, %v6694_v3  ;;  %v407_v6 = vcombine.high %v6691_v2, %v6694_v3  ;;  %v6736_v17 = vrot.slane %v441_v12, %v6650_v18  ;;  %v1570_v19 = vcombine.high %v6718_v11, %v10046_v1  ;;  %v4182_v31 = vld [vmem:[#allocation2 + $0x23] sm:$0xff]  ;;  %v4181_v33 = vld [vmem:[#allocation2 + $0x1b] sm:$0xff] }
 0x165   : > { %10148 = vst [vmem:[#allocation13_spill] sm:$0xff] %v6753_v24  ;;  %v6756_v25 = vrot.slane %v2698_v15, %v6650_v18  ;;  %v3826_v35 = vcombine.high %v4182_v31, %v10046_v1  ;;  %v3760_v39 = vcombine.high %v4181_v33, %v10046_v1  ;;  %10150 = vst [vmem:[#allocation15_spill] sm:$0xff] %v6780_v40 }
 0x166   : > { %811 = vrot.lane.b32.xlu0 %v6674_v60, %s6457_s4  ;;  %v472_v20 = vcombine.low %v6733_v16, %v6736_v17  ;;  %v473_v21 = vcombine.high %v6733_v16, %v6736_v17  ;;  %v6750_v23 = vrot.slane %v1570_v19, %v6650_v18  ;;  %10152 = vst [vmem:[#allocation17_spill] sm:$0xff] %v6786_v42 }
 0x167   : > { %10149 = vst [vmem:[#allocation14_spill] sm:$0xff] %v6756_v25  ;;  %v6783_v41 = vrot.slane %v3826_v35, %v6650_v18  ;;  %v6789_v43 = vrot.slane %v3760_v39, %v6650_v18  ;;  %v6820_v50 = vrot.slane %v390_v49, %v6660_v37  ;;  %v405_v55 = vrot.slane %v391_v51, %v6660_v37 }
 0x168   : > { %813 = vrot.lane.b32.xlu1 %v6678_v61, %s6457_s4  ;;  %v1601_v26 = vcombine.low %v6747_v22, %v6750_v23  ;;  %v1602_v27 = vcombine.high %v6747_v22, %v6750_v23  ;;  %v6832_v57 = vrot.slane %v6686_v0, %v6650_v18  ;;  %v2639_v62 = vrot.slane %v2615_v53, %v6650_v18 }
 0x169   : > { %10151 = vst [vmem:[#allocation16_spill] sm:$0xff] %v6783_v41  ;;  %10153 = vst [vmem:[#allocation18_spill] sm:$0xff] %v6789_v43  ;;  %v422_v54 = vcombine.high %v6820_v50, %v10046_v1  ;;  %v423_v63 = vcombine.high %v405_v55, %v10046_v1  ;;  %v2624_v12 = vrot.slane %v2613_v58, %v6650_v18  ;;  %v10177_v41 = vmov 0.0  }
 0x16a   : > { %815 = vrot.lane.b32.xlu0 %v6686_v0, %s6457_s4  ;;  %v1519_v13 = vcombine.low %v1496_v56, %v1511_v52  ;;  %v1504_v30 = vcombine.high %v1701_v45, %v10046_v1  ;;  %v1577_v32 = vrot.slane %v6718_v11, %v6650_v18  ;;  %v1489_v33 = vcombine.high %v1699_v36, %v10046_v1 }
 0x16b   : > { %v2648_v14 = vcombine.high %v2624_v12, %v2639_v62  ;;  %v414_v34 = vrot.slane %v406_v4, %v6660_v37  ;;  %v1562_v35 = vrot.slane %v6708_v7, %v6650_v18  ;;  %v421_v4 = vrot.slane %v407_v6, %v6660_v37 }
 0x16c   : > { %1039 = vrot.lane.b32.xlu1 %v6670_v59, %s6458_s5  ;;  %v6847_v15 = vrot.slane %v1519_v13, %v6660_v37  ;;  %v1518_v38 = vrot.slane %v1504_v30, %v6650_v18  ;;  %v2617_v51 = vcombine.high %v2613_v58, %v10046_v1  ;;  %v2690_v58 = vrot.slane %v6712_v8, %v6650_v18 }
 0x16d   : > { %v2662_v19 = vrot.slane %v2648_v14, %v6660_v37  ;;  %v425_v14 = vcombine.high %v421_v4, %v10046_v1 }
 0x16e   : > { %1041 = vrot.lane.b32.xlu0 %v6674_v60, %s6458_s5  ;;  %v1551_v31 = vcombine.high %v6847_v15, %v10046_v1  ;;  %v2631_v6 = vrot.slane %v2617_v51, %v6650_v18 }
 0x170   : > { %1043 = vrot.lane.b32.xlu1 %v6678_v61, %s6458_s5 }
 0x172   : > { %1045 = vrot.lane.b32.xlu0 %v6686_v0, %s6458_s5 }
 0x174   : > { %1269 = vrot.lane.b32.xlu1 %v6670_v59, %s6459_s6  ;;  %v1520_v59 = vcombine.high %v1496_v56, %v1511_v52 }
 0x176   : > { %1271 = vrot.lane.b32.xlu0 %v6674_v60, %s6459_s6 }
 0x178   : > { %1273 = vrot.lane.b32.xlu1 %v6678_v61, %s6459_s6  ;;  %v433_v61 = vrot.slane %v6674_v60, %v6650_v18 }
 0x17a   : > { %1275 = vrot.lane.b32.xlu0 %v6686_v0, %s6459_s6  ;;  %v457_v10 = vcombine.high %v433_v61, %v6832_v57  ;;  %v1534_v0 = vrot.slane %v1520_v59, %v6660_v37  ;;  %v2680_v59 = vcombine.high %v2662_v19, %v10046_v1 }
 0x17c   : > { %1707 = vrot.lane.b32.xlu1 %v1699_v36, %s6456_s3  ;;  %v471_v60 = vrot.slane %v457_v10, %v6660_v37  ;;  %v1552_v39 = vcombine.high %v1534_v0, %v10046_v1 }
 0x17e   : > { %1709 = vrot.lane.b32.xlu0 %v6708_v7, %s6456_s3 }
 0x180   : > { %1711 = vrot.lane.b32.xlu1 %v1701_v45, %s6456_s3 }
 0x182   : > { %1713 = vrot.lane.b32.xlu0 %v6718_v11, %s6456_s3 }
 0x184   : > { %1937 = vrot.lane.b32.xlu1 %v1699_v36, %s6457_s4 }
 0x186   : > { %1939 = vrot.lane.b32.xlu0 %v6708_v7, %s6457_s4 }
 0x188   : > { %1941 = vrot.lane.b32.xlu1 %v1701_v45, %s6457_s4 }
 0x18a   : > { %1943 = vrot.lane.b32.xlu0 %v6718_v11, %s6457_s4 }
 0x18c   : > { %2167 = vrot.lane.b32.xlu1 %v1699_v36, %s6458_s5 }
 0x18e   : > { %2169 = vrot.lane.b32.xlu0 %v6708_v7, %s6458_s5 }
 0x190   : > { %2171 = vrot.lane.b32.xlu1 %v1701_v45, %s6458_s5 }
 0x192   : > { %2173 = vrot.lane.b32.xlu0 %v6718_v11, %s6458_s5 }
 0x194   : > { %2391 = vrot.lane.b32.xlu1 %v1699_v36, %s6459_s6  ;;  %v2647_v36 = vcombine.low %v2624_v12, %v2639_v62 }
 0x196   : > { %2393 = vrot.lane.b32.xlu0 %v6708_v7, %s6459_s6  ;;  %v2632_v7 = vcombine.high %v2615_v53, %v10046_v1  ;;  %v6878_v49 = vrot.slane %v2647_v36, %v6660_v37  ;;  %v2705_v53 = vrot.slane %v6714_v9, %v6650_v18  ;;  %v456_v9 = vcombine.low %v433_v61, %v6832_v57 }
 0x197   : > { %v1585_v61 = vcombine.low %v1562_v35, %v1577_v32 }
 0x198   : > { %2395 = vrot.lane.b32.xlu1 %v1701_v45, %s6459_s6  ;;  %v1586_v45 = vcombine.high %v1562_v35, %v1577_v32  ;;  %v2646_v2 = vrot.slane %v2632_v7, %v6650_v18  ;;  %v2679_v3 = vcombine.high %v6878_v49, %v10046_v1  ;;  %v2714_v62 = vcombine.high %v2690_v58, %v2705_v53 }
 0x199   : > { %v6909_v13 = vrot.slane %v456_v9, %v6660_v37  ;;  %v6922_v30 = vrot.slane %v1585_v61, %v6660_v37  ;;  %v1609_v7 = vrot.slane %v1601_v26, %v6660_v37  ;;  %v1616_v26 = vrot.slane %v1602_v27, %v6660_v37 }
 0x19a   : > { %2397 = vrot.lane.b32.xlu0 %v6718_v11, %s6459_s6  ;;  %v1503_v11 = vrot.slane %v1489_v33, %v6650_v18  ;;  %v1600_v48 = vrot.slane %v1586_v45, %v6660_v37  ;;  %v2663_v56 = vcombine.low %v2631_v6, %v2646_v2  ;;  %v2664_v10 = vcombine.high %v2631_v6, %v2646_v2 }
 0x19b   : > { %v6901_v12 = vrot.slane %v2714_v62, %v6660_v37  ;;  %v488_v57 = vcombine.high %v6909_v13, %v10046_v1  ;;  %v1617_v32 = vcombine.high %v6922_v30, %v10046_v1  ;;  %v2713_v33 = vcombine.low %v2690_v58, %v2705_v53 }
 0x19c   : > { %493 = vrot.lane.b32.xlu1 %v422_v54, %s6451_s29  ;;  %v1535_v47 = vcombine.low %v1503_v11, %v1518_v38  ;;  %v1536_v54 = vcombine.high %v1503_v11, %v1518_v38  ;;  %v6906_v8 = vrot.slane %v2664_v10, %v6660_v37  ;;  %v1619_v53 = vcombine.high %v1609_v7, %v10046_v1 }
 0x19d   : > { %10154 = vst [vmem:[#allocation19_spill] sm:$0xff] %v6901_v12  ;;  %v6940_v35 = vrot.slane %v2713_v33, %v6660_v37  ;;  %v1620_v9 = vcombine.high %v1616_v26, %v10046_v1 }
 0x19e   : > { %497 = vrot.lane.b32.xlu0 %v405_v55, %s6449_s15  ;;  %v1543_v52 = vrot.slane %v1535_v47, %v6660_v37  ;;  %v1550_v55 = vrot.slane %v1536_v54, %v6660_v37 }
 0x19f   : > { %10155 = vst [vmem:[#allocation20_spill] sm:$0xff] %v6940_v35  ;;  %v2745_v16 = vcombine.high %v6940_v35, %v10046_v1 }
 0x1a0   : > { %501 = vrot.lane.b32.xlu1 %v423_v63, %s6450_s27  ;;  %v2671_v63 = vrot.slane %v2663_v56, %v6660_v37  ;;  %v1553_v38 = vcombine.high %v1543_v52, %v10046_v1 }
 0x1a2   : > { %1626 = vrot.lane.b32.xlu0 %v1534_v0, %s6449_s15  ;;  %v424_v0 = vcombine.high %v414_v34, %v10046_v1  ;;  %v2681_v23 = vcombine.high %v2671_v63, %v10046_v1 }
 0x1a4   : > { %525 = vrot.lane.b32.xlu1 %v471_v60, %s6449_s15 }
 0x1a6   : > { %2754 = vrot.lane.b32.xlu0 %v2662_v19, %s6449_s15  ;;  %v489_v19 = vcombine.high %v471_v60, %v10046_v1  ;;  %v487_v60 = vrot.slane %v473_v21, %v6660_v37  ;;  %v1554_v21 = vcombine.high %v1550_v55, %v10046_v1 }
 0x1a8   : > { %1622 = vrot.lane.b32.xlu1 %v1551_v31, %s6451_s29  ;;  %v480_v31 = vrot.slane %v472_v20, %v6660_v37 }
 0x1aa   : > { %505 = vrot.lane.b32.xlu0 %v414_v34, %s6447_s24  ;;  %v1618_v34 = vcombine.high %v1600_v48, %v10046_v1  ;;  %v490_v11 = vcombine.high %v480_v31, %v10046_v1 }
 0x1ac   : > { %1630 = vrot.lane.b32.xlu1 %v1552_v39, %s6450_s27 }
 0x1ae   : > { %513 = vrot.lane.b32.xlu0 %v421_v4, %s6448_s26 }
 0x1b0   : > { %1654 = vrot.lane.b32.xlu1 %v1600_v48, %s6449_s15 }
 0x1b2   : > { %1634 = vrot.lane.b32.xlu0 %v1543_v52, %s6447_s24  ;;  %v491_v52 = vcombine.high %v487_v60, %v10046_v1 }
 0x1b4   : > { %2750 = vrot.lane.b32.xlu1 %v2679_v3, %s6451_s29 }
 0x1b6   : > { %1642 = vrot.lane.b32.xlu0 %v1550_v55, %s6448_s26 }
 0x1b8   : > { %2758 = vrot.lane.b32.xlu1 %v2680_v59, %s6450_s27 }
 0x1ba   : > { %2762 = vrot.lane.b32.xlu0 %v2671_v63, %s6447_s24  ;;  %v2682_v63 = vcombine.high %v6906_v8, %v10046_v1 }
 0x1bc   : > { %2782 = vrot.lane.b32.xlu1 %v6901_v12, %s6449_s15 }
 0x1be   : > { %2770 = vrot.lane.b32.xlu0 %v6906_v8, %s6448_s26 }
 0x1c0   : > { %509 = vrot.lane.b32.xlu1 %v424_v0, %s6445_s17 }
 0x1c2   : > { %521 = vrot.lane.b32.xlu0 %v488_v57, %s6451_s29 }
 0x1c4   : > { %517 = vrot.lane.b32.xlu1 %v425_v14, %s6446_s19 }
 0x1c6   : > { %529 = vrot.lane.b32.xlu0 %v489_v19, %s6450_s27 }
 0x1c8   : > { %533 = vrot.lane.b32.xlu1 %v480_v31, %s6447_s24 }
 0x1ca   : > { %1650 = vrot.lane.b32.xlu0 %v1617_v32, %s6451_s29 }
 0x1cc   : > { %541 = vrot.lane.b32.xlu1 %v487_v60, %s6448_s26 }
 0x1ce   : > { %v6942_v20 = vpop.permute.xlu1 %579  ;;  %1658 = vrot.lane.b32.xlu0 %v1618_v34, %s6450_s27 }
 0x1cf   : > { %v598_v3 = vrot.slane %v6942_v20, %v6650_v18 }
 0x1d0   : > { %v6946_v39 = vpop.permute.xlu0 %581  ;;  %1638 = vrot.lane.b32.xlu1 %v1553_v38, %s6445_s17 }
 0x1d1   : > { %v6961_v36 = vrot.slane %v6946_v39, %v6650_v18 }
 0x1d2   : > { %v6951_v17 = vpop.permute.xlu1 %583  ;;  %2778 = vrot.lane.b32.xlu0 %v2745_v16, %s6451_s29 }
 0x1d3   : > { %v613_v54 = vrot.slane %v6951_v17, %v6650_v18 }
 0x1d4   : > { %v6955_v45 = vpop.permute.xlu0 %585  ;;  %1646 = vrot.lane.b32.xlu1 %v1554_v21, %s6446_s19 }
 0x1d5   : > { %v6965_v4 = vrot.slane %v6955_v45, %v6650_v18  ;;  %v621_v55 = vcombine.low %v598_v3, %v613_v54  ;;  %v622_v27 = vcombine.high %v598_v3, %v613_v54 }
 0x1d6   : > { %v6967_v47 = vpop.permute.xlu1 %809  ;;  %537 = vrot.lane.b32.xlu0 %v490_v11, %s6445_s17 }
 0x1d7   : > { %v828_v0 = vrot.slane %v6967_v47, %v6650_v18  ;;  %v7023_v61 = vrot.slane %v621_v55, %v6660_v37  ;;  %v636_v32 = vrot.slane %v622_v27, %v6660_v37 }
 0x1d8   : > { %v6976_v51 = vpop.permute.xlu0 %811  ;;  %1662 = vrot.lane.b32.xlu1 %v1609_v7, %s6447_s24 }
 0x1d9   : > { %v6997_v56 = vrot.slane %v6976_v51, %v6650_v18  ;;  %10158 = vst [vmem:[#allocation23_spill] sm:$0xff] %v7023_v61  ;;  %v653_v38 = vcombine.high %v7023_v61, %v10046_v1  ;;  %v654_v3 = vcombine.high %v636_v32, %v10046_v1 }
 0x1da   : > { %v6982_v2 = vpop.permute.xlu1 %813  ;;  %545 = vrot.lane.b32.xlu0 %v491_v52, %s6446_s19  ;;  %v688_v52 = vcombine.high %v6961_v36, %v6965_v4 }
 0x1db   : > { %v843_v59 = vrot.slane %v6982_v2, %v6650_v18 }
 0x1dc   : > { %v6991_v6 = vpop.permute.xlu0 %815  ;;  %1670 = vrot.lane.b32.xlu1 %v1616_v26, %s6448_s26 }
 0x1dd   : > { %v7001_v58 = vrot.slane %v6991_v6, %v6650_v18  ;;  %v852_v14 = vcombine.high %v828_v0, %v843_v59  ;;  %v851_v54 = vcombine.low %v828_v0, %v843_v59  ;;  %v7067_v59 = vrot.slane %v688_v52, %v6660_v37 }
 0x1de   : > { %v7003_v22 = vpop.permute.xlu1 %1039  ;;  %1666 = vrot.lane.b32.xlu0 %v1619_v53, %s6445_s17 }
 0x1df   : > { %10156 = vst [vmem:[#allocation21_spill] sm:$0xff] %v7001_v58  ;;  %v1058_v33 = vrot.slane %v7003_v22, %v6650_v18  ;;  %v866_v7 = vrot.slane %v852_v14, %v6660_v37  ;;  %10164 = vst [vmem:[#allocation29_spill] sm:$0xff] %v7067_v59 }
 0x1e0   : > { %v7011_v10 = vpop.permute.xlu0 %1041  ;;  %2766 = vrot.lane.b32.xlu1 %v2681_v23, %s6445_s17 }
 0x1e1   : > { %10157 = vst [vmem:[#allocation22_spill] sm:$0xff] %v7011_v10  ;;  %v7035_v60 = vrot.slane %v7011_v10, %v6650_v18  ;;  %v884_v29 = vcombine.high %v866_v7, %v10046_v1 }
 0x1e2   : > { %v7017_v57 = vpop.permute.xlu1 %1043  ;;  %1674 = vrot.lane.b32.xlu0 %v1620_v9, %s6446_s19 }
 0x1e3   : > { %v1073_v19 = vrot.slane %v7017_v57, %v6650_v18  ;;  %10160 = vst [vmem:[#allocation25_spill] sm:$0xff] %v7035_v60 }
 0x1e4   : > { %v7027_v31 = vpop.permute.xlu0 %1045  ;;  %2774 = vrot.lane.b32.xlu1 %v2682_v63, %s6446_s19 }
 0x1e5   : > { %10159 = vst [vmem:[#allocation24_spill] sm:$0xff] %v7027_v31  ;;  %v7039_v8 = vrot.slane %v7027_v31, %v6650_v18  ;;  %v1082_v16 = vcombine.high %v1058_v33, %v1073_v19  ;;  %v1081_v28 = vcombine.low %v1058_v33, %v1073_v19 }
 0x1e6   : > { %v7041_v34 = vpop.permute.xlu1 %1269  ;;  %728 = vrot.lane.b32.xlu0 %v636_v32, %s6449_s15  ;;  %v7081_v32 = vrot.slane %v851_v54, %v6660_v37 }
 0x1e7   : > { %10161 = vst [vmem:[#allocation26_spill] sm:$0xff] %v7039_v8  ;;  %v1288_v55 = vrot.slane %v7041_v34, %v6650_v18  ;;  %v1096_v27 = vrot.slane %v1082_v16, %v6660_v37  ;;  %v1148_v24 = vcombine.high %v7035_v60, %v7039_v8 }
 0x1e8   : > { %v7048_v11 = vpop.permute.xlu0 %1271  ;;  %724 = vrot.lane.b32.xlu1 %v653_v38, %s6451_s29  ;;  %10167 = vst [vmem:[#allocation32_spill] sm:$0xff] %v7081_v32  ;;  %v883_v5 = vcombine.high %v7081_v32, %v10046_v1  ;;  %v7138_v1 = vrot.slane %v1081_v28, %v6660_v37 }
 0x1e9   : > { %10162 = vst [vmem:[#allocation27_spill] sm:$0xff] %v7048_v11  ;;  %v7071_v9 = vrot.slane %v7048_v11, %v6650_v18 }
 0x1ea   : > { %v7054_v26 = vpop.permute.xlu1 %1273  ;;  %958 = vrot.lane.b32.xlu0 %v866_v7, %s6449_s15  ;;  %10174 = vst [vmem:[#allocation39_spill] sm:$0xff] %v7138_v1  ;;  %v1113_v35 = vcombine.high %v7138_v1, %v10177_v41 }
 0x1eb   : > { %v1303_v53 = vrot.slane %v7054_v26, %v6650_v18  ;;  %10165 = vst [vmem:[#allocation30_spill] sm:$0xff] %v7071_v9 }
 0x1ec   : > { %v7062_v23 = vpop.permute.xlu0 %1275  ;;  %732 = vrot.lane.b32.xlu1 %v654_v3, %s6450_s27 }
 0x1ed   : > { %10163 = vst [vmem:[#allocation28_spill] sm:$0xff] %v7062_v23  ;;  %v1312_v0 = vcombine.high %v1288_v55, %v1303_v53  ;;  %v7075_v63 = vrot.slane %v7062_v23, %v6650_v18  ;;  %v1311_v32 = vcombine.low %v1288_v55, %v1303_v53  ;;  %v7195_v53 = vrot.slane %v1148_v24, %v6660_v37 }
 0x1ee   : > { %v7077_v14 = vpop.permute.xlu1 %1707  ;;  %1188 = vrot.lane.b32.xlu0 %v1096_v27, %s6449_s15  ;;  %v606_v24 = vcombine.high %v6951_v17, %v10177_v41 }
 0x1ef   : > { %10166 = vst [vmem:[#allocation31_spill] sm:$0xff] %v7075_v63  ;;  %v7092_v3 = vrot.slane %v1312_v0, %v6660_v37  ;;  %v7102_v46 = vrot.slane %v7077_v14, %v6650_v18  ;;  %v918_v0 = vcombine.high %v6997_v56, %v7001_v58  ;;  %10180 = vst [vmem:[#allocation44_spill] sm:$0xff] %v7195_v53 }
 0x1f0   : > { %v7085_v16 = vpop.permute.xlu0 %1709  ;;  %756 = vrot.lane.b32.xlu1 %v7067_v59, %s6449_s15  ;;  %v7198_v55 = vrot.slane %v1311_v32, %v6660_v37 }
 0x1f1   : > { %10168 = vst [vmem:[#allocation33_spill] sm:$0xff] %v7085_v16  ;;  %v7114_v38 = vrot.slane %v7085_v16, %v6650_v18  ;;  %v7135_v7 = vrot.slane %v918_v0, %v6660_v37 }
 0x1f2   : > { %v7089_v52 = vpop.permute.xlu1 %1711  ;;  %1418 = vrot.lane.b32.xlu0 %v7092_v3, %s6449_s15  ;;  %10181 = vst [vmem:[#allocation45_spill] sm:$0xff] %v7198_v55  ;;  %v1343_v23 = vcombine.high %v7198_v55, %v10177_v41  ;;  %v1378_v55 = vcombine.high %v7071_v9, %v7075_v63  ;;  %v836_v63 = vcombine.high %v6982_v2, %v10177_v41 }
 0x1f3   : > { %v7098_v54 = vrot.slane %v7089_v52, %v6650_v18  ;;  %10170 = vst [vmem:[#allocation35_spill] sm:$0xff] %v7114_v38  ;;  %10173 = vst [vmem:[#allocation38_spill] sm:$0xff] %v7135_v7 }
 0x1f4   : > { %v7106_v44 = vpop.permute.xlu0 %1713  ;;  %954 = vrot.lane.b32.xlu1 %v883_v5, %s6451_s29  ;;  %v7282_v9 = vrot.slane %v1378_v55, %v6660_v37 }
 0x1f5   : > { %10169 = vst [vmem:[#allocation34_spill] sm:$0xff] %v7106_v44  ;;  %v1750_v21 = vcombine.high %v7102_v46, %v7098_v54  ;;  %v7120_v62 = vrot.slane %v7106_v44, %v6650_v18  ;;  %v1749_v31 = vcombine.low %v7102_v46, %v7098_v54 }
 0x1f6   : > { %v7122_v48 = vpop.permute.xlu1 %1937  ;;  %10185 = vst [vmem:[#allocation49_spill] sm:$0xff] %v7282_v9 }
 0x1f7   : > { %10171 = vst [vmem:[#allocation36_spill] sm:$0xff] %v7120_v62  ;;  %v7130_v19 = vrot.slane %v1750_v21, %v6660_v37  ;;  %v7146_v5 = vrot.slane %v7122_v48, %v6650_v18 }
 0x1f8   : > { %v7126_v42 = vpop.permute.xlu0 %1939  ;;  %962 = vrot.lane.b32.xlu1 %v884_v29, %s6450_s27 }
 0x1f9   : > { %10172 = vst [vmem:[#allocation37_spill] sm:$0xff] %v7126_v42  ;;  %1856 = vrot.lane.b32.xlu0 %v7130_v19, %s6449_s15  ;;  %v7156_v28 = vrot.slane %v7126_v42, %v6650_v18 }
 0x1fa   : > { %v7132_v33 = vpop.permute.xlu1 %1941 }
 0x1fb   : > { %v7142_v43 = vrot.slane %v7132_v33, %v6650_v18 }
 0x1fc   : > { %v7150_v29 = vpop.permute.xlu0 %1943  ;;  %986 = vrot.lane.b32.xlu1 %v7135_v7, %s6449_s15 }
 0x1fd   : > { %10175 = vst [vmem:[#allocation40_spill] sm:$0xff] %v7150_v29  ;;  %v1980_v21 = vcombine.high %v7146_v5, %v7142_v43  ;;  %v7162_v0 = vrot.slane %v7150_v29, %v6650_v18  ;;  %v1114_v29 = vcombine.high %v1096_v27, %v10177_v41  ;;  %v1979_v59 = vcombine.low %v7146_v5, %v7142_v43 }
 0x1fe   : > { %v7164_v40 = vpop.permute.xlu1 %2167 }
 0x1ff   : > { %10176 = vst [vmem:[#allocation41_spill] sm:$0xff] %v7162_v0  ;;  %v7176_v61 = vrot.slane %v1980_v21, %v6660_v37  ;;  %v7187_v12 = vrot.slane %v7164_v40, %v6650_v18 }
 0x200   : > { %v7170_v25 = vpop.permute.xlu0 %2169  ;;  %1184 = vrot.lane.b32.xlu1 %v1113_v35, %s6451_s29 }
 0x201   : > { %10178 = vst [vmem:[#allocation42_spill] sm:$0xff] %v7170_v25  ;;  %2086 = vrot.lane.b32.xlu0 %v7176_v61, %s6449_s15  ;;  %v7202_v27 = vrot.slane %v7170_v25, %v6650_v18  ;;  %v591_v25 = vcombine.high %v6942_v20, %v10177_v41 }
 0x202   : > { %v7178_v42 = vpop.permute.xlu1 %2171 }
 0x203   : > { %v7183_v1 = vrot.slane %v7178_v42, %v6650_v18 }
 0x204   : > { %v7191_v35 = vpop.permute.xlu0 %2173  ;;  %1192 = vrot.lane.b32.xlu1 %v1114_v29, %s6450_s27 }
 0x205   : > { %10179 = vst [vmem:[#allocation43_spill] sm:$0xff] %v7191_v35  ;;  %v2210_v21 = vcombine.high %v7187_v12, %v7183_v1  ;;  %v7208_v16 = vrot.slane %v7191_v35, %v6650_v18 }
 0x206   : > { %v7210_v44 = vpop.permute.xlu1 %2391 }
 0x207   : > { %v7223_v11 = vrot.slane %v2210_v21, %v6660_v37  ;;  %v7231_v17 = vrot.slane %v7210_v44, %v6650_v18  ;;  %v605_v21 = vrot.slane %v591_v25, %v6650_v18 }
 0x208   : > { %v7216_v29 = vpop.permute.xlu0 %2393  ;;  %1216 = vrot.lane.b32.xlu1 %v7195_v53, %s6449_s15  ;;  %v620_v53 = vrot.slane %v606_v24, %v6650_v18  ;;  %v1344_v24 = vcombine.high %v7092_v3, %v10177_v41 }
 0x209   : > { %10182 = vst [vmem:[#allocation46_spill] sm:$0xff] %v7216_v29  ;;  %2316 = vrot.lane.b32.xlu0 %v7223_v11, %s6449_s15  ;;  %v7254_v7 = vrot.slane %v7216_v29, %v6650_v18  ;;  %v821_v29 = vcombine.high %v6967_v47, %v10177_v41 }
 0x20a   : > { %v7225_v35 = vpop.permute.xlu1 %2395  ;;  %v637_v54 = vcombine.low %v605_v21, %v620_v53  ;;  %v638_v8 = vcombine.high %v605_v21, %v620_v53 }
 0x20b   : > { %v7235_v32 = vrot.slane %v7225_v35, %v6650_v18 }
 0x20c   : > { %v7240_v20 = vpop.permute.xlu0 %2397  ;;  %1414 = vrot.lane.b32.xlu1 %v1343_v23, %s6451_s29  ;;  %v7290_v47 = vrot.slane %v637_v54, %v6660_v37  ;;  %v7305_v54 = vrot.slane %v638_v8, %v6660_v37 }
 0x20d   : > { %10183 = vst [vmem:[#allocation47_spill] sm:$0xff] %v7240_v20  ;;  %v2434_v10 = vcombine.high %v7231_v17, %v7235_v32  ;;  %v7258_v23 = vrot.slane %v7240_v20, %v6650_v18  ;;  %v7275_v20 = vrot.slane %v1749_v31, %v6660_v37  ;;  %v835_v31 = vrot.slane %v821_v29, %v6650_v18 }
 0x20e   : > { %v7260_v25 = vpop.permute.xlu1 %493  ;;  %v1051_v29 = vcombine.high %v7003_v22, %v10177_v41 }
 0x20f   : > { %v7270_v3 = vrot.slane %v2434_v10, %v6660_v37  ;;  %10184 = vst [vmem:[#allocation48_spill] sm:$0xff] %v7275_v20  ;;  %v1781_v53 = vcombine.high %v7275_v20, %v10177_v41  ;;  %v1782_v20 = vcombine.high %v7130_v19, %v10177_v41 }
 0x210   : > { %v7266_v46 = vpop.permute.xlu0 %497  ;;  %1422 = vrot.lane.b32.xlu1 %v1344_v24, %s6450_s27  ;;  %v850_v24 = vrot.slane %v836_v63, %v6650_v18  ;;  %v1066_v63 = vcombine.high %v7017_v57, %v10177_v41  ;;  %v1065_v19 = vrot.slane %v1051_v29, %v6650_v18 }
 0x211   : > { %2540 = vrot.lane.b32.xlu0 %v7270_v3, %s6449_s15 }
 0x212   : > { %v7279_v2 = vpop.permute.xlu1 %501  ;;  %v867_v55 = vcombine.low %v835_v31, %v850_v24  ;;  %v1080_v8 = vrot.slane %v1066_v63, %v6650_v18 }
 0x214   : > { %v7285_v10 = vpop.permute.xlu0 %1626  ;;  %1446 = vrot.lane.b32.xlu1 %v7282_v9, %s6449_s15  ;;  %v1816_v9 = vcombine.high %v7114_v38, %v7120_v62  ;;  %v7324_v22 = vrot.slane %v867_v55, %v6660_v37  ;;  %v7328_v62 = vrot.slane %v1979_v59, %v6660_v37  ;;  %v1281_v55 = vcombine.high %v7041_v34, %v10177_v41 }
 0x215   : > { %736 = vrot.lane.b32.xlu0 %v7290_v47, %s6447_s24 }
 0x216   : > { %v7295_v60 = vpop.permute.xlu1 %525  ;;  %10186 = vst [vmem:[#allocation50_spill] sm:$0xff] %v7328_v62  ;;  %v7335_v5 = vrot.slane %v1816_v9, %v6660_v37  ;;  %v2011_v63 = vcombine.high %v7328_v62, %v10177_v41  ;;  %v1295_v34 = vrot.slane %v1281_v55, %v6650_v18 }
 0x218   : > { %v7301_v21 = vpop.permute.xlu0 %2754  ;;  %1852 = vrot.lane.b32.xlu1 %v1781_v53, %s6451_s29  ;;  %v868_v53 = vcombine.high %v835_v31, %v850_v24  ;;  %10187 = vst [vmem:[#allocation51_spill] sm:$0xff] %v7335_v5  ;;  %v1097_v24 = vcombine.low %v1065_v19, %v1080_v8 }
 0x219   : > { %744 = vrot.lane.b32.xlu0 %v7305_v54, %s6448_s26 }
 0x21a   : > { %v7317_v57 = vpop.permute.xlu1 %1622  ;;  %v7344_v59 = vrot.slane %v868_v53, %v6660_v37  ;;  %v7359_v53 = vrot.slane %v1097_v24, %v6660_v37  ;;  %v1734_v24 = vcombine.high %v7089_v52, %v10177_v41 }
 0x21c   : > { %v7320_v58 = vpop.permute.xlu0 %505  ;;  %1860 = vrot.lane.b32.xlu1 %v1782_v20, %s6450_s27  ;;  %v1296_v20 = vcombine.high %v7054_v26, %v10177_v41  ;;  %10188 = vst [vmem:[#allocation52_spill] sm:$0xff] %v7344_v59  ;;  %v1098_v26 = vcombine.high %v1065_v19, %v1080_v8  ;;  %v2209_v8 = vcombine.low %v7187_v12, %v7183_v1 }
 0x21d   : > { %966 = vrot.lane.b32.xlu0 %v7324_v22, %s6447_s24  ;;  %v1719_v1 = vcombine.high %v7077_v14, %v10177_v41  ;;  %v1748_v62 = vrot.slane %v1734_v24, %v6650_v18  ;;  %v1949_v24 = vcombine.high %v7122_v48, %v10177_v41 }
 0x21e   : > { %v7332_v43 = vpop.permute.xlu1 %1630  ;;  %v1310_v29 = vrot.slane %v1296_v20, %v6650_v18  ;;  %v7383_v12 = vrot.slane %v2209_v8, %v6660_v37 }
 0x220   : > { %v7339_v31 = vpop.permute.xlu0 %513  ;;  %1884 = vrot.lane.b32.xlu1 %v7335_v5, %s6449_s15  ;;  %v2046_v5 = vcombine.high %v7156_v28, %v7162_v0  ;;  %v1327_v20 = vcombine.low %v1295_v34, %v1310_v29  ;;  %10189 = vst [vmem:[#allocation53_spill] sm:$0xff] %v7383_v12  ;;  %v1733_v0 = vrot.slane %v1719_v1, %v6650_v18 }
 0x221   : > { %974 = vrot.lane.b32.xlu0 %v7344_v59, %s6448_s26  ;;  %v2012_v59 = vcombine.high %v7176_v61, %v10177_v41 }
 0x222   : > { %v7350_v9 = vpop.permute.xlu1 %1654  ;;  %v7390_v52 = vrot.slane %v2046_v5, %v6660_v37  ;;  %v7401_v8 = vrot.slane %v1327_v20, %v6660_v37 }
 0x224   : > { %v7355_v38 = vpop.permute.xlu0 %1634  ;;  %2082 = vrot.lane.b32.xlu1 %v2011_v63, %s6451_s29  ;;  %v7378_v63 = vrot.slane %v1098_v26, %v6660_v37  ;;  %v1328_v26 = vcombine.high %v1295_v34, %v1310_v29  ;;  %v1765_v29 = vcombine.low %v1733_v0, %v1748_v62  ;;  %v1964_v34 = vcombine.high %v7132_v33, %v10177_v41 }
 0x225   : > { %1196 = vrot.lane.b32.xlu0 %v7359_v53, %s6447_s24  ;;  %v2242_v33 = vcombine.high %v7223_v11, %v10177_v41 }
 0x226   : > { %v7370_v19 = vpop.permute.xlu1 %2750  ;;  %v7438_v11 = vrot.slane %v1765_v29, %v6660_v37 }
 0x228   : > { %v7374_v55 = vpop.permute.xlu0 %1642  ;;  %2090 = vrot.lane.b32.xlu1 %v2012_v59, %s6450_s27  ;;  %v549_v59 = vsel %vm548_vm4, %v6820_v50, %v7260_v25  ;;  %v2241_v25 = vcombine.high %v7383_v12, %v10177_v41 }
 0x229   : > { %1204 = vrot.lane.b32.xlu0 %v7378_v63, %s6448_s26  ;;  %v551_v5 = vsel %vm550_vm5, %v549_v59, %v7266_v46  ;;  %v7418_v46 = vrot.slane %v1328_v26, %v6660_v37  ;;  %v2276_v59 = vcombine.high %v7202_v27, %v7208_v16 }
 0x22a   : > { %v7387_v61 = vpop.permute.xlu1 %2758  ;;  %v553_v1 = vsel %vm552_vm6, %v551_v5, %v7279_v2  ;;  %v1766_v2 = vcombine.high %v1733_v0, %v1748_v62  ;;  %v1978_v5 = vrot.slane %v1964_v34, %v6650_v18 }
 0x22b   : > { %v555_v26 = vsel %vm554_vm7, %v553_v1, %v7320_v58  ;;  %v2194_v1 = vcombine.high %v7178_v42, %v10177_v41 }
 0x22c   : > { %v7396_v14 = vpop.permute.xlu0 %2762  ;;  %2114 = vrot.lane.b32.xlu1 %v7390_v52, %s6449_s15 }
 0x22d   : > { %1426 = vrot.lane.b32.xlu0 %v7401_v8, %s6447_s24  ;;  %v2208_v42 = vrot.slane %v2194_v1, %v6650_v18 }
 0x22e   : > { %v7408_v50 = vpop.permute.xlu1 %2782 }
 0x22f   : > { %10190 = vst [vmem:[#allocation54_spill] sm:$0xff] %v7408_v50  ;;  %v2433_v50 = vcombine.low %v7231_v17, %v7235_v32  ;;  %v1963_v32 = vrot.slane %v1949_v24, %v6650_v18  ;;  %v7449_v17 = vrot.slane %v2276_v59, %v6660_v37 }
 0x230   : > { %v7414_v20 = vpop.permute.xlu0 %2770  ;;  %2312 = vrot.lane.b32.xlu1 %v2241_v25, %s6451_s29 }
 0x231   : > { %1434 = vrot.lane.b32.xlu0 %v7418_v46, %s6448_s26  ;;  %v7442_v58 = vrot.slane %v2433_v50, %v6660_v37  ;;  %v1995_v29 = vcombine.low %v1963_v32, %v1978_v5  ;;  %v7457_v50 = vrot.slane %v1766_v2, %v6660_v37 }
 0x232   : > { %v510_v25 = vpop.permute.xlu1 %509 }
 0x233   : > { %v557_v48 = vsel %vm556_vm8, %v555_v26, %v510_v25  ;;  %10191 = vst [vmem:[#allocation55_spill] sm:$0xff] %v7442_v58  ;;  %v1996_v26 = vcombine.high %v1963_v32, %v1978_v5  ;;  %v2466_v5 = vcombine.high %v7270_v3, %v10177_v41 }
 0x234   : > { %v522_v12 = vpop.permute.xlu0 %521  ;;  %2320 = vrot.lane.b32.xlu1 %v2242_v33, %s6450_s27  ;;  %v559_v62 = vsel %vm558_vm9, %v557_v48, %v7339_v31  ;;  %v2179_v31 = vcombine.high %v7164_v40, %v10177_v41  ;;  %v2465_v33 = vcombine.high %v7442_v58, %v10177_v41  ;;  %v7468_v48 = vrot.slane %v1995_v29, %v6660_v37 }
 0x235   : > { %1864 = vrot.lane.b32.xlu0 %v7438_v11, %s6447_s24  ;;  %v1677_v40 = vsel %vm548_vm4, %v6847_v15, %v7317_v57  ;;  %v7486_v57 = vrot.slane %v1996_v26, %v6660_v37  ;;  %v562_v1 = vsel %vm548_vm4, %v6909_v13, %v522_v12 }
 0x236   : > { %v518_v0 = vpop.permute.xlu1 %517  ;;  %v2193_v2 = vrot.slane %v2179_v31, %v6650_v18  ;;  %v1678_v29 = vsel %vm550_vm5, %v1677_v40, %v7285_v10  ;;  %v672_v31 = vcombine.high %v6955_v45, %v10177_v41 }
 0x237   : > { %v561_v34 = vsel %vm560_vm10, %v559_v62, %v518_v0  ;;  %v2500_v62 = vcombine.high %v7254_v7, %v7258_v23  ;;  %v1679_v3 = vsel %vm552_vm6, %v1678_v29, %v7332_v43  ;;  %v657_v43 = vcombine.high %v6946_v39, %v10177_v41 }
 0x238   : > { %569 = vst [vmem:[#allocation3] sm:$0x3] %v561_v34  ;;  %v530_v24 = vpop.permute.xlu0 %529  ;;  %2344 = vrot.lane.b32.xlu1 %v7449_v17, %s6449_s15  ;;  %v2225_v0 = vcombine.low %v2193_v2, %v2208_v42  ;;  %v2418_v34 = vcombine.high %v7225_v35, %v10177_v41  ;;  %v2403_v35 = vcombine.high %v7210_v44, %v10177_v41 }
 0x239   : > { %1872 = vrot.lane.b32.xlu0 %v7457_v50, %s6448_s26  ;;  %v1680_v10 = vsel %vm554_vm7, %v1679_v3, %v7355_v38  ;;  %v7501_v26 = vrot.slane %v2500_v62, %v6660_v37  ;;  %v2226_v12 = vcombine.high %v2193_v2, %v2208_v42  ;;  %v563_v44 = vsel %vm550_vm5, %v562_v1, %v7295_v60 }
 0x23a   : > { %v534_v59 = vpop.permute.xlu1 %533  ;;  %v2432_v45 = vrot.slane %v2418_v34, %v6650_v18  ;;  %v7514_v38 = vrot.slane %v2225_v0, %v6660_v37  ;;  %v564_v62 = vsel %vm552_vm6, %v563_v44, %v530_v24  ;;  %v686_v39 = vrot.slane %v672_v31, %v6650_v18 }
 0x23b   : > { %v655_v42 = vcombine.high %v7290_v47, %v10177_v41  ;;  %v671_v34 = vrot.slane %v657_v43, %v6650_v18  ;;  %v565_v24 = vsel %vm554_vm7, %v564_v62, %v534_v59  ;;  %v7530_v47 = vrot.slane %v2226_v12, %v6660_v37 }
 0x23c   : > { %v1651_v25 = vpop.permute.xlu0 %1650  ;;  %2536 = vrot.lane.b32.xlu1 %v2465_v33, %s6451_s29  ;;  %v2805_v59 = vsel %vm548_vm4, %v6878_v49, %v7370_v19 }
 0x23d   : > { %2094 = vrot.lane.b32.xlu0 %v7468_v48, %s6447_s24 }
 0x23e   : > { %v542_v32 = vpop.permute.xlu1 %541 }
 0x240   : > { %v1659_v15 = vpop.permute.xlu0 %1658  ;;  %2544 = vrot.lane.b32.xlu1 %v2466_v5, %s6450_s27  ;;  %v2417_v5 = vrot.slane %v2403_v35, %v6650_v18  ;;  %v703_v35 = vcombine.low %v671_v34, %v686_v39 }
 0x241   : > { %2102 = vrot.lane.b32.xlu0 %v7486_v57, %s6448_s26 }
 0x242   : > { %v1639_v33 = vpop.permute.xlu1 %1638  ;;  %v2449_v29 = vcombine.low %v2417_v5, %v2432_v45  ;;  %v2450_v43 = vcombine.high %v2417_v5, %v2432_v45  ;;  %v7555_v19 = vrot.slane %v703_v35, %v6660_v37 }
 0x243   : > { %v1681_v13 = vsel %vm556_vm8, %v1680_v10, %v1639_v33  ;;  %v656_v10 = vcombine.high %v7305_v54, %v10177_v41  ;;  %v1684_v33 = vsel %vm548_vm4, %v6922_v30, %v1651_v25  ;;  %v2806_v54 = vsel %vm550_vm5, %v2805_v59, %v7301_v21 }
 0x244   : > { %v7509_v40 = vpop.permute.xlu0 %2778  ;;  %2568 = vrot.lane.b32.xlu1 %v7501_v26, %s6449_s15  ;;  %v1682_v60 = vsel %vm558_vm9, %v1681_v13, %v7374_v55  ;;  %v7545_v44 = vrot.slane %v2449_v29, %v6660_v37  ;;  %v1685_v49 = vsel %vm550_vm5, %v1684_v33, %v7350_v9  ;;  %v2807_v25 = vsel %vm552_vm6, %v2806_v54, %v7387_v61 }
 0x245   : > { %10192 = vst [vmem:[#allocation56_spill] sm:$0xff] %v7509_v40  ;;  %2324 = vrot.lane.b32.xlu0 %v7514_v38, %s6447_s24  ;;  %v10193_v21 = vcombine.low %v6961_v36, %v6965_v4  ;;  %v7570_v5 = vrot.slane %v2450_v43, %v6660_v37  ;;  %v902_v61 = vcombine.high %v6991_v6, %v10177_v41  ;;  %v10196_v43 = vld [vmem:[#allocation29_spill] sm:$0xff] }
 0x246   : > { %v1647_v2 = vpop.permute.xlu1 %1646 }
 0x247   : > { %v1683_v0 = vsel %vm560_vm10, %v1682_v60, %v1647_v2  ;;  %v7564_v45 = vrot.slane %v10193_v21, %v6660_v37 }
 0x248   : > { %v1693_v3 = vrot.slane %v1683_v0, 6  ;;  %v538_v1 = vpop.permute.xlu0 %537  ;;  %740 = vrot.lane.b32.xlu1 %v655_v42, %s6445_s17  ;;  %v704_v42 = vcombine.high %v671_v34, %v686_v39  ;;  %v887_v34 = vcombine.high %v6976_v51, %v10177_v41 }
 0x249   : > { %v566_v31 = vsel %vm556_vm8, %v565_v24, %v538_v1  ;;  %2332 = vrot.lane.b32.xlu0 %v7530_v47, %s6448_s26  ;;  %v719_v6 = vcombine.high %v7564_v45, %v10177_v41  ;;  %v916_v24 = vrot.slane %v902_v61, %v6650_v18  ;;  %v10202_v61 = vld [vmem:[#allocation24_spill] sm:$0xff] }
 0x24a   : > { %1697 = vst [vmem:[#allocation3 + $0x10] sm:$0xc] %v1693_v3  ;;  %v1663_v55 = vpop.permute.xlu1 %1662  ;;  %v567_v12 = vsel %vm558_vm9, %v566_v31, %v542_v32  ;;  %v1686_v32 = vsel %vm552_vm6, %v1685_v49, %v1659_v15  ;;  %v2808_v15 = vsel %vm554_vm7, %v2807_v25, %v7396_v14  ;;  %v7580_v4 = vrot.slane %v704_v42, %v6660_v37  ;;  %v10198_v25 = vld [vmem:[#allocation25_spill] sm:$0xff] }
 0x24b   : > { %v1687_v9 = vsel %vm554_vm7, %v1686_v32, %v1663_v55  ;;  %v885_v31 = vcombine.high %v7324_v22, %v10177_v41  ;;  %v901_v55 = vrot.slane %v887_v34, %v6650_v18  ;;  %v10199_v32 = vld [vmem:[#allocation26_spill] sm:$0xff] }
 0x24c   : > { %v546_v13 = vpop.permute.xlu0 %545  ;;  %748 = vrot.lane.b32.xlu1 %v656_v10, %s6446_s19  ;;  %v10194_v10 = vld [vmem:[#allocation21_spill] sm:$0xff]  ;;  %v10200_v21 = vcombine.low %v10198_v25, %v10199_v32  ;;  %v10208_v25 = vld [vmem:[#allocation35_spill] sm:$0xff]  ;;  %v10209_v32 = vld [vmem:[#allocation36_spill] sm:$0xff]  ;;  %v722_v40 = vcombine.high %v7580_v4, %v10177_v41 }
 0x24d   : > { %v568_v62 = vsel %vm560_vm10, %v567_v12, %v546_v13  ;;  %2548 = vrot.lane.b32.xlu0 %v7545_v44, %s6447_s24  ;;  %v10195_v59 = vcombine.low %v6997_v56, %v10194_v10  ;;  %v720_v13 = vcombine.high %v10196_v43, %v10177_v41  ;;  %v934_v54 = vcombine.high %v901_v55, %v916_v24  ;;  %v10207_v10 = vld [vmem:[#allocation44_spill] sm:$0xff] }
 0x24e   : > { %570 = vst [vmem:[#allocation3 + $0x8] sm:$0x3] %v568_v62  ;;  %v1671_v30 = vpop.permute.xlu1 %1670  ;;  %v10197_v62 = vld [vmem:[#allocation52_spill] sm:$0xff] }
 0x24f   : > { %v7603_v33 = vrot.slane %v10195_v59, %v6660_v37  ;;  %v886_v42 = vcombine.high %v10197_v62, %v10177_v41  ;;  %v7640_v34 = vrot.slane %v934_v54, %v6660_v37  ;;  %v1180_v59 = vcombine.high %v10207_v10, %v10177_v41 }
 0x250   : > { %v1667_v39 = vpop.permute.xlu0 %1666  ;;  %764 = vrot.lane.b32.xlu1 %v7555_v19, %s6447_s24 }
 0x251   : > { %v1688_v60 = vsel %vm556_vm8, %v1687_v9, %v1667_v39  ;;  %2556 = vrot.lane.b32.xlu0 %v7570_v5, %s6448_s26  ;;  %v949_v56 = vcombine.high %v7603_v33, %v10177_v41  ;;  %v7626_v9 = vrot.slane %v10200_v21, %v6660_v37  ;;  %v10201_v39 = vld [vmem:[#allocation38_spill] sm:$0xff]  ;;  %v10210_v21 = vcombine.low %v10208_v25, %v10209_v32 }
 0x252   : > { %v2767_v36 = vpop.permute.xlu1 %2766  ;;  %v1689_v29 = vsel %vm558_vm9, %v1688_v60, %v1671_v30  ;;  %v950_v60 = vcombine.high %v10201_v39, %v10177_v41  ;;  %v10211_v39 = vld [vmem:[#allocation49_spill] sm:$0xff] }
 0x253   : > { %v2809_v2 = vsel %vm556_vm8, %v2808_v15, %v2767_v36  ;;  %v1132_v15 = vcombine.high %v10202_v61, %v10177_v41  ;;  %v10212_v61 = vld [vmem:[#allocation28_spill] sm:$0xff] }
 0x254   : > { %v1675_v0 = vpop.permute.xlu0 %1674  ;;  %772 = vrot.lane.b32.xlu1 %v7580_v4, %s6448_s26  ;;  %v2810_v1 = vsel %vm558_vm9, %v2809_v2, %v7414_v20  ;;  %v933_v20 = vcombine.low %v901_v55, %v916_v24 }
 0x255   : > { %v1690_v14 = vsel %vm560_vm10, %v1689_v29, %v1675_v0  ;;  %752 = vrot.lane.b32.xlu0 %v719_v6, %s6451_s29  ;;  %v10203_v0 = vld [vmem:[#allocation22_spill] sm:$0xff]  ;;  %v1179_v6 = vcombine.high %v7626_v9, %v10177_v41 }
 0x256   : > { %v1694_v3 = vrot.slane %v1690_v14, 6  ;;  %v2775_v51 = vpop.permute.xlu1 %2774  ;;  %v7620_v30 = vrot.slane %v933_v20, %v6660_v37  ;;  %v1117_v29 = vcombine.high %v10203_v0, %v10177_v41  ;;  %v1146_v14 = vrot.slane %v1132_v15, %v6650_v18 }
 0x257   : > { %v2811_v35 = vsel %vm560_vm10, %v2810_v1, %v2775_v51  ;;  %v10204_v51 = vld [vmem:[#allocation30_spill] sm:$0xff]  ;;  %v1362_v15 = vcombine.high %v10212_v61, %v10177_v41 }
 0x258   : > { %1698 = vst [vmem:[#allocation3 + $0x18] sm:$0xc] %v1694_v3  ;;  %v2821_v12 = vrot.slane %v2811_v35, 4  ;;  %970 = vrot.lane.b32.xlu1 %v885_v31, %s6445_s17  ;;  %v7634_v36 = vpop.permute.xlu0 %728  ;;  %v1115_v3 = vcombine.high %v7359_v53, %v10177_v41  ;;  %v1131_v1 = vrot.slane %v1117_v29, %v6650_v18  ;;  %v10205_v31 = vld [vmem:[#allocation31_spill] sm:$0xff]  ;;  %v1116_v53 = vcombine.high %v7378_v63, %v10177_v41 }
 0x259   : > { %760 = vrot.lane.b32.xlu0 %v720_v13, %s6450_s27  ;;  %v10206_v35 = vcombine.low %v10204_v51, %v10205_v31  ;;  %v7686_v63 = vrot.slane %v10210_v21, %v6660_v37  ;;  %v1376_v51 = vrot.slane %v1362_v15, %v6650_v18 }
 0x25a   : > { %2825 = vst [vmem:[#allocation3 + $0x20] sm:$0x30] %v2821_v12  ;;  %v7609_v22 = vpop.permute.xlu1 %724  ;;  %v1163_v13 = vcombine.low %v1131_v1, %v1146_v14  ;;  %v1164_v62 = vcombine.high %v1131_v1, %v1146_v14 }
 0x25b   : > { %v7659_v55 = vrot.slane %v10206_v35, %v6660_v37  ;;  %v1847_v1 = vcombine.high %v7686_v63, %v10177_v41  ;;  %v1345_v35 = vcombine.high %v7401_v8, %v10177_v41  ;;  %v1346_v8 = vcombine.high %v7418_v46, %v10177_v41 }
 0x25c   : > { %978 = vrot.lane.b32.xlu1 %v886_v42, %s6446_s19  ;;  %v7663_v43 = vpop.permute.xlu0 %958  ;;  %v7680_v54 = vrot.slane %v1163_v13, %v6660_v37  ;;  %v7698_v29 = vrot.slane %v1164_v62, %v6660_v37  ;;  %v10217_v62 = vld [vmem:[#allocation51_spill] sm:$0xff] }
 0x25d   : > { %982 = vrot.lane.b32.xlu0 %v949_v56, %s6451_s29  ;;  %v1409_v20 = vcombine.high %v7659_v55, %v10177_v41  ;;  %v1848_v25 = vcombine.high %v10217_v62, %v10177_v41 }
 0x25e   : > { %v7617_v49 = vpop.permute.xlu1 %732 }
 0x260   : > { %994 = vrot.lane.b32.xlu1 %v7620_v30, %s6447_s24  ;;  %v7674_v42 = vpop.permute.xlu0 %1188 }
 0x261   : > { %990 = vrot.lane.b32.xlu0 %v950_v60, %s6450_s27  ;;  %v1410_v60 = vcombine.high %v10211_v39, %v10177_v41 }
 0x262   : > { %v7637_v2 = vpop.permute.xlu1 %756 }
 0x264   : > { %1002 = vrot.lane.b32.xlu1 %v7640_v34, %s6448_s26 }
 0x265   : > { %1212 = vrot.lane.b32.xlu0 %v1179_v6, %s6451_s29  ;;  %v10213_v6 = vld [vmem:[#allocation27_spill] sm:$0xff] }
 0x266   : > { %v7650_v24 = vpop.permute.xlu1 %954  ;;  %v1347_v14 = vcombine.high %v10213_v6, %v10177_v41  ;;  %v10218_v6 = vcombine.low %v7202_v27, %v7208_v16  ;;  %v10221_v16 = vld [vmem:[#allocation33_spill] sm:$0xff] }
 0x267   : > { %v1785_v27 = vcombine.high %v10221_v16, %v10177_v41 }
 0x268   : > { %1200 = vrot.lane.b32.xlu1 %v1115_v3, %s6445_s17  ;;  %v7702_v3 = vpop.permute.xlu0 %1418  ;;  %v1361_v10 = vrot.slane %v1347_v14, %v6650_v18  ;;  %v7746_v46 = vrot.slane %v10218_v6, %v6660_v37 }
 0x269   : > { %1220 = vrot.lane.b32.xlu0 %v1180_v59, %s6450_s27  ;;  %v10214_v59 = vld [vmem:[#allocation41_spill] sm:$0xff] }
 0x26a   : > { %v7667_v12 = vpop.permute.xlu1 %962  ;;  %v10215_v13 = vcombine.low %v7156_v28, %v10214_v59  ;;  %v1393_v32 = vcombine.low %v1361_v10, %v1376_v51  ;;  %10219 = vst [vmem:[#allocation29_spill] sm:$0xff] %v7746_v46 }
 0x26c   : > { %1208 = vrot.lane.b32.xlu1 %v1116_v53, %s6446_s19  ;;  %v7719_v53 = vrot.slane %v10215_v13, %v6660_v37  ;;  %v7740_v15 = vrot.slane %v1393_v32, %v6660_v37  ;;  %v1783_v32 = vcombine.high %v7438_v11, %v10177_v41  ;;  %v1784_v11 = vcombine.high %v7457_v50, %v10177_v41 }
 0x26d   : > { %1442 = vrot.lane.b32.xlu0 %v1409_v20, %s6451_s29  ;;  %v7721_v20 = vpop.permute.xlu0 %1856  ;;  %v2532_v50 = vcombine.high %v7501_v26, %v10177_v41  ;;  %v721_v26 = vcombine.high %v7555_v19, %v10177_v41 }
 0x26e   : > { %v7677_v56 = vpop.permute.xlu1 %986  ;;  %10216 = vst [vmem:[#allocation21_spill] sm:$0xff] %v7719_v53  ;;  %v2077_v28 = vcombine.high %v7719_v53, %v10177_v41  ;;  %v1182_v53 = vcombine.high %v7698_v29, %v10177_v41 }
 0x270   : > { %1224 = vrot.lane.b32.xlu1 %v7680_v54, %s6447_s24 }
 0x271   : > { %1450 = vrot.lane.b32.xlu0 %v1410_v60, %s6450_s27  ;;  %v1394_v60 = vcombine.high %v1361_v10, %v1376_v51  ;;  %v10220_v51 = vld [vmem:[#allocation34_spill] sm:$0xff] }
 0x272   : > { %v7695_v0 = vpop.permute.xlu1 %1184 }
 0x273   : > { %v7731_v39 = vpop.permute.xlu0 %2086  ;;  %v7760_v59 = vrot.slane %v1394_v60, %v6660_v37 }
 0x274   : > { %1232 = vrot.lane.b32.xlu1 %v7698_v29, %s6448_s26 }
 0x275   : > { %1880 = vrot.lane.b32.xlu0 %v1847_v1, %s6451_s29  ;;  %v2078_v1 = vcombine.high %v7390_v52, %v10177_v41  ;;  %v2307_v52 = vcombine.high %v7746_v46, %v10177_v41  ;;  %v10229_v46 = vld [vmem:[#allocation43_spill] sm:$0xff] }
 0x276   : > { %v7710_v31 = vpop.permute.xlu1 %1192 }
 0x278   : > { %1430 = vrot.lane.b32.xlu1 %v1345_v35, %s6445_s17  ;;  %v1800_v35 = vcombine.high %v10220_v51, %v10177_v41 }
 0x279   : > { %1888 = vrot.lane.b32.xlu0 %v1848_v25, %s6450_s27 }
 0x27a   : > { %v7727_v21 = vpop.permute.xlu1 %1216  ;;  %v1814_v62 = vrot.slane %v1800_v35, %v6650_v18 }
 0x27b   : > { %v7748_v14 = vpop.permute.xlu0 %2316 }
 0x27c   : > { %1438 = vrot.lane.b32.xlu1 %v1346_v8, %s6446_s19  ;;  %v1799_v8 = vrot.slane %v1785_v27, %v6650_v18 }
 0x27d   : > { %2110 = vrot.lane.b32.xlu0 %v2077_v28, %s6451_s29  ;;  %v10223_v28 = vcombine.low %v7254_v7, %v7258_v23 }
 0x27e   : > { %v7737_v61 = vpop.permute.xlu1 %1414  ;;  %v1831_v51 = vcombine.low %v1799_v8, %v1814_v62  ;;  %v1832_v23 = vcombine.high %v1799_v8, %v1814_v62 }
 0x27f   : > { %v7781_v60 = vrot.slane %v10223_v28, %v6660_v37 }
 0x280   : > { %1454 = vrot.lane.b32.xlu1 %v7740_v15, %s6447_s24  ;;  %v7816_v8 = vrot.slane %v1832_v23, %v6660_v37  ;;  %v2013_v23 = vcombine.high %v7468_v48, %v10177_v41  ;;  %v951_v48 = vcombine.high %v7620_v30, %v10177_v41 }
 0x281   : > { %2118 = vrot.lane.b32.xlu0 %v2078_v1, %s6450_s27  ;;  %10224 = vst [vmem:[#allocation25_spill] sm:$0xff] %v7781_v60  ;;  %v2308_v1 = vcombine.high %v7449_v17, %v10177_v41  ;;  %v2531_v7 = vcombine.high %v7781_v60, %v10177_v41  ;;  %v7802_v17 = vrot.slane %v1831_v51, %v6660_v37 }
 0x282   : > { %v7757_v10 = vpop.permute.xlu1 %1422 }
 0x283   : > { %v7764_v13 = vpop.permute.xlu0 %2540 }
 0x284   : > { %10222 = vst [vmem:[#allocation52_spill] sm:$0xff] %v7764_v13  ;;  %1462 = vrot.lane.b32.xlu1 %v7760_v59, %s6448_s26 }
 0x285   : > { %2340 = vrot.lane.b32.xlu0 %v2307_v52, %s6451_s29 }
 0x286   : > { %v7772_v25 = vpop.permute.xlu1 %1446 }
 0x287   : > { %v7783_v6 = vpop.permute.xlu0 %736 }
 0x288   : > { %1868 = vrot.lane.b32.xlu1 %v1783_v32, %s6445_s17  ;;  %v10225_v32 = vld [vmem:[#allocation40_spill] sm:$0xff] }
 0x289   : > { %2348 = vrot.lane.b32.xlu0 %v2308_v1, %s6450_s27  ;;  %v2030_v28 = vcombine.high %v10225_v32, %v10177_v41  ;;  %v10227_v1 = vld [vmem:[#allocation37_spill] sm:$0xff] }
 0x28a   : > { %v7789_v35 = vpop.permute.xlu1 %1852  ;;  %v2015_v51 = vcombine.high %v10227_v1, %v10177_v41 }
 0x28b   : > { %v7793_v16 = vpop.permute.xlu0 %744 }
 0x28c   : > { %1876 = vrot.lane.b32.xlu1 %v1784_v11, %s6446_s19  ;;  %v2029_v32 = vrot.slane %v2015_v51, %v6650_v18 }
 0x28d   : > { %2564 = vrot.lane.b32.xlu0 %v2531_v7, %s6451_s29  ;;  %v2044_v7 = vrot.slane %v2030_v28, %v6650_v18  ;;  %v2014_v28 = vcombine.high %v7486_v57, %v10177_v41  ;;  %v952_v57 = vcombine.high %v7640_v34, %v10177_v41  ;;  %v1181_v34 = vcombine.high %v7680_v54, %v10177_v41 }
 0x28e   : > { %v7799_v27 = vpop.permute.xlu1 %1860 }
 0x28f   : > { %v7804_v52 = vpop.permute.xlu0 %966  ;;  %v2061_v60 = vcombine.low %v2029_v32, %v2044_v7  ;;  %v2062_v51 = vcombine.high %v2029_v32, %v2044_v7  ;;  %v10230_v32 = vld [vmem:[#allocation42_spill] sm:$0xff] }
 0x290   : > { %1892 = vrot.lane.b32.xlu1 %v7802_v17, %s6447_s24 }
 0x291   : > { %2572 = vrot.lane.b32.xlu0 %v2532_v50, %s6450_s27  ;;  %v2069_v4 = vrot.slane %v2061_v60, %v6660_v37  ;;  %v7863_v7 = vrot.slane %v2062_v51, %v6660_v37  ;;  %v2245_v60 = vcombine.high %v10230_v32, %v10177_v41  ;;  %v2243_v51 = vcombine.high %v7514_v38, %v10177_v41 }
 0x292   : > { %v7813_v62 = vpop.permute.xlu1 %1884  ;;  %v1411_v38 = vcombine.high %v7740_v15, %v10177_v41 }
 0x293   : > { %10226 = vst [vmem:[#allocation26_spill] sm:$0xff] %v7813_v62  ;;  %v7820_v11 = vpop.permute.xlu0 %974  ;;  %v1849_v62 = vcombine.high %v7802_v17, %v10177_v41 }
 0x294   : > { %1900 = vrot.lane.b32.xlu1 %v7816_v8, %s6448_s26 }
 0x295   : > { %768 = vrot.lane.b32.xlu0 %v721_v26, %s6445_s17 }
 0x296   : > { %v7828_v50 = vpop.permute.xlu1 %2082 }
 0x297   : > { %v7833_v1 = vpop.permute.xlu0 %1196 }
 0x298   : > { %2098 = vrot.lane.b32.xlu1 %v2013_v23, %s6445_s17 }
 0x299   : > { %776 = vrot.lane.b32.xlu0 %v722_v40, %s6446_s19 }
 0x29a   : > { %v7839_v19 = vpop.permute.xlu1 %2090 }
 0x29b   : > { %v7843_v26 = vpop.permute.xlu0 %1204 }
 0x29c   : > { %2106 = vrot.lane.b32.xlu1 %v2014_v28, %s6446_s19  ;;  %v2260_v28 = vcombine.high %v10229_v46, %v10177_v41 }
 0x29d   : > { %998 = vrot.lane.b32.xlu0 %v951_v48, %s6445_s17 }
 0x29e   : > { %v7849_v23 = vpop.permute.xlu1 %2114  ;;  %v2274_v46 = vrot.slane %v2260_v28, %v6650_v18  ;;  %v2244_v28 = vcombine.high %v7530_v47, %v10177_v41  ;;  %v1412_v47 = vcombine.high %v7760_v59, %v10177_v41  ;;  %v10236_v59 = vld [vmem:[#allocation23_spill] sm:$0xff] }
 0x29f   : > { %10228 = vst [vmem:[#allocation38_spill] sm:$0xff] %v7849_v23  ;;  %v7852_v40 = vpop.permute.xlu0 %1426  ;;  %v2259_v23 = vrot.slane %v2245_v60, %v6650_v18 }
 0x2a0   : > { %2122 = vrot.lane.b32.xlu1 %v2069_v4, %s6447_s24 }
 0x2a1   : > { %1006 = vrot.lane.b32.xlu0 %v952_v57, %s6446_s19  ;;  %v2291_v13 = vcombine.low %v2259_v23, %v2274_v46  ;;  %v2292_v60 = vcombine.high %v2259_v23, %v2274_v46  ;;  %v10235_v46 = vld [vmem:[#allocation46_spill] sm:$0xff] }
 0x2a2   : > { %v7860_v30 = vpop.permute.xlu1 %2312 }
 0x2a3   : > { %v7867_v48 = vpop.permute.xlu0 %1434  ;;  %v2299_v29 = vrot.slane %v2291_v13, %v6660_v37  ;;  %v2306_v23 = vrot.slane %v2292_v60, %v6660_v37  ;;  %v2467_v60 = vcombine.high %v7545_v44, %v10177_v41 }
 0x2a4   : > { %2130 = vrot.lane.b32.xlu1 %v7863_v7, %s6448_s26 }
 0x2a5   : > { %1228 = vrot.lane.b32.xlu0 %v1181_v34, %s6445_s17 }
 0x2a6   : > { %v7875_v57 = vpop.permute.xlu1 %2320 }
 0x2a7   : > { %v7880_v32 = vpop.permute.xlu0 %1864 }
 0x2a8   : > { %2328 = vrot.lane.b32.xlu1 %v2243_v51, %s6445_s17 }
 0x2a9   : > { %1236 = vrot.lane.b32.xlu0 %v1182_v53, %s6446_s19 }
 0x2aa   : > { %v7886_v54 = vpop.permute.xlu1 %2344 }
 0x2ab   : > { %10231 = vst [vmem:[#allocation24_spill] sm:$0xff] %v7886_v54  ;;  %v7890_v34 = vpop.permute.xlu0 %1872  ;;  %v10233_v54 = vld [vmem:[#allocation47_spill] sm:$0xff] }
 0x2ac   : > { %2336 = vrot.lane.b32.xlu1 %v2244_v28, %s6446_s19  ;;  %v2484_v28 = vcombine.high %v10233_v54, %v10177_v41  ;;  %v779_v54 = vsel %vm548_vm4, %v10236_v59, %v7609_v22  ;;  %v1850_v22 = vcombine.high %v7816_v8, %v10177_v41  ;;  %v2079_v8 = vcombine.high %v2069_v4, %v10177_v41 }
 0x2ad   : > { %1458 = vrot.lane.b32.xlu0 %v1411_v38, %s6445_s17  ;;  %v2469_v38 = vcombine.high %v10235_v46, %v10177_v41  ;;  %v780_v58 = vsel %vm550_vm5, %v779_v54, %v7634_v36  ;;  %v2468_v36 = vcombine.high %v7570_v5, %v10177_v41 }
 0x2ae   : > { %v7896_v51 = vpop.permute.xlu1 %2536  ;;  %v781_v17 = vsel %vm552_vm6, %v780_v58, %v7617_v49 }
 0x2af   : > { %10232 = vst [vmem:[#allocation22_spill] sm:$0xff] %v7896_v51  ;;  %v7899_v53 = vpop.permute.xlu0 %2094  ;;  %v2483_v46 = vrot.slane %v2469_v38, %v6650_v18 }
 0x2b0   : > { %2352 = vrot.lane.b32.xlu1 %v2299_v29, %s6447_s24 }
 0x2b1   : > { %1466 = vrot.lane.b32.xlu0 %v1412_v47, %s6446_s19  ;;  %v2498_v47 = vrot.slane %v2484_v28, %v6650_v18  ;;  %v782_v28 = vsel %vm554_vm7, %v781_v17, %v7783_v6  ;;  %v2080_v17 = vcombine.high %v7863_v7, %v10177_v41 }
 0x2b2   : > { %v7907_v15 = vpop.permute.xlu1 %2544 }
 0x2b3   : > { %10234 = vst [vmem:[#allocation30_spill] sm:$0xff] %v7907_v15  ;;  %v7912_v13 = vpop.permute.xlu0 %2102  ;;  %v2516_v54 = vcombine.high %v2483_v46, %v2498_v47 }
 0x2b4   : > { %2360 = vrot.lane.b32.xlu1 %v2306_v23, %s6448_s26 }
 0x2b5   : > { %1896 = vrot.lane.b32.xlu0 %v1849_v62, %s6445_s17  ;;  %v2515_v62 = vcombine.low %v2483_v46, %v2498_v47  ;;  %v2309_v46 = vcombine.high %v2299_v29, %v10177_v41  ;;  %v2310_v29 = vcombine.high %v2306_v23, %v10177_v41 }
 0x2b6   : > { %v7922_v15 = vpop.permute.xlu1 %2568 }
 0x2b7   : > { %v7929_v51 = vpop.permute.xlu0 %2324  ;;  %v2523_v6 = vrot.slane %v2515_v62, %v6660_v37  ;;  %v10237_v62 = vld [vmem:[#allocation32_spill] sm:$0xff] }
 0x2b8   : > { %2552 = vrot.lane.b32.xlu1 %v2467_v60, %s6445_s17 }
 0x2b9   : > { %1904 = vrot.lane.b32.xlu0 %v1850_v22, %s6446_s19  ;;  %v2533_v23 = vcombine.high %v2523_v6, %v10177_v41 }
 0x2ba   : > { %v741_v44 = vpop.permute.xlu1 %740 }
 0x2bb   : > { %v783_v38 = vsel %vm556_vm8, %v782_v28, %v741_v44  ;;  %v7942_v59 = vpop.permute.xlu0 %2332  ;;  %v1009_v28 = vsel %vm548_vm4, %v10237_v62, %v7650_v24  ;;  %v10238_v44 = vld [vmem:[#allocation13_spill] sm:$0xff] }
 0x2bc   : > { %2560 = vrot.lane.b32.xlu1 %v2468_v36, %s6446_s19  ;;  %v784_v58 = vsel %vm558_vm9, %v783_v38, %v7793_v16  ;;  %v2530_v16 = vrot.slane %v2516_v54, %v6660_v37  ;;  %v10239_v36 = vld [vmem:[#allocation14_spill] sm:$0xff]  ;;  %v1010_v54 = vsel %vm550_vm5, %v1009_v28, %v7663_v43 }
 0x2bd   : > { %2126 = vrot.lane.b32.xlu0 %v2079_v8, %s6445_s17  ;;  %v10240_v38 = vcombine.low %v10238_v44, %v10239_v36  ;;  %v1011_v24 = vsel %vm552_vm6, %v1010_v54, %v7667_v12  ;;  %v7998_v28 = vld [vmem:[#allocation2 + $0x2] sm:$0xff]  ;;  %v8008_v54 = vld [vmem:[#allocation2 + $0x1a] sm:$0xff] }
 0x2be   : > { %v749_v49 = vpop.permute.xlu1 %748 }
 0x2bf   : > { %v785_v60 = vsel %vm560_vm10, %v784_v58, %v749_v49  ;;  %v7951_v22 = vpop.permute.xlu0 %2548  ;;  %v2737_v8 = vrot.slane %v10240_v38, %v6660_v37  ;;  %v1012_v49 = vsel %vm554_vm7, %v1011_v24, %v7804_v52  ;;  %v2534_v38 = vcombine.high %v2530_v16, %v10177_v41 }
 0x2c0   : > { %v795_v5 = vrot.slane %v785_v60, 6  ;;  %2576 = vrot.lane.b32.xlu1 %v2523_v6, %s6447_s24 }
 0x2c1   : > { %2134 = vrot.lane.b32.xlu0 %v2080_v17, %s6446_s19 }
 0x2c2   : > { %799 = vst [vmem:[#allocation3] sm:$0xc] %v795_v5  ;;  %v7957_v4 = vpop.permute.xlu1 %764  ;;  %v10241_v5 = vcombine.high %v10238_v44, %v10239_v36 }
 0x2c3   : > { %v7960_v47 = vpop.permute.xlu0 %2556 }
 0x2c4   : > { %2584 = vrot.lane.b32.xlu1 %v2530_v16, %s6448_s26  ;;  %v2744_v43 = vrot.slane %v10241_v5, %v6660_v37 }
 0x2c5   : > { %2356 = vrot.lane.b32.xlu0 %v2309_v46, %s6445_s17 }
 0x2c6   : > { %v7968_v7 = vpop.permute.xlu1 %772 }
 0x2c7   : > { %v7976_v58 = vpop.permute.xlu0 %752 }
 0x2c8   : > { %2790 = vrot.lane.b32.xlu1 %v2737_v8, %s6447_s24 }
 0x2c9   : > { %2364 = vrot.lane.b32.xlu0 %v2310_v29, %s6446_s19 }
 0x2ca   : > { %v971_v60 = vpop.permute.xlu1 %970 }
 0x2cb   : > { %v1013_v17 = vsel %vm556_vm8, %v1012_v49, %v971_v60  ;;  %v7990_v46 = vpop.permute.xlu0 %760  ;;  %v10243_v49 = vld [vmem:[#allocation39_spill] sm:$0xff] }
 0x2cc   : > { %2798 = vrot.lane.b32.xlu1 %v2744_v43, %s6448_s26  ;;  %v1014_v12 = vsel %vm558_vm9, %v1013_v17, %v7820_v11  ;;  %v10242_v11 = vld [vmem:[#allocation19_spill] sm:$0xff]  ;;  %v1239_v60 = vsel %vm548_vm4, %v10243_v49, %v7695_v0 }
 0x2cd   : > { %2580 = vrot.lane.b32.xlu0 %v2533_v23, %s6445_s17  ;;  %v2746_v29 = vcombine.high %v10242_v11, %v10177_v41  ;;  %v1240_v5 = vsel %vm550_vm5, %v1239_v60, %v7674_v42  ;;  %v2747_v23 = vcombine.high %v2737_v8, %v10177_v41  ;;  %v10244_v60 = vld [vmem:[#allocation45_spill] sm:$0xff] }
 0x2ce   : > { %v979_v52 = vpop.permute.xlu1 %978 }
 0x2cf   : > { %v1015_v62 = vsel %vm560_vm10, %v1014_v12, %v979_v52  ;;  %v8000_v36 = vpop.permute.xlu0 %982  ;;  %v1241_v12 = vsel %vm552_vm6, %v1240_v5, %v7710_v31  ;;  %v8053_v5 = vld [vmem:[#allocation2 + $0x22] sm:$0xff] }
 0x2d0   : > { %v1025_v44 = vrot.slane %v1015_v62, 4  ;;  %2835 = vrot.lane.b32.xlu1 %v7998_v28, %s6456_s3  ;;  %v1242_v52 = vsel %vm554_vm7, %v1241_v12, %v7833_v1  ;;  %v8042_v1 = vld [vmem:[#allocation2 + $0xa] sm:$0xff] }
 0x2d1   : > { %2588 = vrot.lane.b32.xlu0 %v2534_v38, %s6446_s19  ;;  %v2748_v38 = vcombine.high %v2744_v43, %v10177_v41 }
 0x2d2   : > { %1029 = vst [vmem:[#allocation3] sm:$0x30] %v1025_v44  ;;  %v8006_v6 = vpop.permute.xlu1 %994 }
 0x2d3   : > { %v8012_v24 = vpop.permute.xlu0 %990 }
 0x2d4   : > { %2839 = vrot.lane.b32.xlu1 %v8008_v54, %s6456_s3 }
 0x2d5   : > { %2786 = vrot.lane.b32.xlu0 %v2746_v29, %s6450_s27 }
 0x2d6   : > { %v8020_v16 = vpop.permute.xlu1 %1002 }
 0x2d7   : > { %v8024_v17 = vpop.permute.xlu0 %1212 }
 0x2d9   : > { %2794 = vrot.lane.b32.xlu0 %v2747_v23, %s6445_s17 }
 0x2da   : > { %v1201_v0 = vpop.permute.xlu1 %1200 }
 0x2db   : > { %v1243_v62 = vsel %vm556_vm8, %v1242_v52, %v1201_v0  ;;  %v8033_v44 = vpop.permute.xlu0 %1220 }
 0x2dc   : > { %v1244_v42 = vsel %vm558_vm9, %v1243_v62, %v7843_v26  ;;  %v1469_v26 = vsel %vm548_vm4, %v10244_v60, %v7737_v61 }
 0x2dd   : > { %2802 = vrot.lane.b32.xlu0 %v2748_v38, %s6446_s19  ;;  %v1470_v12 = vsel %vm550_vm5, %v1469_v26, %v7702_v3 }
 0x2de   : > { %v1209_v8 = vpop.permute.xlu1 %1208  ;;  %v1471_v0 = vsel %vm552_vm6, %v1470_v12, %v7757_v10 }
 0x2df   : > { %v1245_v31 = vsel %vm560_vm10, %v1244_v42, %v1209_v8  ;;  %v8040_v29 = vpop.permute.xlu0 %1442  ;;  %v1472_v62 = vsel %vm554_vm7, %v1471_v0, %v7852_v40  ;;  %v10245_v40 = vld [vmem:[#allocation48_spill] sm:$0xff] }
 0x2e0   : > { %v1255_v11 = vrot.slane %v1245_v31, 2  ;;  %v1907_v26 = vsel %vm548_vm4, %v10245_v40, %v7789_v35 }
 0x2e1   : > { %2837 = vrot.lane.b32.xlu0 %v8042_v1, %s6456_s3  ;;  %v1908_v0 = vsel %vm550_vm5, %v1907_v26, %v7721_v20 }
 0x2e2   : > { %1259 = vst [vmem:[#allocation3] sm:$0xc0] %v1255_v11  ;;  %v8046_v49 = vpop.permute.xlu1 %1224 }
 0x2e3   : > { %v8048_v43 = vpop.permute.xlu0 %1450 }
 0x2e5   : > { %2841 = vrot.lane.b32.xlu0 %v8053_v5, %s6456_s3 }
 0x2e6   : > { %v8057_v23 = vpop.permute.xlu1 %1232 }
 0x2e7   : > { %v8061_v52 = vpop.permute.xlu0 %1880 }
 0x2ea   : > { %v1431_v38 = vpop.permute.xlu1 %1430 }
 0x2eb   : > { %v1473_v61 = vsel %vm556_vm8, %v1472_v62, %v1431_v38  ;;  %v8068_v42 = vpop.permute.xlu0 %1888  ;;  %v1909_v62 = vsel %vm552_vm6, %v1908_v0, %v7799_v27  ;;  %v786_v27 = vsel %vm548_vm4, %v7564_v45, %v7976_v58 }
 0x2ec   : > { %v1474_v8 = vsel %vm558_vm9, %v1473_v61, %v7867_v48  ;;  %v1910_v38 = vsel %vm554_vm7, %v1909_v62, %v7880_v32  ;;  %v787_v0 = vsel %vm550_vm5, %v786_v27, %v7637_v2 }
 0x2ee   : > { %v1439_v31 = vpop.permute.xlu1 %1438 }
 0x2ef   : > { %v1475_v11 = vsel %vm560_vm10, %v1474_v8, %v1439_v31  ;;  %v8073_v3 = vpop.permute.xlu0 %2110 }
 0x2f0   : > { %1483 = vst [vmem:[#allocation3 + $0x10] sm:$0x3] %v1475_v11 }
 0x2f2   : > { %v8075_v60 = vpop.permute.xlu1 %1454 }
 0x2f3   : > { %v8077_v10 = vpop.permute.xlu0 %2118 }
 0x2f6   : > { %v8082_v12 = vpop.permute.xlu1 %1462 }
 0x2f7   : > { %v8086_v48 = vpop.permute.xlu0 %2340 }
 0x2fa   : > { %v1869_v61 = vpop.permute.xlu1 %1868 }
 0x2fb   : > { %v1911_v8 = vsel %vm556_vm8, %v1910_v38, %v1869_v61  ;;  %v8093_v31 = vpop.permute.xlu0 %2348  ;;  %v788_v61 = vsel %vm552_vm6, %v787_v0, %v7990_v46 }
 0x2fc   : > { %v1912_v35 = vsel %vm558_vm9, %v1911_v8, %v7890_v34  ;;  %v10246_v34 = vld [vmem:[#allocation50_spill] sm:$0xff] }
 0x2fd   : > { %v2137_v38 = vsel %vm548_vm4, %v10246_v34, %v7828_v50 }
 0x2fe   : > { %v1877_v11 = vpop.permute.xlu1 %1876  ;;  %v2138_v45 = vsel %vm550_vm5, %v2137_v38, %v7731_v39 }
 0x2ff   : > { %v1913_v40 = vsel %vm560_vm10, %v1912_v35, %v1877_v11  ;;  %v8098_v26 = vpop.permute.xlu0 %2564  ;;  %v789_v35 = vsel %vm554_vm7, %v788_v61, %v7957_v4  ;;  %v2139_v2 = vsel %vm552_vm6, %v2138_v45, %v7839_v19  ;;  %v1016_v11 = vsel %vm548_vm4, %v7603_v33, %v8000_v36 }
 0x300   : > { %v1923_v20 = vrot.slane %v1913_v40, 4  ;;  %v2140_v46 = vsel %vm554_vm7, %v2139_v2, %v7899_v53  ;;  %v1017_v39 = vsel %vm550_vm5, %v1016_v11, %v7677_v56 }
 0x301   : > { %v1018_v19 = vsel %vm552_vm6, %v1017_v39, %v8012_v24  ;;  %v1246_v24 = vsel %vm548_vm4, %v7626_v9, %v8024_v17 }
 0x302   : > { %1927 = vst [vmem:[#allocation3 + $0x10] sm:$0x30] %v1923_v20  ;;  %v8103_v32 = vpop.permute.xlu1 %1892  ;;  %v1019_v56 = vsel %vm554_vm7, %v1018_v19, %v8006_v6  ;;  %v1247_v6 = vsel %vm550_vm5, %v1246_v24, %v7727_v21 }
 0x303   : > { %v8107_v62 = vpop.permute.xlu0 %2572 }
 0x306   : > { %v8114_v8 = vpop.permute.xlu1 %1900 }
 0x307   : > { %v769_v58 = vpop.permute.xlu0 %768 }
 0x308   : > { %v790_v50 = vsel %vm556_vm8, %v789_v35, %v769_v58  ;;  %v10247_v35 = vld [vmem:[#allocation53_spill] sm:$0xff] }
 0x309   : > { %v791_v4 = vsel %vm558_vm9, %v790_v50, %v7968_v7  ;;  %v2367_v2 = vsel %vm548_vm4, %v10247_v35, %v7860_v30  ;;  %v10252_v35 = vld [vmem:[#allocation30_spill] sm:$0xff] }
 0x30a   : > { %v2099_v40 = vpop.permute.xlu1 %2098  ;;  %v2368_v9 = vsel %vm550_vm5, %v2367_v2, %v7748_v14 }
 0x30b   : > { %v2141_v20 = vsel %vm556_vm8, %v2140_v46, %v2099_v40  ;;  %v777_v27 = vpop.permute.xlu0 %776  ;;  %v1248_v40 = vsel %vm552_vm6, %v1247_v6, %v8033_v44  ;;  %v2369_v30 = vsel %vm552_vm6, %v2368_v9, %v7875_v57  ;;  %v1476_v44 = vsel %vm548_vm4, %v7659_v55, %v8040_v29 }
 0x30c   : > { %v792_v33 = vsel %vm560_vm10, %v791_v4, %v777_v27  ;;  %v2142_v0 = vsel %vm558_vm9, %v2141_v20, %v7912_v13  ;;  %v2370_v21 = vsel %vm554_vm7, %v2369_v30, %v7929_v51  ;;  %v1477_v57 = vsel %vm550_vm5, %v1476_v44, %v7772_v25  ;;  %v10254_v30 = vld [vmem:[#allocation38_spill] sm:$0xff] }
 0x30d   : > { %v796_v36 = vrot.slane %v792_v33, 6  ;;  %v1914_v25 = vsel %vm548_vm4, %v7686_v63, %v8061_v52 }
 0x30e   : > { %v2107_v53 = vpop.permute.xlu1 %2106 }
 0x30f   : > { %v2143_v34 = vsel %vm560_vm10, %v2142_v0, %v2107_v53  ;;  %800 = vst [vmem:[#allocation3 + $0x8] sm:$0xc] %v796_v36  ;;  %v999_v61 = vpop.permute.xlu0 %998  ;;  %v1478_v36 = vsel %vm552_vm6, %v1477_v57, %v8048_v43  ;;  %v10248_v43 = vld [vmem:[#allocation22_spill] sm:$0xff]  ;;  %v10255_v57 = vld [vmem:[#allocation29_spill] sm:$0xff] }
 0x310   : > { %v2153_v38 = vrot.slane %v2143_v34, 2  ;;  %v1020_v7 = vsel %vm556_vm8, %v1019_v56, %v999_v61  ;;  %v1479_v29 = vsel %vm554_vm7, %v1478_v36, %v8075_v60  ;;  %v10250_v56 = vld [vmem:[#allocation26_spill] sm:$0xff] }
 0x311   : > { %v1021_v13 = vsel %vm558_vm9, %v1020_v7, %v8020_v16  ;;  %v1249_v16 = vsel %vm554_vm7, %v1248_v40, %v8046_v49  ;;  %v1915_v7 = vsel %vm550_vm5, %v1914_v25, %v10250_v56  ;;  %v10253_v40 = vld [vmem:[#allocation21_spill] sm:$0xff] }
 0x312   : > { %2157 = vst [vmem:[#allocation3 + $0x10] sm:$0xc0] %v2153_v38  ;;  %v8142_v45 = vpop.permute.xlu1 %2122  ;;  %v10249_v38 = vld [vmem:[#allocation55_spill] sm:$0xff] }
 0x313   : > { %v1007_v58 = vpop.permute.xlu0 %1006  ;;  %v2591_v61 = vsel %vm548_vm4, %v10249_v38, %v10248_v43 }
 0x314   : > { %v1022_v11 = vsel %vm560_vm10, %v1021_v13, %v1007_v58  ;;  %v1916_v58 = vsel %vm552_vm6, %v1915_v7, %v8068_v42  ;;  %v10251_v13 = vld [vmem:[#allocation52_spill] sm:$0xff]  ;;  %v2144_v42 = vsel %vm548_vm4, %v10253_v40, %v8073_v3 }
 0x315   : > { %v1026_v50 = vrot.slane %v1022_v11, 4  ;;  %v2592_v63 = vsel %vm550_vm5, %v2591_v61, %v10251_v13  ;;  %v1917_v52 = vsel %vm554_vm7, %v1916_v58, %v8103_v32 }
 0x316   : > { %v8155_v46 = vpop.permute.xlu1 %2130  ;;  %v2593_v2 = vsel %vm552_vm6, %v2592_v63, %v10252_v35  ;;  %v6005_v63 = vld [vmem:[#allocation3] sm:$0xff] }
 0x317   : > { %1030 = vst [vmem:[#allocation3 + $0x8] sm:$0x30] %v1026_v50  ;;  %v1229_v17 = vpop.permute.xlu0 %1228  ;;  %v2594_v6 = vsel %vm554_vm7, %v2593_v2, %v7951_v22 }
 0x318   : > { %v1250_v20 = vsel %vm556_vm8, %v1249_v16, %v1229_v17 }
 0x319   : > { %v1251_v49 = vsel %vm558_vm9, %v1250_v20, %v8057_v23  ;;  %v2145_v20 = vsel %vm550_vm5, %v2144_v42, %v10254_v30  ;;  %v10260_v30 = vld [vmem:[#allocation54_spill] sm:$0xff] }
 0x31a   : > { %v2329_v39 = vpop.permute.xlu1 %2328  ;;  %v2146_v44 = vsel %vm552_vm6, %v2145_v20, %v8077_v10 }
 0x31b   : > { %v2371_v14 = vsel %vm556_vm8, %v2370_v21, %v2329_v39  ;;  %v1237_v27 = vpop.permute.xlu0 %1236 }
 0x31c   : > { %v1252_v4 = vsel %vm560_vm10, %v1251_v49, %v1237_v27  ;;  %v2372_v51 = vsel %vm558_vm9, %v2371_v14, %v7942_v59  ;;  %v2147_v14 = vsel %vm554_vm7, %v2146_v44, %v8142_v45 }
 0x31d   : > { %v1256_v19 = vrot.slane %v1252_v4, 2 }
 0x31e   : > { %v2337_v33 = vpop.permute.xlu1 %2336 }
 0x31f   : > { %v2373_v55 = vsel %vm560_vm10, %v2372_v51, %v2337_v33  ;;  %1260 = vst [vmem:[#allocation3 + $0x8] sm:$0xc0] %v1256_v19  ;;  %v1459_v23 = vpop.permute.xlu0 %1458  ;;  %v10256_v33 = vld [vmem:[#allocation24_spill] sm:$0xff] }
 0x320   : > { %2381 = vst [vmem:[#allocation3 + $0x20] sm:$0x3] %v2373_v55  ;;  %v1480_v0 = vsel %vm556_vm8, %v1479_v29, %v1459_v23 }
 0x321   : > { %v1481_v34 = vsel %vm558_vm9, %v1480_v0, %v8082_v12 }
 0x322   : > { %v2353_v53 = vpop.permute.xlu1 %2352 }
 0x323   : > { %v1467_v59 = vpop.permute.xlu0 %1466 }
 0x324   : > { %v1482_v60 = vsel %vm560_vm10, %v1481_v34, %v1467_v59  ;;  %v10257_v59 = vld [vmem:[#allocation25_spill] sm:$0xff] }
 0x325   : > { %1484 = vst [vmem:[#allocation3 + $0x18] sm:$0x3] %v1482_v60 }
 0x326   : > { %v2361_v24 = vpop.permute.xlu1 %2360  ;;  %v6006_v56 = vld [vmem:[#allocation3 + $0x8] sm:$0xff] }
 0x327   : > { %v1897_v12 = vpop.permute.xlu0 %1896 }
 0x328   : > { %v1918_v11 = vsel %vm556_vm8, %v1917_v52, %v1897_v12 }
 0x329   : > { %v1919_v32 = vsel %vm558_vm9, %v1918_v11, %v8114_v8  ;;  %v10258_v11 = vld [vmem:[#allocation56_spill] sm:$0xff] }
 0x32a   : > { %v2553_v50 = vpop.permute.xlu1 %2552 }
 0x32b   : > { %v2595_v9 = vsel %vm556_vm8, %v2594_v6, %v2553_v50  ;;  %v1905_v16 = vpop.permute.xlu0 %1904 }
 0x32c   : > { %v1920_v17 = vsel %vm560_vm10, %v1919_v32, %v1905_v16  ;;  %v2596_v22 = vsel %vm558_vm9, %v2595_v9, %v7960_v47  ;;  %v2374_v47 = vsel %vm548_vm4, %v10255_v57, %v8086_v48 }
 0x32d   : > { %v1924_v21 = vrot.slane %v1920_v17, 4  ;;  %v2375_v45 = vsel %vm550_vm5, %v2374_v47, %v10256_v33 }
 0x32e   : > { %v2561_v39 = vpop.permute.xlu1 %2560  ;;  %v2376_v29 = vsel %vm552_vm6, %v2375_v45, %v8093_v31 }
 0x32f   : > { %v2597_v3 = vsel %vm560_vm10, %v2596_v22, %v2561_v39  ;;  %1928 = vst [vmem:[#allocation3 + $0x18] sm:$0x30] %v1924_v21  ;;  %v2127_v27 = vpop.permute.xlu0 %2126  ;;  %v2377_v23 = vsel %vm554_vm7, %v2376_v29, %v2353_v53  ;;  %v6007_v53 = vld [vmem:[#allocation3 + $0x10] sm:$0xff] }
 0x330   : > { %v2607_v8 = vrot.slane %v2597_v3, 6  ;;  %v2148_v49 = vsel %vm556_vm8, %v2147_v14, %v2127_v27  ;;  %v6223_v52 = vpack.c.bf16 %v6007_v53, %v6005_v63 }
 0x331   : > { %v2149_v10 = vsel %vm558_vm9, %v2148_v49, %v8155_v46  ;;  %v2598_v46 = vsel %vm548_vm4, %v10257_v59, %v8098_v26 }
 0x332   : > { %2611 = vst [vmem:[#allocation3 + $0x20] sm:$0xc] %v2607_v8  ;;  %v2577_v4 = vpop.permute.xlu1 %2576  ;;  %v2599_v61 = vsel %vm550_vm5, %v2598_v46, %v7922_v15 }
 0x333   : > { %v2135_v19 = vpop.permute.xlu0 %2134  ;;  %v2600_v60 = vsel %vm552_vm6, %v2599_v61, %v8107_v62  ;;  %v10259_v62 = vld [vmem:[#allocation20_spill] sm:$0xff] }
 0x334   : > { %v2150_v51 = vsel %vm560_vm10, %v2149_v10, %v2135_v19  ;;  %v2601_v58 = vsel %vm554_vm7, %v2600_v60, %v2577_v4  ;;  %v2812_v6 = vsel %vm548_vm4, %v10259_v62, %v10258_v11 }
 0x335   : > { %v2154_v36 = vrot.slane %v2150_v51, 2  ;;  %v2813_v20 = vsel %vm550_vm5, %v2812_v6, %v10260_v30 }
 0x336   : > { %v2585_v55 = vpop.permute.xlu1 %2584 }
 0x337   : > { %2158 = vst [vmem:[#allocation3 + $0x18] sm:$0xc0] %v2154_v36  ;;  %v2357_v0 = vpop.permute.xlu0 %2356 }
 0x338   : > { %v2378_v48 = vsel %vm556_vm8, %v2377_v23, %v2357_v0 }
 0x339   : > { %v2379_v43 = vsel %vm558_vm9, %v2378_v48, %v2361_v24 }
 0x33a   : > { %v2791_v25 = vpop.permute.xlu1 %2790 }
 0x33b   : > { %v2365_v34 = vpop.permute.xlu0 %2364 }
 0x33c   : > { %v2380_v38 = vsel %vm560_vm10, %v2379_v43, %v2365_v34 }
 0x33d   : > { %2382 = vst [vmem:[#allocation3 + $0x28] sm:$0x3] %v2380_v38 }
 0x33e   : > { %v2799_v31 = vpop.permute.xlu1 %2798  ;;  %v6008_v7 = vld [vmem:[#allocation3 + $0x18] sm:$0xff] }
 0x33f   : > { %v2581_v13 = vpop.permute.xlu0 %2580  ;;  %v6221_v26 = vpack.c.bf16 %v6008_v7, %v6006_v56 }
 0x340   : > { %v2602_v24 = vsel %vm556_vm8, %v2601_v58, %v2581_v13 }
 0x341   : > { %6222 = vmatprep.subr.bf16.mxu0 %v6221_v26  ;;  %v2603_v2 = vsel %vm558_vm9, %v2602_v24, %v2585_v55 }
 0x342   : > { %v2836_v12 = vpop.permute.xlu1 %2835  ;;  %6224 = vmatpush1.bf16.msra.mxu0 %v6223_v52 }
 0x343   : > { %v2847_v15 = vcombine.high %v2836_v12, %v10177_v41  ;;  %v2589_v35 = vpop.permute.xlu0 %2588  ;;  %v2854_v9 = vrot.slane %v2836_v12, %v6650_v18 }
 0x344   : > { %v2604_v50 = vsel %vm560_vm10, %v2603_v2, %v2589_v35 }
 0x345   : > { %v2608_v40 = vrot.slane %v2604_v50, 6  ;;  %v2861_v17 = vrot.slane %v2847_v15, %v6650_v18 }
 0x346   : > { %v2840_v42 = vpop.permute.xlu1 %2839 }
 0x347   : > { %v2862_v16 = vcombine.high %v2840_v42, %v10177_v41  ;;  %v2869_v32 = vrot.slane %v2840_v42, %v6650_v18  ;;  %2612 = vst [vmem:[#allocation3 + $0x28] sm:$0xc] %v2608_v40  ;;  %v2787_v21 = vpop.permute.xlu0 %2786 }
 0x348   : > { %v2814_v3 = vsel %vm552_vm6, %v2813_v20, %v2787_v21 }
 0x349   : > { %v2876_v22 = vrot.slane %v2862_v16, %v6650_v18  ;;  %v2877_v39 = vcombine.low %v2854_v9, %v2869_v32  ;;  %v2878_v44 = vcombine.high %v2854_v9, %v2869_v32  ;;  %v2815_v4 = vsel %vm554_vm7, %v2814_v3, %v2791_v25 }
 0x34b   : > { %v2885_v14 = vrot.slane %v2877_v39, %v6660_v37  ;;  %v2893_v8 = vcombine.low %v2861_v17, %v2876_v22  ;;  %v2892_v27 = vrot.slane %v2878_v44, %v6660_v37  ;;  %v2795_v49 = vpop.permute.xlu0 %2794  ;;  %v2894_v19 = vcombine.high %v2861_v17, %v2876_v22 }
 0x34c   : > { %v2816_v57 = vsel %vm556_vm8, %v2815_v4, %v2795_v49 }
 0x34d   : > { %2984 = vrot.lane.b32.xlu0 %v2892_v27, %s6449_s15  ;;  %v2909_v47 = vcombine.high %v2885_v14, %v10177_v41  ;;  %v2901_v10 = vrot.slane %v2893_v8, %v6660_v37  ;;  %v2817_v33 = vsel %vm558_vm9, %v2816_v57, %v2799_v31  ;;  %v2910_v36 = vcombine.high %v2892_v27, %v10177_v41 }
 0x34e   : > { %v2908_v29 = vrot.slane %v2894_v19, %v6660_v37 }
 0x34f   : > { %2980 = vrot.lane.b32.xlu1 %v2909_v47, %s6451_s29  ;;  %v2803_v51 = vpop.permute.xlu0 %2802  ;;  %v2911_v0 = vcombine.high %v2901_v10, %v10177_v41 }
 0x350   : > { %v2818_v45 = vsel %vm560_vm10, %v2817_v33, %v2803_v51  ;;  %v2912_v43 = vcombine.high %v2908_v29, %v10177_v41 }
 0x351   : > { %2992 = vrot.lane.b32.xlu0 %v2901_v10, %s6447_s24  ;;  %v2822_v55 = vrot.slane %v2818_v45, 4 }
 0x353   : > { %2988 = vrot.lane.b32.xlu1 %v2910_v36, %s6450_s27  ;;  %2826 = vst [vmem:[#allocation3 + $0x28] sm:$0x30] %v2822_v55  ;;  %v2838_v23 = vpop.permute.xlu0 %2837 }
 0x354   : > { %v2913_v48 = vcombine.high %v2838_v23, %v10177_v41  ;;  %v2920_v59 = vrot.slane %v2838_v23, %v6650_v18 }
 0x355   : > { %3000 = vrot.lane.b32.xlu0 %v2908_v29, %s6448_s26 }
 0x356   : > { %v2927_v38 = vrot.slane %v2913_v48, %v6650_v18 }
 0x357   : > { %2996 = vrot.lane.b32.xlu1 %v2911_v0, %s6445_s17  ;;  %v2842_v25 = vpop.permute.xlu0 %2841 }
 0x358   : > { %v2928_v46 = vcombine.high %v2842_v25, %v10177_v41  ;;  %v2935_v34 = vrot.slane %v2842_v25, %v6650_v18 }
 0x35a   : > { %v2942_v61 = vrot.slane %v2928_v46, %v6650_v18  ;;  %v2943_v31 = vcombine.low %v2920_v59, %v2935_v34  ;;  %v2944_v53 = vcombine.high %v2920_v59, %v2935_v34 }
 0x35b   : > { %3004 = vrot.lane.b32.xlu1 %v2912_v43, %s6446_s19 }
 0x35c   : > { %v2951_v60 = vrot.slane %v2943_v31, %v6660_v37  ;;  %v2959_v56 = vcombine.low %v2927_v38, %v2942_v61  ;;  %v2958_v7 = vrot.slane %v2944_v53, %v6660_v37  ;;  %v2960_v13 = vcombine.high %v2927_v38, %v2942_v61 }
 0x35e   : > { %v2975_v58 = vcombine.high %v2951_v60, %v10177_v41  ;;  %v2967_v26 = vrot.slane %v2959_v56, %v6660_v37  ;;  %v2976_v63 = vcombine.high %v2958_v7, %v10177_v41  ;;  %v2974_v24 = vrot.slane %v2960_v13, %v6660_v37 }
 0x35f   : > { %3012 = vrot.lane.b32.xlu1 %v2958_v7, %s6449_s15 }
 0x360   : > { %3008 = vrot.lane.b32.xlu0 %v2975_v58, %s6451_s29  ;;  %v2977_v52 = vcombine.high %v2967_v26, %v10177_v41  ;;  %v2978_v12 = vcombine.high %v2974_v24, %v10177_v41 }
 0x363   : > { %3020 = vrot.lane.b32.xlu1 %v2967_v26, %s6447_s24 }
 0x364   : > { %3016 = vrot.lane.b32.xlu0 %v2976_v63, %s6450_s27 }
 0x367   : > { %3028 = vrot.lane.b32.xlu1 %v2974_v24, %s6448_s26 }
 0x368   : > { %3024 = vrot.lane.b32.xlu0 %v2977_v52, %s6445_s17 }
 0x36b   : > { %3065 = vrot.lane.b32.xlu1 %v7998_v28, %s6457_s4 }
 0x36c   : > { %3032 = vrot.lane.b32.xlu0 %v2978_v12, %s6446_s19 }
 0x36f   : > { %3069 = vrot.lane.b32.xlu1 %v8008_v54, %s6457_s4 }
 0x370   : > { %3067 = vrot.lane.b32.xlu0 %v8042_v1, %s6457_s4 }
 0x374   : > { %3071 = vrot.lane.b32.xlu0 %v8053_v5, %s6457_s4 }
 0x3bf   : > { %v2985_v15 = vpop.permute.xlu0 %2984 }
 0x3c1   : > { %v2981_v35 = vpop.permute.xlu1 %2980 }
 0x3c2   : > { %v3035_v2 = vsel %vm548_vm4, %v2885_v14, %v2981_v35 }
 0x3c3   : > { %v3036_v11 = vsel %vm550_vm5, %v3035_v2, %v2985_v15  ;;  %v2993_v6 = vpop.permute.xlu0 %2992 }
 0x3c5   : > { %v2989_v62 = vpop.permute.xlu1 %2988 }
 0x3c6   : > { %v3037_v50 = vsel %vm552_vm6, %v3036_v11, %v2989_v62 }
 0x3c7   : > { %v3038_v40 = vsel %vm554_vm7, %v3037_v50, %v2993_v6  ;;  %v3001_v16 = vpop.permute.xlu0 %3000 }
 0x3c9   : > { %v2997_v42 = vpop.permute.xlu1 %2996 }
 0x3ca   : > { %v3039_v9 = vsel %vm556_vm8, %v3038_v40, %v2997_v42 }
 0x3cb   : > { %v3040_v32 = vsel %vm558_vm9, %v3039_v9, %v3001_v16 }
 0x3cd   : > { %v3005_v17 = vpop.permute.xlu1 %3004 }
 0x3ce   : > { %v3041_v30 = vsel %vm560_vm10, %v3040_v32, %v3005_v17 }
 0x3cf   : > { %v3051_v20 = vrot.slane %v3041_v30, 2 }
 0x3d1   : > { %3055 = vst [vmem:[#allocation3 + $0x20] sm:$0xc0] %v3051_v20  ;;  %v3013_v21 = vpop.permute.xlu1 %3012 }
 0x3d2   : > { %v3009_v22 = vpop.permute.xlu0 %3008 }
 0x3d3   : > { %v3042_v39 = vsel %vm548_vm4, %v2951_v60, %v3009_v22 }
 0x3d4   : > { %v3043_v14 = vsel %vm550_vm5, %v3042_v39, %v3013_v21 }
 0x3d5   : > { %v3021_v44 = vpop.permute.xlu1 %3020 }
 0x3d6   : > { %v3017_v3 = vpop.permute.xlu0 %3016 }
 0x3d7   : > { %v3044_v8 = vsel %vm552_vm6, %v3043_v14, %v3017_v3 }
 0x3d8   : > { %v3045_v4 = vsel %vm554_vm7, %v3044_v8, %v3021_v44 }
 0x3d9   : > { %v3029_v27 = vpop.permute.xlu1 %3028 }
 0x3da   : > { %v3025_v49 = vpop.permute.xlu0 %3024 }
 0x3db   : > { %v3046_v57 = vsel %vm556_vm8, %v3045_v4, %v3025_v49 }
 0x3dc   : > { %v3047_v10 = vsel %vm558_vm9, %v3046_v57, %v3029_v27 }
 0x3dd   : > { %v3066_v47 = vpop.permute.xlu1 %3065 }
 0x3de   : > { %v3033_v19 = vpop.permute.xlu0 %3032  ;;  %v3077_v33 = vcombine.high %v3066_v47, %v10177_v41  ;;  %v3084_v55 = vrot.slane %v3066_v47, %v6650_v18 }
 0x3df   : > { %v3048_v51 = vsel %vm560_vm10, %v3047_v10, %v3033_v19 }
 0x3e0   : > { %v3052_v45 = vrot.slane %v3048_v51, 2  ;;  %v3091_v46 = vrot.slane %v3077_v33, %v6650_v18 }
 0x3e1   : > { %v3070_v36 = vpop.permute.xlu1 %3069 }
 0x3e2   : > { %v3092_v29 = vcombine.high %v3070_v36, %v10177_v41  ;;  %v3099_v23 = vrot.slane %v3070_v36, %v6650_v18  ;;  %3056 = vst [vmem:[#allocation3 + $0x28] sm:$0xc0] %v3052_v45  ;;  %v3068_v0 = vpop.permute.xlu0 %3067 }
 0x3e3   : > { %v3150_v60 = vrot.slane %v3068_v0, %v6650_v18  ;;  %v3143_v63 = vcombine.high %v3068_v0, %v10177_v41 }
 0x3e4   : > { %v3106_v48 = vrot.slane %v3092_v29, %v6650_v18  ;;  %v3107_v25 = vcombine.low %v3084_v55, %v3099_v23  ;;  %v3108_v59 = vcombine.high %v3084_v55, %v3099_v23 }
 0x3e5   : > { %v3157_v2 = vrot.slane %v3143_v63, %v6650_v18 }
 0x3e6   : > { %v3115_v34 = vrot.slane %v3107_v25, %v6660_v37  ;;  %v3123_v43 = vcombine.low %v3091_v46, %v3106_v48  ;;  %v3072_v38 = vpop.permute.xlu0 %3071  ;;  %v3122_v61 = vrot.slane %v3108_v59, %v6660_v37  ;;  %v3124_v56 = vcombine.high %v3091_v46, %v3106_v48 }
 0x3e7   : > { %v3165_v31 = vrot.slane %v3072_v38, %v6650_v18  ;;  %v3158_v7 = vcombine.high %v3072_v38, %v10177_v41 }
 0x3e8   : > { %v3139_v53 = vcombine.high %v3115_v34, %v10177_v41  ;;  %3214 = vrot.lane.b32.xlu0 %v3122_v61, %s6449_s15  ;;  %v3131_v13 = vrot.slane %v3123_v43, %v6660_v37  ;;  %v3140_v26 = vcombine.high %v3122_v61, %v10177_v41  ;;  %v3138_v15 = vrot.slane %v3124_v56, %v6660_v37 }
 0x3e9   : > { %v3173_v58 = vcombine.low %v3150_v60, %v3165_v31  ;;  %v3172_v24 = vrot.slane %v3158_v7, %v6650_v18  ;;  %v3174_v52 = vcombine.high %v3150_v60, %v3165_v31 }
 0x3ea   : > { %3210 = vrot.lane.b32.xlu1 %v3139_v53, %s6451_s29  ;;  %v3141_v35 = vcombine.high %v3131_v13, %v10177_v41  ;;  %v3142_v50 = vcombine.high %v3138_v15, %v10177_v41 }
 0x3eb   : > { %v3181_v12 = vrot.slane %v3173_v58, %v6660_v37  ;;  %v3188_v11 = vrot.slane %v3174_v52, %v6660_v37  ;;  %v3189_v62 = vcombine.low %v3157_v2, %v3172_v24  ;;  %v3190_v40 = vcombine.high %v3157_v2, %v3172_v24 }
 0x3ec   : > { %3222 = vrot.lane.b32.xlu0 %v3131_v13, %s6447_s24 }
 0x3ed   : > { %v3205_v6 = vcombine.high %v3181_v12, %v10177_v41  ;;  %v3206_v42 = vcombine.high %v3188_v11, %v10177_v41  ;;  %v3197_v9 = vrot.slane %v3189_v62, %v6660_v37  ;;  %v3204_v32 = vrot.slane %v3190_v40, %v6660_v37 }
 0x3ee   : > { %3218 = vrot.lane.b32.xlu1 %v3140_v26, %s6450_s27 }
 0x3ef   : > { %v3207_v16 = vcombine.high %v3197_v9, %v10177_v41  ;;  %v3208_v17 = vcombine.high %v3204_v32, %v10177_v41 }
 0x3f0   : > { %3230 = vrot.lane.b32.xlu0 %v3138_v15, %s6448_s26 }
 0x3f2   : > { %3226 = vrot.lane.b32.xlu1 %v3141_v35, %s6445_s17 }
 0x3f4   : > { %3238 = vrot.lane.b32.xlu0 %v3205_v6, %s6451_s29 }
 0x3f6   : > { %3234 = vrot.lane.b32.xlu1 %v3142_v50, %s6446_s19 }
 0x3f8   : > { %3246 = vrot.lane.b32.xlu0 %v3206_v42, %s6450_s27 }
 0x3fa   : > { %3242 = vrot.lane.b32.xlu1 %v3188_v11, %s6449_s15 }
 0x3fc   : > { %3254 = vrot.lane.b32.xlu0 %v3207_v16, %s6445_s17 }
 0x3fe   : > { %3250 = vrot.lane.b32.xlu1 %v3197_v9, %s6447_s24 }
 0x400   : > { %3262 = vrot.lane.b32.xlu0 %v3208_v17, %s6446_s19 }
 0x402   : > { %3258 = vrot.lane.b32.xlu1 %v3204_v32, %s6448_s26 }
 0x404   : > { %3291 = vrot.lane.b32.xlu0 %v8042_v1, %s6458_s5 }
 0x406   : > { %3289 = vrot.lane.b32.xlu1 %v7998_v28, %s6458_s5 }
 0x408   : > { %3295 = vrot.lane.b32.xlu0 %v8053_v5, %s6458_s5 }
 0x40a   : > { %3293 = vrot.lane.b32.xlu1 %v8008_v54, %s6458_s5 }
 0x45a   : > { %v3215_v30 = vpop.permute.xlu0 %3214 }
 0x45c   : > { %v3211_v20 = vpop.permute.xlu1 %3210 }
 0x45d   : > { %v3265_v21 = vsel %vm548_vm4, %v3115_v34, %v3211_v20 }
 0x45e   : > { %v3223_v22 = vpop.permute.xlu0 %3222  ;;  %v3266_v39 = vsel %vm550_vm5, %v3265_v21, %v3215_v30 }
 0x460   : > { %v3219_v44 = vpop.permute.xlu1 %3218 }
 0x461   : > { %v3267_v3 = vsel %vm552_vm6, %v3266_v39, %v3219_v44 }
 0x462   : > { %v3231_v14 = vpop.permute.xlu0 %3230  ;;  %v3268_v8 = vsel %vm554_vm7, %v3267_v3, %v3223_v22 }
 0x464   : > { %v3227_v27 = vpop.permute.xlu1 %3226 }
 0x465   : > { %v3269_v49 = vsel %vm556_vm8, %v3268_v8, %v3227_v27 }
 0x466   : > { %v3239_v4 = vpop.permute.xlu0 %3238  ;;  %v3270_v57 = vsel %vm558_vm9, %v3269_v49, %v3231_v14 }
 0x467   : > { %v3272_v51 = vsel %vm548_vm4, %v3181_v12, %v3239_v4 }
 0x468   : > { %v3235_v47 = vpop.permute.xlu1 %3234 }
 0x469   : > { %v3271_v19 = vsel %vm560_vm10, %v3270_v57, %v3235_v47 }
 0x46a   : > { %3279 = vst [vmem:[#allocation3 + $0x30] sm:$0x3] %v3271_v19  ;;  %v3247_v10 = vpop.permute.xlu0 %3246 }
 0x46c   : > { %v3243_v33 = vpop.permute.xlu1 %3242 }
 0x46d   : > { %v3273_v45 = vsel %vm550_vm5, %v3272_v51, %v3243_v33 }
 0x46e   : > { %v3255_v36 = vpop.permute.xlu0 %3254  ;;  %v3274_v55 = vsel %vm552_vm6, %v3273_v45, %v3247_v10 }
 0x470   : > { %v3251_v29 = vpop.permute.xlu1 %3250 }
 0x471   : > { %v3275_v23 = vsel %vm554_vm7, %v3274_v55, %v3251_v29 }
 0x472   : > { %v3263_v0 = vpop.permute.xlu0 %3262  ;;  %v3276_v48 = vsel %vm556_vm8, %v3275_v23, %v3255_v36 }
 0x474   : > { %v3259_v25 = vpop.permute.xlu1 %3258 }
 0x475   : > { %v3277_v59 = vsel %vm558_vm9, %v3276_v48, %v3259_v25 }
 0x476   : > { %v3278_v46 = vsel %vm560_vm10, %v3277_v59, %v3263_v0  ;;  %v3292_v34 = vpop.permute.xlu0 %3291 }
 0x477   : > { %3280 = vst [vmem:[#allocation3 + $0x38] sm:$0x3] %v3278_v46  ;;  %v3374_v15 = vrot.slane %v3292_v34, %v6650_v18  ;;  %v3367_v50 = vcombine.high %v3292_v34, %v10177_v41 }
 0x478   : > { %v3290_v43 = vpop.permute.xlu1 %3289 }
 0x479   : > { %v3301_v38 = vcombine.high %v3290_v43, %v10177_v41  ;;  %v3308_v31 = vrot.slane %v3290_v43, %v6650_v18  ;;  %v3381_v17 = vrot.slane %v3367_v50, %v6650_v18 }
 0x47a   : > { %v3296_v56 = vpop.permute.xlu0 %3295 }
 0x47b   : > { %v3315_v7 = vrot.slane %v3301_v38, %v6650_v18  ;;  %v3389_v63 = vrot.slane %v3296_v56, %v6650_v18  ;;  %v3382_v2 = vcombine.high %v3296_v56, %v10177_v41 }
 0x47c   : > { %v3294_v61 = vpop.permute.xlu1 %3293 }
 0x47d   : > { %v3316_v53 = vcombine.high %v3294_v61, %v10177_v41  ;;  %v3323_v60 = vrot.slane %v3294_v61, %v6650_v18  ;;  %v3397_v11 = vcombine.low %v3374_v15, %v3389_v63  ;;  %v3396_v42 = vrot.slane %v3382_v2, %v6650_v18 }
 0x47e   : > { %v3398_v9 = vcombine.high %v3374_v15, %v3389_v63 }
 0x47f   : > { %v3330_v58 = vrot.slane %v3316_v53, %v6650_v18  ;;  %v3331_v13 = vcombine.low %v3308_v31, %v3323_v60  ;;  %v3332_v26 = vcombine.high %v3308_v31, %v3323_v60  ;;  %v3405_v16 = vrot.slane %v3397_v11, %v6660_v37 }
 0x480   : > { %v3412_v20 = vrot.slane %v3398_v9, %v6660_v37  ;;  %v3413_v21 = vcombine.low %v3381_v17, %v3396_v42  ;;  %v3414_v44 = vcombine.high %v3381_v17, %v3396_v42 }
 0x481   : > { %v3339_v24 = vrot.slane %v3331_v13, %v6660_v37  ;;  %v3347_v52 = vcombine.low %v3315_v7, %v3330_v58  ;;  %v3346_v12 = vrot.slane %v3332_v26, %v6660_v37  ;;  %v3348_v62 = vcombine.high %v3315_v7, %v3330_v58 }
 0x482   : > { %v3429_v22 = vcombine.high %v3405_v16, %v10177_v41  ;;  %v3430_v3 = vcombine.high %v3412_v20, %v10177_v41  ;;  %v3421_v14 = vrot.slane %v3413_v21, %v6660_v37  ;;  %v3428_v27 = vrot.slane %v3414_v44, %v6660_v37 }
 0x483   : > { %3438 = vrot.lane.b32.xlu0 %v3346_v12, %s6449_s15  ;;  %v3363_v35 = vcombine.high %v3339_v24, %v10177_v41  ;;  %v3355_v6 = vrot.slane %v3347_v52, %v6660_v37  ;;  %v3364_v40 = vcombine.high %v3346_v12, %v10177_v41  ;;  %v3362_v32 = vrot.slane %v3348_v62, %v6660_v37 }
 0x484   : > { %v3431_v8 = vcombine.high %v3421_v14, %v10177_v41  ;;  %v3432_v49 = vcombine.high %v3428_v27, %v10177_v41 }
 0x485   : > { %3434 = vrot.lane.b32.xlu1 %v3363_v35, %s6451_s29  ;;  %v3365_v30 = vcombine.high %v3355_v6, %v10177_v41  ;;  %v3366_v39 = vcombine.high %v3362_v32, %v10177_v41 }
 0x487   : > { %3446 = vrot.lane.b32.xlu0 %v3355_v6, %s6447_s24 }
 0x489   : > { %3442 = vrot.lane.b32.xlu1 %v3364_v40, %s6450_s27 }
 0x48b   : > { %3454 = vrot.lane.b32.xlu0 %v3362_v32, %s6448_s26 }
 0x48d   : > { %3450 = vrot.lane.b32.xlu1 %v3365_v30, %s6445_s17 }
 0x48f   : > { %3462 = vrot.lane.b32.xlu0 %v3429_v22, %s6451_s29 }
 0x491   : > { %3458 = vrot.lane.b32.xlu1 %v3366_v39, %s6446_s19  ;;  %v6307_v39 = vld [vmem:[#allocation2 + $0xb] sm:$0xff] }
 0x493   : > { %3470 = vrot.lane.b32.xlu0 %v3430_v3, %s6450_s27  ;;  %v6308_v3 = vld [vmem:[#allocation2 + $0x23] sm:$0xff] }
 0x495   : > { %3466 = vrot.lane.b32.xlu1 %v3412_v20, %s6449_s15 }
 0x497   : > { %3478 = vrot.lane.b32.xlu0 %v3431_v8, %s6445_s17  ;;  %v8504_v8 = vld [vmem:[#allocation2 + $0x24] sm:$0xff] }
 0x499   : > { %3474 = vrot.lane.b32.xlu1 %v3421_v14, %s6447_s24  ;;  %v8497_v14 = vld [vmem:[#allocation2 + $0xc] sm:$0xff] }
 0x49b   : > { %3486 = vrot.lane.b32.xlu0 %v3432_v49, %s6446_s19  ;;  %v6310_v49 = vld [vmem:[#allocation2 + $0x1b] sm:$0xff] }
 0x49d   : > { %3482 = vrot.lane.b32.xlu1 %v3428_v27, %s6448_s26  ;;  %v6309_v27 = vld [vmem:[#allocation2 + $0x3] sm:$0xff] }
 0x49f   : > { %3521 = vrot.lane.b32.xlu0 %v8042_v1, %s6459_s6 }
 0x4a1   : > { %3519 = vrot.lane.b32.xlu1 %v7998_v28, %s6459_s6 }
 0x4a3   : > { %3525 = vrot.lane.b32.xlu0 %v8053_v5, %s6459_s6 }
 0x4a5   : > { %3523 = vrot.lane.b32.xlu1 %v8008_v54, %s6459_s6 }
 0x4f5   : > { %v3439_v4 = vpop.permute.xlu0 %3438 }
 0x4f7   : > { %v3435_v57 = vpop.permute.xlu1 %3434 }
 0x4f8   : > { %v3489_v47 = vsel %vm548_vm4, %v3339_v24, %v3435_v57  ;;  %v8526_v57 = vld [vmem:[#allocation2 + $0x1c] sm:$0xff] }
 0x4f9   : > { %v3447_v19 = vpop.permute.xlu0 %3446  ;;  %v3490_v10 = vsel %vm550_vm5, %v3489_v47, %v3439_v4  ;;  %v8519_v4 = vld [vmem:[#allocation2 + $0x4] sm:$0xff] }
 0x4fb   : > { %v3443_v51 = vpop.permute.xlu1 %3442 }
 0x4fc   : > { %v3491_v33 = vsel %vm552_vm6, %v3490_v10, %v3443_v51  ;;  %v3833_v51 = vrot.slane %v6308_v3, %v6650_v18 }
 0x4fd   : > { %v3455_v1 = vpop.permute.xlu0 %3454  ;;  %v3492_v45 = vsel %vm554_vm7, %v3491_v33, %v3447_v19 }
 0x4ff   : > { %v3451_v28 = vpop.permute.xlu1 %3450 }
 0x500   : > { %v3493_v36 = vsel %vm556_vm8, %v3492_v45, %v3451_v28  ;;  %v3767_v28 = vrot.slane %v6310_v49, %v6650_v18 }
 0x501   : > { %v3463_v5 = vpop.permute.xlu0 %3462  ;;  %v3494_v55 = vsel %vm558_vm9, %v3493_v36, %v3455_v1  ;;  %v3818_v1 = vrot.slane %v6307_v39, %v6650_v18 }
 0x502   : > { %v3496_v48 = vsel %vm548_vm4, %v3405_v16, %v3463_v5 }
 0x503   : > { %v3459_v54 = vpop.permute.xlu1 %3458  ;;  %v3841_v45 = vcombine.low %v3818_v1, %v3833_v51 }
 0x504   : > { %v3495_v29 = vsel %vm560_vm10, %v3494_v55, %v3459_v54  ;;  %v3752_v55 = vrot.slane %v6309_v27, %v6650_v18 }
 0x505   : > { %v3505_v23 = vrot.slane %v3495_v29, 6  ;;  %v3471_v0 = vpop.permute.xlu0 %3470  ;;  %v8560_v54 = vrot.slane %v3841_v45, %v6660_v37 }
 0x506   : > { %v3775_v29 = vcombine.low %v3752_v55, %v3767_v28 }
 0x507   : > { %3509 = vst [vmem:[#allocation3 + $0x30] sm:$0xc] %v3505_v23  ;;  %v3467_v25 = vpop.permute.xlu1 %3466  ;;  %10263 = vst [vmem:[#allocation35_spill] sm:$0xff] %v8560_v54 }
 0x508   : > { %v3497_v59 = vsel %vm550_vm5, %v3496_v48, %v3467_v25  ;;  %v3873_v48 = vcombine.high %v8560_v54, %v10177_v41  ;;  %v8569_v25 = vrot.slane %v3775_v29, %v6660_v37 }
 0x509   : > { %v3479_v46 = vpop.permute.xlu0 %3478  ;;  %v3498_v34 = vsel %vm552_vm6, %v3497_v59, %v3471_v0  ;;  %v3842_v0 = vcombine.high %v3818_v1, %v3833_v51 }
 0x50a   : > { %10264 = vst [vmem:[#allocation36_spill] sm:$0xff] %v8569_v25 }
 0x50b   : > { %v3475_v43 = vpop.permute.xlu1 %3474  ;;  %v3856_v59 = vrot.slane %v3842_v0, %v6660_v37 }
 0x50c   : > { %v3499_v38 = vsel %vm554_vm7, %v3498_v34, %v3475_v43  ;;  %v3807_v34 = vcombine.high %v8569_v25, %v10177_v41 }
 0x50d   : > { %v3487_v61 = vpop.permute.xlu0 %3486  ;;  %v3500_v31 = vsel %vm556_vm8, %v3499_v38, %v3479_v46  ;;  %v3776_v46 = vcombine.high %v3752_v55, %v3767_v28 }
 0x50f   : > { %v3483_v53 = vpop.permute.xlu1 %3482  ;;  %v3790_v38 = vrot.slane %v3776_v46, %v6660_v37 }
 0x510   : > { %v3501_v60 = vsel %vm558_vm9, %v3500_v31, %v3483_v53  ;;  %v10265_v53 = vld [vmem:[#allocation16_spill] sm:$0xff] }
 0x511   : > { %v3502_v56 = vsel %vm560_vm10, %v3501_v60, %v3487_v61  ;;  %v8451_v7 = vpop.permute.xlu0 %3521  ;;  %v10266_v60 = vld [vmem:[#allocation15_spill] sm:$0xff] }
 0x512   : > { %v3506_v58 = vrot.slane %v3502_v56, 6  ;;  %v3597_v26 = vcombine.high %v8451_v7, %v10177_v41  ;;  %v3604_v19 = vrot.slane %v8451_v7, %v6650_v18  ;;  %v3857_v56 = vcombine.low %v10266_v60, %v10265_v53 }
 0x513   : > { %v3520_v13 = vpop.permute.xlu1 %3519  ;;  %v3874_v7 = vcombine.high %v3856_v59, %v10177_v41 }
 0x514   : > { %3510 = vst [vmem:[#allocation3 + $0x38] sm:$0xc] %v3506_v58  ;;  %v3531_v24 = vcombine.high %v3520_v13, %v10177_v41  ;;  %v8458_v15 = vrot.slane %v3597_v26, %v6650_v18  ;;  %v3538_v11 = vrot.slane %v3520_v13, %v6650_v18  ;;  %v3865_v58 = vrot.slane %v3857_v56, %v6660_v37  ;;  %v10267_v13 = vld [vmem:[#allocation18_spill] sm:$0xff]  ;;  %v10268_v26 = vld [vmem:[#allocation17_spill] sm:$0xff] }
 0x515   : > { %v3526_v63 = vpop.permute.xlu0 %3525 }
 0x516   : > { %v3612_v52 = vcombine.high %v3526_v63, %v10177_v41  ;;  %v8467_v6 = vrot.slane %v3531_v24, %v6650_v18  ;;  %v3619_v47 = vrot.slane %v3526_v63, %v6650_v18  ;;  %v3791_v63 = vcombine.low %v10268_v26, %v10267_v13 }
 0x517   : > { %v3524_v12 = vpop.permute.xlu1 %3523  ;;  %v3808_v24 = vcombine.high %v3790_v38, %v10177_v41 }
 0x518   : > { %v8461_v35 = vrot.slane %v3612_v52, %v6650_v18  ;;  %v3546_v2 = vcombine.high %v3524_v12, %v10177_v41  ;;  %v3553_v62 = vrot.slane %v3524_v12, %v6650_v18  ;;  %v3627_v10 = vcombine.low %v3604_v19, %v3619_v47 }
 0x519   : > { %v3628_v36 = vcombine.high %v3604_v19, %v3619_v47  ;;  %v8596_v52 = vrot.slane %v3791_v63, %v6660_v37 }
 0x51a   : > { %v8472_v40 = vrot.slane %v3546_v2, %v6650_v18  ;;  %v3561_v42 = vcombine.low %v3538_v11, %v3553_v62  ;;  %v3562_v9 = vcombine.high %v3538_v11, %v3553_v62  ;;  %v8546_v33 = vrot.slane %v3627_v10, %v6660_v37 }
 0x51b   : > { %v3642_v23 = vrot.slane %v3628_v36, %v6660_v37  ;;  %v3643_v43 = vcombine.low %v8458_v15, %v8461_v35  ;;  %v3875_v2 = vcombine.high %v3865_v58, %v10177_v41 }
 0x51c   : > { %v8477_v32 = vrot.slane %v3561_v42, %v6660_v37  ;;  %v3577_v17 = vcombine.low %v8467_v6, %v8472_v40  ;;  %v3576_v30 = vrot.slane %v3562_v9, %v6660_v37  ;;  %10262 = vst [vmem:[#allocation44_spill] sm:$0xff] %v8546_v33  ;;  %v3659_v5 = vcombine.high %v8546_v33, %v10177_v41 }
 0x51d   : > { %v3660_v61 = vcombine.high %v3642_v23, %v10177_v41  ;;  %v3651_v31 = vrot.slane %v3643_v43, %v6660_v37 }
 0x51e   : > { %10261 = vst [vmem:[#allocation31_spill] sm:$0xff] %v8477_v32  ;;  %3668 = vrot.lane.b32.xlu0 %v3576_v30, %s6449_s15  ;;  %v3593_v20 = vcombine.high %v8477_v32, %v10177_v41  ;;  %v3585_v21 = vrot.slane %v3577_v17, %v6660_v37  ;;  %v3594_v22 = vcombine.high %v3576_v30, %v10177_v41 }
 0x51f   : > { %v3661_v12 = vcombine.high %v3651_v31, %v10177_v41 }
 0x520   : > { %3664 = vrot.lane.b32.xlu1 %v3593_v20, %s6451_s29  ;;  %v3595_v44 = vcombine.high %v3585_v21, %v10177_v41 }
 0x522   : > { %3676 = vrot.lane.b32.xlu0 %v3585_v21, %s6447_s24 }
 0x524   : > { %3672 = vrot.lane.b32.xlu1 %v3594_v22, %s6450_s27 }
 0x526   : > { %4189 = vrot.lane.b32.xlu0 %v6307_v39, %s6457_s4 }
 0x528   : > { %3680 = vrot.lane.b32.xlu1 %v3595_v44, %s6445_s17 }
 0x52a   : > { %4419 = vrot.lane.b32.xlu0 %v6307_v39, %s6458_s5 }
 0x52c   : > { %4193 = vrot.lane.b32.xlu1 %v6308_v3, %s6457_s4 }
 0x52e   : > { %4649 = vrot.lane.b32.xlu0 %v6307_v39, %s6459_s6 }
 0x530   : > { %4423 = vrot.lane.b32.xlu1 %v6308_v3, %s6458_s5 }
 0x532   : > { %5087 = vrot.lane.b32.xlu0 %v8497_v14, %s6456_s3 }
 0x534   : > { %4653 = vrot.lane.b32.xlu1 %v6308_v3, %s6459_s6 }
 0x536   : > { %5317 = vrot.lane.b32.xlu0 %v8497_v14, %s6457_s4 }
 0x538   : > { %5091 = vrot.lane.b32.xlu1 %v8504_v8, %s6456_s3 }
 0x53a   : > { %5547 = vrot.lane.b32.xlu0 %v8497_v14, %s6458_s5 }
 0x53c   : > { %5321 = vrot.lane.b32.xlu1 %v8504_v8, %s6457_s4 }
 0x53e   : > { %4187 = vrot.lane.b32.xlu0 %v6309_v27, %s6457_s4 }
 0x540   : > { %5551 = vrot.lane.b32.xlu1 %v8504_v8, %s6458_s5 }
 0x542   : > { %4417 = vrot.lane.b32.xlu0 %v6309_v27, %s6458_s5 }
 0x544   : > { %4191 = vrot.lane.b32.xlu1 %v6310_v49, %s6457_s4 }
 0x546   : > { %4647 = vrot.lane.b32.xlu0 %v6309_v27, %s6459_s6 }
 0x548   : > { %4421 = vrot.lane.b32.xlu1 %v6310_v49, %s6458_s5 }
 0x54a   : > { %5085 = vrot.lane.b32.xlu0 %v8519_v4, %s6456_s3 }
 0x54c   : > { %4651 = vrot.lane.b32.xlu1 %v6310_v49, %s6459_s6 }
 0x54e   : > { %5315 = vrot.lane.b32.xlu0 %v8519_v4, %s6457_s4 }
 0x550   : > { %5089 = vrot.lane.b32.xlu1 %v8526_v57, %s6456_s3 }
 0x552   : > { %5545 = vrot.lane.b32.xlu0 %v8519_v4, %s6458_s5 }
 0x554   : > { %5319 = vrot.lane.b32.xlu1 %v8526_v57, %s6457_s4 }
 0x556   : > { %3965 = vrot.lane.b32.xlu0 %v6307_v39, %s6456_s3 }
 0x558   : > { %5549 = vrot.lane.b32.xlu1 %v8526_v57, %s6458_s5 }
 0x55a   : > { %3963 = vrot.lane.b32.xlu0 %v6309_v27, %s6456_s3 }
 0x55c   : > { %3969 = vrot.lane.b32.xlu1 %v6308_v3, %s6456_s3 }
 0x55e   : > { %5777 = vrot.lane.b32.xlu0 %v8497_v14, %s6459_s6 }
 0x560   : > { %3967 = vrot.lane.b32.xlu1 %v6310_v49, %s6456_s3 }
 0x562   : > { %5775 = vrot.lane.b32.xlu0 %v8519_v4, %s6459_s6 }
 0x564   : > { %5781 = vrot.lane.b32.xlu1 %v8504_v8, %s6459_s6 }
 0x566   : > { %3692 = vrot.lane.b32.xlu0 %v3659_v5, %s6451_s29 }
 0x568   : > { %5779 = vrot.lane.b32.xlu1 %v8526_v57, %s6459_s6 }
 0x56a   : > { %3696 = vrot.lane.b32.xlu0 %v3642_v23, %s6449_s15 }
 0x56c   : > { %3906 = vrot.lane.b32.xlu1 %v3873_v48, %s6451_s29 }
 0x56e   : > { %3910 = vrot.lane.b32.xlu0 %v3856_v59, %s6449_s15 }
 0x570   : > { %3878 = vrot.lane.b32.xlu1 %v3807_v34, %s6451_s29 }
 0x572   : > { %3882 = vrot.lane.b32.xlu0 %v3790_v38, %s6449_s15 }
 0x574   : > { %3700 = vrot.lane.b32.xlu1 %v3660_v61, %s6450_s27 }
 0x576   : > { %3704 = vrot.lane.b32.xlu0 %v3651_v31, %s6447_s24 }
 0x578   : > { %3914 = vrot.lane.b32.xlu1 %v3874_v7, %s6450_s27 }
 0x57a   : > { %3918 = vrot.lane.b32.xlu0 %v3865_v58, %s6447_s24 }
 0x57c   : > { %3886 = vrot.lane.b32.xlu1 %v3808_v24, %s6450_s27 }
 0x57e   : > { %3890 = vrot.lane.b32.xlu0 %v8596_v52, %s6447_s24 }
 0x580   : > { %3708 = vrot.lane.b32.xlu1 %v3661_v12, %s6445_s17 }
 0x584   : > { %3922 = vrot.lane.b32.xlu1 %v3875_v2, %s6445_s17 }
 0x590   : > { %v8604_v11 = vpop.permute.xlu0 %3668 }
 0x591   : > { %10269 = vst [vmem:[#allocation49_spill] sm:$0xff] %v8604_v11 }
 0x592   : > { %v8606_v62 = vpop.permute.xlu1 %3664 }
 0x593   : > { %10270 = vst [vmem:[#allocation28_spill] sm:$0xff] %v8606_v62 }
 0x594   : > { %v8608_v42 = vpop.permute.xlu0 %3676 }
 0x595   : > { %10271 = vst [vmem:[#allocation27_spill] sm:$0xff] %v8608_v42 }
 0x596   : > { %v8610_v9 = vpop.permute.xlu1 %3672 }
 0x597   : > { %10272 = vst [vmem:[#allocation41_spill] sm:$0xff] %v8610_v9 }
 0x598   : > { %v4190_v17 = vpop.permute.xlu0 %4189 }
 0x599   : > { %v4265_v21 = vcombine.high %v4190_v17, %v10177_v41  ;;  %v8616_v39 = vrot.slane %v4190_v17, %v6650_v18 }
 0x59a   : > { %v8612_v30 = vpop.permute.xlu1 %3680 }
 0x59b   : > { %10273 = vst [vmem:[#allocation51_spill] sm:$0xff] %v8612_v30  ;;  %v8623_v49 = vrot.slane %v4265_v21, %v6650_v18 }
 0x59c   : > { %v4420_v20 = vpop.permute.xlu0 %4419 }
 0x59d   : > { %v4495_v10 = vcombine.high %v4420_v20, %v10177_v41  ;;  %v8637_v28 = vrot.slane %v4420_v20, %v6650_v18 }
 0x59e   : > { %v4194_v22 = vpop.permute.xlu1 %4193 }
 0x59f   : > { %v4280_v44 = vcombine.high %v4194_v22, %v10177_v41  ;;  %v8620_v3 = vrot.slane %v4194_v22, %v6650_v18  ;;  %v8647_v0 = vrot.slane %v4495_v10, %v6650_v18 }
 0x5a0   : > { %v4650_v27 = vpop.permute.xlu0 %4649 }
 0x5a1   : > { %v8626_v47 = vrot.slane %v4280_v44, %v6650_v18  ;;  %v4295_v19 = vcombine.low %v8616_v39, %v8620_v3  ;;  %v4725_v29 = vcombine.high %v4650_v27, %v10177_v41  ;;  %v8655_v34 = vrot.slane %v4650_v27, %v6650_v18 }
 0x5a2   : > { %v4424_v51 = vpop.permute.xlu1 %4423 }
 0x5a3   : > { %v8632_v1 = vrot.slane %v4295_v19, %v6660_v37  ;;  %v4510_v36 = vcombine.high %v4424_v51, %v10177_v41  ;;  %v8641_v5 = vrot.slane %v4424_v51, %v6650_v18  ;;  %v8668_v7 = vrot.slane %v4725_v29, %v6650_v18 }
 0x5a4   : > { %v5088_v55 = vpop.permute.xlu0 %5087 }
 0x5a5   : > { %10274 = vst [vmem:[#allocation34_spill] sm:$0xff] %v8632_v1  ;;  %v4327_v23 = vcombine.high %v8632_v1, %v10177_v41  ;;  %v8650_v48 = vrot.slane %v4510_v36, %v6650_v18  ;;  %v4525_v59 = vcombine.low %v8637_v28, %v8641_v5  ;;  %v5163_v24 = vcombine.high %v5088_v55, %v10177_v41 }
 0x5a6   : > { %v4654_v46 = vpop.permute.xlu1 %4653  ;;  %v8684_v21 = vrot.slane %v5088_v55, %v6650_v18 }
 0x5a7   : > { %v4740_v43 = vcombine.high %v4654_v46, %v10177_v41  ;;  %v8659_v38 = vrot.slane %v4654_v46, %v6650_v18  ;;  %4360 = vrot.lane.b32.xlu0 %v4327_v23, %s6451_s29  ;;  %v8663_v61 = vrot.slane %v4525_v59, %v6660_v37  ;;  %v8695_v51 = vrot.slane %v5163_v24, %v6650_v18 }
 0x5a8   : > { %v5318_v56 = vpop.permute.xlu0 %5317 }
 0x5a9   : > { %10275 = vst [vmem:[#allocation33_spill] sm:$0xff] %v8663_v61  ;;  %v8671_v58 = vrot.slane %v4740_v43, %v6650_v18  ;;  %v4755_v63 = vcombine.low %v8655_v34, %v8659_v38  ;;  %v4557_v2 = vcombine.high %v8663_v61, %v10177_v41  ;;  %v5393_v19 = vcombine.high %v5318_v56, %v10177_v41 }
 0x5aa   : > { %v5092_v12 = vpop.permute.xlu1 %5091  ;;  %v8703_v23 = vrot.slane %v5318_v56, %v6650_v18 }
 0x5ab   : > { %v8679_v17 = vrot.slane %v4755_v63, %v6660_v37  ;;  %v5178_v22 = vcombine.high %v5092_v12, %v10177_v41  ;;  %v8688_v44 = vrot.slane %v5092_v12, %v6650_v18  ;;  %4590 = vrot.lane.b32.xlu1 %v4557_v2, %s6451_s29  ;;  %v8716_v12 = vrot.slane %v5393_v19, %v6650_v18 }
 0x5ac   : > { %v5548_v27 = vpop.permute.xlu0 %5547 }
 0x5ad   : > { %10276 = vst [vmem:[#allocation40_spill] sm:$0xff] %v8679_v17  ;;  %v4787_v10 = vcombine.high %v8679_v17, %v10177_v41  ;;  %v8698_v36 = vrot.slane %v5178_v22, %v6650_v18  ;;  %v5193_v55 = vcombine.low %v8684_v21, %v8688_v44  ;;  %v5623_v22 = vcombine.high %v5548_v27, %v10177_v41 }
 0x5ae   : > { %v5322_v29 = vpop.permute.xlu1 %5321  ;;  %v8732_v19 = vrot.slane %v5548_v27, %v6650_v18 }
 0x5af   : > { %v5408_v59 = vcombine.high %v5322_v29, %v10177_v41  ;;  %v8707_v46 = vrot.slane %v5322_v29, %v6650_v18  ;;  %4820 = vrot.lane.b32.xlu0 %v4787_v10, %s6451_s29  ;;  %v8711_v43 = vrot.slane %v5193_v55, %v6660_v37  ;;  %v8743_v16 = vrot.slane %v5623_v22, %v6650_v18 }
 0x5b0   : > { %v4188_v24 = vpop.permute.xlu0 %4187 }
 0x5b1   : > { %10277 = vst [vmem:[#allocation37_spill] sm:$0xff] %v8711_v43  ;;  %v8719_v56 = vrot.slane %v5408_v59, %v6650_v18  ;;  %v5423_v2 = vcombine.low %v8703_v23, %v8707_v46  ;;  %v5225_v10 = vcombine.high %v8711_v43, %v10177_v41  ;;  %v4199_v45 = vcombine.high %v4188_v24, %v10177_v41 }
 0x5b2   : > { %v5552_v29 = vpop.permute.xlu1 %5551  ;;  %v8756_v43 = vrot.slane %v4188_v24, %v6650_v18 }
 0x5b3   : > { %v8727_v55 = vrot.slane %v5423_v2, %v6660_v37  ;;  %v5638_v59 = vcombine.high %v5552_v29, %v10177_v41  ;;  %v8736_v20 = vrot.slane %v5552_v29, %v6650_v18  ;;  %5258 = vrot.lane.b32.xlu1 %v5225_v10, %s6451_s29  ;;  %v8764_v17 = vrot.slane %v4199_v45, %v6650_v18 }
 0x5b4   : > { %v4418_v31 = vpop.permute.xlu0 %4417  ;;  %v10281_v45 = vcombine.high %v10266_v60, %v10265_v53 }
 0x5b5   : > { %10278 = vst [vmem:[#allocation43_spill] sm:$0xff] %v8727_v55  ;;  %v5455_v2 = vcombine.high %v8727_v55, %v10177_v41  ;;  %v8746_v63 = vrot.slane %v5638_v59, %v6650_v18  ;;  %v5653_v27 = vcombine.low %v8732_v19, %v8736_v20  ;;  %v4429_v24 = vcombine.high %v4418_v31, %v10177_v41 }
 0x5b6   : > { %v4192_v50 = vpop.permute.xlu1 %4191  ;;  %v8799_v42 = vrot.slane %v10281_v45, %v6660_v37 }
 0x5b7   : > { %v4214_v29 = vcombine.high %v4192_v50, %v10177_v41  ;;  %v8752_v10 = vrot.slane %v4192_v50, %v6650_v18  ;;  %5488 = vrot.lane.b32.xlu0 %v5455_v2, %s6451_s29  ;;  %v8759_v22 = vrot.slane %v5653_v27, %v6660_v37  ;;  %v10280_v50 = vcombine.high %v8458_v15, %v8461_v35 }
 0x5b8   : > { %v4648_v55 = vpop.permute.xlu0 %4647  ;;  %v4296_v15 = vcombine.high %v8616_v39, %v8620_v3  ;;  %v8787_v35 = vrot.slane %v4418_v31, %v6650_v18  ;;  %v3809_v39 = vcombine.high %v8596_v52, %v10177_v41  ;;  %v8804_v3 = vrot.slane %v4429_v24, %v6650_v18 }
 0x5b9   : > { %10279 = vst [vmem:[#allocation42_spill] sm:$0xff] %v8759_v22  ;;  %v8767_v61 = vrot.slane %v4214_v29, %v6650_v18  ;;  %v8773_v2 = vrot.slane %v10280_v50, %v6660_v37  ;;  %v4229_v27 = vcombine.low %v8756_v43, %v8752_v10  ;;  %v5685_v59 = vcombine.high %v8759_v22, %v10177_v41 }
 0x5ba   : > { %v4422_v1 = vpop.permute.xlu1 %4421  ;;  %v4659_v30 = vcombine.high %v4648_v55, %v10177_v41  ;;  %v8821_v52 = vrot.slane %v4648_v55, %v6650_v18  ;;  %v8827_v45 = vrot.slane %v4296_v15, %v6660_v37 }
 0x5bb   : > { %3712 = vrot.lane.b32.xlu0 %v8773_v2, %s6448_s26  ;;  %v4444_v29 = vcombine.high %v4422_v1, %v10177_v41  ;;  %v8791_v50 = vrot.slane %v4422_v1, %v6650_v18  ;;  %5718 = vrot.lane.b32.xlu1 %v5685_v59, %s6451_s29  ;;  %v8807_v1 = vrot.slane %v4229_v27, %v6660_v37 }
 0x5bc   : > { %v5086_v22 = vpop.permute.xlu0 %5085 }
 0x5bd   : > { %10282 = vst [vmem:[#allocation47_spill] sm:$0xff] %v8807_v1  ;;  %v8810_v31 = vrot.slane %v4444_v29, %v6650_v18  ;;  %v4459_v59 = vcombine.low %v8787_v35, %v8791_v50  ;;  %v4526_v29 = vcombine.high %v8637_v28, %v8641_v5  ;;  %v5097_v11 = vcombine.high %v5086_v22, %v10177_v41 }
 0x5be   : > { %v4652_v9 = vpop.permute.xlu1 %4651  ;;  %v4261_v15 = vcombine.high %v8807_v1, %v10177_v41  ;;  %v8852_v5 = vrot.slane %v5086_v22, %v6650_v18 }
 0x5bf   : > { %v4674_v53 = vcombine.high %v4652_v9, %v10177_v41  ;;  %v8816_v60 = vrot.slane %v4652_v9, %v6650_v18  ;;  %3926 = vrot.lane.b32.xlu0 %v8799_v42, %s6448_s26  ;;  %3894 = vrot.lane.b32.xlu1 %v3809_v39, %s6445_s17  ;;  %v8832_v9 = vrot.slane %v4659_v30, %v6650_v18 }
 0x5c0   : > { %v5316_v27 = vpop.permute.xlu0 %5315  ;;  %v8839_v32 = vrot.slane %v4459_v59, %v6660_v37  ;;  %v4756_v30 = vcombine.high %v8655_v34, %v8659_v38  ;;  %v8860_v62 = vrot.slane %v5097_v11, %v6650_v18  ;;  %v8864_v25 = vrot.slane %v4526_v29, %v6660_v37 }
 0x5c1   : > { %10283 = vst [vmem:[#allocation46_spill] sm:$0xff] %v8832_v9  ;;  %v8836_v55 = vrot.slane %v4674_v53, %v6650_v18  ;;  %v4689_v39 = vcombine.low %v8821_v52, %v8816_v60  ;;  %v5327_v28 = vcombine.high %v5316_v27, %v10177_v41  ;;  %v8883_v29 = vrot.slane %v5316_v27, %v6650_v18 }
 0x5c2   : > { %10285 = vst [vmem:[#allocation32_spill] sm:$0xff] %v8839_v32  ;;  %v5090_v24 = vpop.permute.xlu1 %5089  ;;  %10286 = vst [vmem:[#allocation13_spill] sm:$0xff] %v8860_v62 }
 0x5c3   : > { %10284 = vst [vmem:[#allocation23_spill] sm:$0xff] %v8836_v55  ;;  %4364 = vrot.lane.b32.xlu0 %v8827_v45, %s6449_s15  ;;  %v5112_v59 = vcombine.high %v5090_v24, %v10177_v41  ;;  %v8856_v53 = vrot.slane %v5090_v24, %v6650_v18  ;;  %4332 = vrot.lane.b32.xlu1 %v4261_v15, %s6451_s29 }
 0x5c4   : > { %v5546_v1 = vpop.permute.xlu0 %5545  ;;  %v8867_v34 = vrot.slane %v4689_v39, %v6660_v37  ;;  %v4491_v15 = vcombine.high %v8839_v32, %v10177_v41  ;;  %v5194_v32 = vcombine.high %v8684_v21, %v8688_v44 }
 0x5c5   : > { %v8870_v38 = vrot.slane %v5112_v59, %v6650_v18  ;;  %v5127_v22 = vcombine.low %v8852_v5, %v8856_v53  ;;  %v8889_v59 = vrot.slane %v4756_v30, %v6660_v37  ;;  %v5557_v33 = vcombine.high %v5546_v1, %v10177_v41 }
 0x5c6   : > { %10287 = vst [vmem:[#allocation14_spill] sm:$0xff] %v8867_v34  ;;  %v5320_v24 = vpop.permute.xlu1 %5319  ;;  %v4721_v62 = vcombine.high %v8867_v34, %v10177_v41  ;;  %v8912_v44 = vrot.slane %v5546_v1, %v6650_v18 }
 0x5c7   : > { %10288 = vst [vmem:[#allocation19_spill] sm:$0xff] %v8870_v38  ;;  %v5342_v11 = vcombine.high %v5320_v24, %v10177_v41  ;;  %v8878_v54 = vrot.slane %v5320_v24, %v6650_v18  ;;  %4594 = vrot.lane.b32.xlu0 %v8864_v25, %s6449_s15  ;;  %4562 = vrot.lane.b32.xlu1 %v4491_v15, %s6451_s29 }
 0x5c8   : > { %v8894_v24 = vrot.slane %v5327_v28, %v6650_v18  ;;  %v8901_v27 = vrot.slane %v5127_v22, %v6660_v37  ;;  %v3966_v39 = vpop.permute.xlu0 %3965  ;;  %v8922_v34 = vrot.slane %v5557_v33, %v6650_v18 }
 0x5c9   : > { %v8898_v9 = vrot.slane %v5342_v11, %v6650_v18  ;;  %v5357_v15 = vcombine.low %v8883_v29, %v8878_v54  ;;  %v5424_v11 = vcombine.high %v8703_v23, %v8707_v46  ;;  %v4041_v21 = vcombine.high %v3966_v39, %v10177_v41 }
 0x5ca   : > { %10289 = vst [vmem:[#allocation39_spill] sm:$0xff] %v8894_v24  ;;  %10291 = vst [vmem:[#allocation48_spill] sm:$0xff] %v8901_v27  ;;  %v5550_v30 = vpop.permute.xlu1 %5549  ;;  %v5208_v24 = vrot.slane %v5194_v32, %v6660_v37  ;;  %v5159_v23 = vcombine.high %v8901_v27, %v10177_v41  ;;  %v5654_v46 = vcombine.high %v8732_v19, %v8736_v20 }
 0x5cb   : > { %10290 = vst [vmem:[#allocation45_spill] sm:$0xff] %v8898_v9  ;;  %4824 = vrot.lane.b32.xlu0 %v8889_v59, %s6449_s15  ;;  %v5572_v28 = vcombine.high %v5550_v30, %v10177_v41  ;;  %v8916_v22 = vrot.slane %v5550_v30, %v6650_v18  ;;  %4792 = vrot.lane.b32.xlu1 %v4721_v62, %s6451_s29 }
 0x5cc   : > { %v8927_v1 = vrot.slane %v5357_v15, %v6660_v37  ;;  %v8944_v15 = vrot.slane %v4041_v21, %v6650_v18  ;;  %v5438_v27 = vrot.slane %v5424_v11, %v6660_v37  ;;  %v5668_v20 = vrot.slane %v5654_v46, %v6660_v37 }
 0x5cd   : > { %v8930_v9 = vrot.slane %v5572_v28, %v6650_v18  ;;  %v5587_v30 = vcombine.low %v8912_v44, %v8916_v22  ;;  %v8967_v11 = vrot.slane %v3966_v39, %v6650_v18  ;;  %v4230_v39 = vcombine.high %v8756_v43, %v8752_v10 }
 0x5ce   : > { %10292 = vst [vmem:[#allocation50_spill] sm:$0xff] %v8927_v1  ;;  %v3970_v62 = vpop.permute.xlu1 %3969  ;;  %v5389_v55 = vcombine.high %v8927_v1, %v10177_v41  ;;  %v3876_v46 = vcombine.high %v8799_v42, %v10177_v41  ;;  %v9000_v42 = vrot.slane %v8504_v8, %v6650_v18 }
 0x5cf   : > { %v4056_v33 = vcombine.high %v3970_v62, %v10177_v41  ;;  %5262 = vrot.lane.b32.xlu0 %v5208_v24, %s6449_s15  ;;  %5230 = vrot.lane.b32.xlu1 %v5159_v23, %s6451_s29  ;;  %v8951_v38 = vrot.slane %v5587_v30, %v6660_v37  ;;  %v8961_v19 = vrot.slane %v3970_v62, %v6650_v18 }
 0x5d0   : > { %v3662_v30 = vcombine.high %v8773_v2, %v10177_v41  ;;  %v10294_v62 = vcombine.high %v8467_v6, %v8472_v40  ;;  %v4460_v6 = vcombine.high %v8787_v35, %v8791_v50  ;;  %v8996_v40 = vrot.slane %v4230_v39, %v6660_v37 }
 0x5d1   : > { %v8947_v28 = vrot.slane %v4056_v33, %v6650_v18  ;;  %10293 = vst [vmem:[#allocation53_spill] sm:$0xff] %v8951_v38  ;;  %v5619_v21 = vcombine.high %v8951_v38, %v10177_v41  ;;  %v4328_v50 = vcombine.high %v8827_v45, %v10177_v41  ;;  %v10314_v38 = vld [vmem:[#allocation13_spill] sm:$0xff] }
 0x5d2   : > { %v3592_v33 = vrot.slane %v10294_v62, %v6660_v37  ;;  %v9014_v10 = vrot.slane %v4460_v6, %v6660_v37  ;;  %v9035_v45 = vpop.permute.xlu1 %3967  ;;  %v5358_v6 = vcombine.high %v8883_v29, %v8878_v54 }
 0x5d3   : > { %5492 = vrot.lane.b32.xlu0 %v5438_v27, %s6449_s15  ;;  %5460 = vrot.lane.b32.xlu1 %v5389_v55, %s6451_s29  ;;  %v4071_v55 = vcombine.low %v8967_v11, %v8961_v19  ;;  %v9066_v54 = vrot.slane %v9035_v45, %v6650_v18 }
 0x5d4   : > { %v9069_v29 = vrot.slane %v5358_v6, %v6660_v37  ;;  %v4311_v6 = vcombine.low %v8623_v49, %v8626_v47 }
 0x5d5   : > { %v8985_v2 = vrot.slane %v4071_v55, %v6660_v37 }
 0x5d7   : > { %5722 = vrot.lane.b32.xlu0 %v5668_v20, %s6449_s15  ;;  %5690 = vrot.lane.b32.xlu1 %v5619_v21, %s6451_s29  ;;  %10295 = vst [vmem:[#allocation22_spill] sm:$0xff] %v8985_v2  ;;  %v10296_v21 = vcombine.high %v10268_v26, %v10267_v13  ;;  %v4103_v43 = vcombine.high %v8985_v2, %v10177_v41  ;;  %v10310_v2 = vld [vmem:[#allocation46_spill] sm:$0xff] }
 0x5d8   : > { %v9008_v13 = vrot.slane %v8497_v14, %v6650_v18  ;;  %v4690_v26 = vcombine.high %v8821_v52, %v8816_v60  ;;  %v4558_v52 = vcombine.high %v8864_v25, %v10177_v41  ;;  %v5226_v25 = vcombine.high %v5208_v24, %v10177_v41 }
 0x5d9   : > { %v3806_v23 = vrot.slane %v10296_v21, %v6660_v37  ;;  %v4788_v21 = vcombine.high %v8889_v59, %v10177_v41 }
 0x5da   : > { %v4969_v35 = vcombine.low %v9008_v13, %v9000_v42  ;;  %v9026_v55 = vrot.slane %v4690_v26, %v6660_v37 }
 0x5db   : > { %3716 = vrot.lane.b32.xlu0 %v3662_v30, %s6446_s19  ;;  %3684 = vrot.lane.b32.xlu1 %v3592_v33, %s6448_s26  ;;  %v9020_v30 = vpop.permute.xlu0 %3963 }
 0x5dc   : > { %v9029_v60 = vrot.slane %v4969_v35, %v6660_v37  ;;  %v9074_v59 = vrot.slane %v9020_v30, %v6650_v18 }
 0x5de   : > { %10297 = vst [vmem:[#allocation55_spill] sm:$0xff] %v9029_v60  ;;  %v5001_v39 = vcombine.high %v9029_v60, %v10177_v41 }
 0x5df   : > { %3930 = vrot.lane.b32.xlu0 %v3876_v46, %s6446_s19  ;;  %3898 = vrot.lane.b32.xlu1 %v3806_v23, %s6448_s26  ;;  %v9038_v62 = vpop.permute.xlu0 %5777  ;;  %v5128_v46 = vcombine.high %v8852_v5, %v8856_v53  ;;  %v5456_v5 = vcombine.high %v5438_v27, %v10177_v41  ;;  %v5588_v53 = vcombine.high %v8912_v44, %v8916_v22 }
 0x5e0   : > { %10298 = vst [vmem:[#allocation26_spill] sm:$0xff] %v9038_v62  ;;  %v5686_v44 = vcombine.high %v5668_v20, %v10177_v41  ;;  %v4005_v22 = vcombine.low %v9074_v59, %v9066_v54  ;;  %v3596_v20 = vcombine.high %v3592_v33, %v10177_v41  ;;  %v4541_v33 = vcombine.low %v8647_v0, %v8650_v48 }
 0x5e1   : > { %v9054_v26 = vrot.slane %v5128_v46, %v6660_v37 }
 0x5e2   : > { %v9092_v46 = vrot.slane %v4005_v22, %v6660_v37  ;;  %v9119_v22 = vrot.slane %v8526_v57, %v6650_v18 }
 0x5e3   : > { %4336 = vrot.lane.b32.xlu0 %v8996_v40, %s6449_s15  ;;  %4136 = vrot.lane.b32.xlu1 %v4103_v43, %s6451_s29  ;;  %v9051_v43 = vpop.permute.xlu1 %5781  ;;  %v9056_v35 = vpop.permute.xlu0 %5775 }
 0x5e4   : > { %10299 = vst [vmem:[#allocation52_spill] sm:$0xff] %v9051_v43  ;;  %10300 = vst [vmem:[#allocation30_spill] sm:$0xff] %v9056_v35 }
 0x5e5   : > { %10302 = vst [vmem:[#allocation38_spill] sm:$0xff] %v9092_v46 }
 0x5e7   : > { %4566 = vrot.lane.b32.xlu0 %v9014_v10, %s6449_s15  ;;  %4368 = vrot.lane.b32.xlu1 %v4328_v50, %s6450_s27  ;;  %v9076_v24 = vpop.permute.xlu1 %5779  ;;  %v9080_v27 = vpop.permute.xlu0 %3692  ;;  %v5602_v50 = vrot.slane %v5588_v53, %v6660_v37  ;;  %v4319_v53 = vrot.slane %v4311_v6, %v6660_v37 }
 0x5e8   : > { %10301 = vst [vmem:[#allocation21_spill] sm:$0xff] %v9076_v24 }
 0x5eb   : > { %4796 = vrot.lane.b32.xlu0 %v9026_v55, %s6449_s15  ;;  %4598 = vrot.lane.b32.xlu1 %v4558_v52, %s6450_s27  ;;  %v4072_v52 = vcombine.high %v8967_v11, %v8961_v19 }
 0x5ed   : > { %v4086_v19 = vrot.slane %v4072_v52, %v6660_v37  ;;  %v9125_v52 = vrot.slane %v8519_v4, %v6650_v18 }
 0x5ef   : > { %5034 = vrot.lane.b32.xlu0 %v5001_v39, %s6451_s29  ;;  %4828 = vrot.lane.b32.xlu1 %v4788_v21, %s6450_s27  ;;  %v3810_v39 = vcombine.high %v3806_v23, %v10177_v41  ;;  %v9094_v21 = vpop.permute.xlu1 %3906  ;;  %v4037_v23 = vcombine.high %v9092_v46, %v10177_v41  ;;  %v4903_v57 = vcombine.low %v9125_v52, %v9119_v22 }
 0x5f0   : > { %v5620_v46 = vcombine.high %v5602_v50, %v10177_v41 }
 0x5f1   : > { %v9146_v32 = vrot.slane %v4903_v57, %v6660_v37 }
 0x5f3   : > { %5266 = vrot.lane.b32.xlu0 %v5226_v25, %s6450_s27  ;;  %5234 = vrot.lane.b32.xlu1 %v9054_v26, %s6449_s15  ;;  %v9097_v25 = vpop.permute.xlu0 %3696  ;;  %v9107_v11 = vpop.permute.xlu1 %3878  ;;  %10303 = vst [vmem:[#allocation29_spill] sm:$0xff] %v9146_v32 }
 0x5f7   : > { %5496 = vrot.lane.b32.xlu0 %v5456_v5, %s6450_s27  ;;  %5464 = vrot.lane.b32.xlu1 %v9069_v29, %s6449_s15  ;;  %v9112_v5 = vpop.permute.xlu0 %3910  ;;  %v9130_v6 = vpop.permute.xlu1 %3700 }
 0x5fb   : > { %5726 = vrot.lane.b32.xlu0 %v5686_v44, %s6450_s27  ;;  %5694 = vrot.lane.b32.xlu1 %v5602_v50, %s6449_s15  ;;  %v4262_v44 = vcombine.high %v8996_v40, %v10177_v41  ;;  %v4492_v40 = vcombine.high %v9014_v10, %v10177_v41  ;;  %v9149_v10 = vpop.permute.xlu1 %3914  ;;  %v4475_v50 = vcombine.low %v8804_v3, %v8810_v31 }
 0x5ff   : > { %3902 = vrot.lane.b32.xlu0 %v3810_v39, %s6446_s19  ;;  %3688 = vrot.lane.b32.xlu1 %v3596_v20, %s6446_s19  ;;  %v4771_v39 = vcombine.low %v8668_v7, %v8671_v58  ;;  %v4549_v20 = vrot.slane %v4541_v33, %v6660_v37  ;;  %v4722_v33 = vcombine.high %v9026_v55, %v10177_v41  ;;  %v9164_v57 = vpop.permute.xlu1 %3886 }
 0x601   : > { %v4779_v4 = vrot.slane %v4771_v39, %v6660_v37 }
 0x603   : > { %4140 = vrot.lane.b32.xlu0 %v4086_v19, %s6449_s15  ;;  %4108 = vrot.lane.b32.xlu1 %v4037_v23, %s6451_s29  ;;  %v9136_v23 = vpop.permute.xlu0 %3882 }
 0x607   : > { %4372 = vrot.lane.b32.xlu0 %v4319_v53, %s6447_s24  ;;  %4340 = vrot.lane.b32.xlu1 %v4262_v44, %s6450_s27  ;;  %v4970_v44 = vcombine.high %v9008_v13, %v9000_v42  ;;  %v9154_v1 = vpop.permute.xlu0 %3704  ;;  %v4935_v42 = vcombine.high %v9146_v32, %v10177_v41  ;;  %v5439_v13 = vcombine.low %v8716_v12, %v8719_v56 }
 0x608   : > { %v5390_v32 = vcombine.high %v9069_v29, %v10177_v41 }
 0x609   : > { %v4984_v39 = vrot.slane %v4970_v44, %v6660_v37  ;;  %v5669_v44 = vcombine.low %v8743_v16, %v8746_v63 }
 0x60b   : > { %4602 = vrot.lane.b32.xlu0 %v4549_v20, %s6447_s24  ;;  %4570 = vrot.lane.b32.xlu1 %v4492_v40, %s6450_s27  ;;  %v5209_v40 = vcombine.low %v8695_v51, %v8698_v36  ;;  %v9168_v60 = vpop.permute.xlu0 %3918  ;;  %v5677_v35 = vrot.slane %v5669_v44, %v6660_v37 }
 0x60d   : > { %v5217_v55 = vrot.slane %v5209_v40, %v6660_v37  ;;  %v9178_v40 = vpop.permute.xlu1 %3708 }
 0x60f   : > { %4832 = vrot.lane.b32.xlu0 %v4779_v4, %s6447_s24  ;;  %4800 = vrot.lane.b32.xlu1 %v4722_v33, %s6450_s27  ;;  %v5160_v33 = vcombine.high %v9054_v26, %v10177_v41  ;;  %v9181_v26 = vpop.permute.xlu0 %3890 }
 0x610   : > { %10304 = vst [vmem:[#allocation24_spill] sm:$0xff] %v9181_v26 }
 0x611   : > { %v9194_v24 = vpop.permute.xlu1 %3922 }
 0x613   : > { %5038 = vrot.lane.b32.xlu0 %v4984_v39, %s6449_s15  ;;  %5006 = vrot.lane.b32.xlu1 %v4935_v42, %s6451_s29  ;;  %v5447_v42 = vrot.slane %v5439_v13, %v6660_v37  ;;  %v4104_v13 = vcombine.high %v4086_v19, %v10177_v41 }
 0x617   : > { %5270 = vrot.lane.b32.xlu0 %v5217_v55, %s6447_s24  ;;  %5238 = vrot.lane.b32.xlu1 %v5160_v33, %s6450_s27  ;;  %v4006_v33 = vcombine.high %v9074_v59, %v9066_v54  ;;  %v4329_v59 = vcombine.high %v4319_v53, %v10177_v41  ;;  %v4483_v53 = vrot.slane %v4475_v50, %v6660_v37 }
 0x619   : > { %v9189_v29 = vpop.permute.xlu0 %4360  ;;  %v4020_v44 = vrot.slane %v4006_v33, %v6660_v37 }
 0x61a   : > { %10305 = vst [vmem:[#allocation25_spill] sm:$0xff] %v9189_v29  ;;  %v10309_v29 = vld [vmem:[#allocation23_spill] sm:$0xff] }
 0x61b   : > { %5500 = vrot.lane.b32.xlu0 %v5447_v42, %s6447_s24  ;;  %5468 = vrot.lane.b32.xlu1 %v5390_v32, %s6450_s27  ;;  %v4245_v32 = vcombine.low %v8764_v17, %v8767_v61 }
 0x61d   : > { %v4253_v19 = vrot.slane %v4245_v32, %v6660_v37 }
 0x61f   : > { %5730 = vrot.lane.b32.xlu0 %v5677_v35, %s6447_s24  ;;  %5698 = vrot.lane.b32.xlu1 %v5620_v46, %s6450_s27  ;;  %v9204_v46 = vpop.permute.xlu1 %4590 }
 0x620   : > { %10307 = vst [vmem:[#allocation20_spill] sm:$0xff] %v9204_v46 }
 0x621   : > { %v9199_v54 = vpop.permute.xlu0 %4820 }
 0x622   : > { %10306 = vst [vmem:[#allocation56_spill] sm:$0xff] %v9199_v54  ;;  %v4705_v54 = vcombine.low %v10310_v2, %v10309_v29 }
 0x623   : > { %4144 = vrot.lane.b32.xlu0 %v4104_v13, %s6450_s27  ;;  %4112 = vrot.lane.b32.xlu1 %v4020_v44, %s6449_s15  ;;  %v4559_v13 = vcombine.high %v4549_v20, %v10177_v41  ;;  %v4904_v20 = vcombine.high %v9125_v52, %v9119_v22  ;;  %v5227_v52 = vcombine.high %v5217_v55, %v10177_v41 }
 0x624   : > { %v5603_v55 = vcombine.low %v8922_v34, %v8930_v9 }
 0x625   : > { %v9214_v62 = vpop.permute.xlu1 %5258 }
 0x626   : > { %10311 = vst [vmem:[#allocation16_spill] sm:$0xff] %v9214_v62  ;;  %v10313_v62 = vld [vmem:[#allocation19_spill] sm:$0xff] }
 0x627   : > { %4376 = vrot.lane.b32.xlu0 %v4329_v59, %s6445_s17  ;;  %4344 = vrot.lane.b32.xlu1 %v4253_v19, %s6447_s24  ;;  %v4789_v59 = vcombine.high %v4779_v4, %v10177_v41  ;;  %v5143_v4 = vcombine.low %v10314_v38, %v10313_v62 }
 0x629   : > { %v9209_v33 = vpop.permute.xlu0 %5488  ;;  %v9253_v62 = vrot.slane %v5143_v4, %v6660_v37  ;;  %v4087_v4 = vcombine.low %v8944_v15, %v8947_v28 }
 0x62a   : > { %10308 = vst [vmem:[#allocation54_spill] sm:$0xff] %v9209_v33  ;;  %v9225_v33 = vrot.slane %v4705_v54, %v6660_v37  ;;  %v9240_v54 = vrot.slane %v4904_v20, %v6660_v37 }
 0x62b   : > { %4606 = vrot.lane.b32.xlu0 %v4559_v13, %s6445_s17  ;;  %4574 = vrot.lane.b32.xlu1 %v4483_v53, %s6447_s24  ;;  %v5002_v13 = vcombine.high %v4984_v39, %v10177_v41 }
 0x62d   : > { %v9219_v32 = vpop.permute.xlu0 %3712  ;;  %v9222_v46 = vpop.permute.xlu1 %5718 }
 0x62e   : > { %10312 = vst [vmem:[#allocation15_spill] sm:$0xff] %v9222_v46  ;;  %v10317_v46 = vld [vmem:[#allocation39_spill] sm:$0xff] }
 0x62f   : > { %4836 = vrot.lane.b32.xlu0 %v4789_v59, %s6445_s17  ;;  %4804 = vrot.lane.b32.xlu1 %v9225_v33, %s6447_s24  ;;  %v10316_v59 = vld [vmem:[#allocation45_spill] sm:$0xff] }
 0x630   : > { %v5373_v39 = vcombine.low %v10317_v46, %v10316_v59 }
 0x631   : > { %v9232_v50 = vpop.permute.xlu0 %3926  ;;  %v9237_v43 = vpop.permute.xlu1 %3894 }
 0x632   : > { %v9266_v59 = vrot.slane %v5373_v39, %v6660_v37 }
 0x633   : > { %5042 = vrot.lane.b32.xlu0 %v5002_v13, %s6450_s27  ;;  %5010 = vrot.lane.b32.xlu1 %v9240_v54, %s6449_s15  ;;  %v5457_v13 = vcombine.high %v5447_v42, %v10177_v41  ;;  %v5687_v42 = vcombine.high %v5677_v35, %v10177_v41 }
 0x635   : > { %v9245_v22 = vpop.permute.xlu0 %4364  ;;  %v9250_v26 = vpop.permute.xlu1 %4332 }
 0x636   : > { %10315 = vst [vmem:[#allocation18_spill] sm:$0xff] %v9245_v22  ;;  %10318 = vst [vmem:[#allocation17_spill] sm:$0xff] %v9250_v26  ;;  %v9279_v26 = vrot.slane %v5603_v55, %v6660_v37  ;;  %v10325_v55 = vcombine.high %v8623_v49, %v8626_v47  ;;  %v4939_v49 = vcombine.high %v8497_v14, %v10177_v41  ;;  %v10327_v47 = vld [vmem:[#allocation35_spill] sm:$0xff] }
 0x637   : > { %5274 = vrot.lane.b32.xlu0 %v5227_v52, %s6445_s17  ;;  %5242 = vrot.lane.b32.xlu1 %v9253_v62, %s6447_s24 }
 0x639   : > { %v9258_v20 = vpop.permute.xlu0 %4594  ;;  %v9263_v22 = vpop.permute.xlu1 %4562 }
 0x63a   : > { %10319 = vst [vmem:[#allocation23_spill] sm:$0xff] %v9258_v20  ;;  %10320 = vst [vmem:[#allocation46_spill] sm:$0xff] %v9263_v22 }
 0x63b   : > { %5504 = vrot.lane.b32.xlu0 %v5457_v13, %s6445_s17  ;;  %5472 = vrot.lane.b32.xlu1 %v9266_v59, %s6447_s24  ;;  %v9287_v13 = vrot.slane %v4087_v4, %v6660_v37  ;;  %v4954_v4 = vcombine.high %v8504_v8, %v10177_v41  ;;  %v3940_v8 = vsel %vm548_vm4, %v10327_v47, %v9094_v21 }
 0x63c   : > { %v4493_v21 = vcombine.high %v4483_v53, %v10177_v41 }
 0x63d   : > { %v9273_v52 = vpop.permute.xlu0 %4824  ;;  %v9276_v20 = vpop.permute.xlu1 %4792 }
 0x63e   : > { %10321 = vst [vmem:[#allocation13_spill] sm:$0xff] %v9273_v52  ;;  %10322 = vst [vmem:[#allocation39_spill] sm:$0xff] %v9276_v20  ;;  %v4038_v52 = vcombine.high %v4020_v44, %v10177_v41  ;;  %v4263_v20 = vcombine.high %v4253_v19, %v10177_v41 }
 0x63f   : > { %5734 = vrot.lane.b32.xlu0 %v5687_v42, %s6445_s17  ;;  %5702 = vrot.lane.b32.xlu1 %v9279_v26, %s6447_s24  ;;  %v9301_v42 = vrot.slane %v10325_v55, %v6660_v37  ;;  %v9332_v55 = vrot.slane %v4954_v4, %v6650_v18 }
 0x641   : > { %v9284_v39 = vpop.permute.xlu0 %5262  ;;  %v9289_v22 = vpop.permute.xlu1 %5230 }
 0x642   : > { %10323 = vst [vmem:[#allocation57_spill] sm:$0xff] %v9284_v39  ;;  %10324 = vst [vmem:[#allocation58_spill] sm:$0xff] %v9289_v22  ;;  %v10326_v39 = vld [vmem:[#allocation44_spill] sm:$0xff] }
 0x643   : > { %4148 = vrot.lane.b32.xlu0 %v9287_v13, %s6447_s24  ;;  %4116 = vrot.lane.b32.xlu1 %v4038_v52, %s6450_s27  ;;  %v3726_v44 = vsel %vm548_vm4, %v10326_v39, %v9080_v27 }
 0x644   : > { %v3727_v52 = vsel %vm550_vm5, %v3726_v44, %v9097_v25  ;;  %v10328_v25 = vcombine.high %v8647_v0, %v8650_v48  ;;  %v9344_v0 = vrot.slane %v4939_v49, %v6650_v18 }
 0x645   : > { %v9295_v35 = vpop.permute.xlu0 %5492  ;;  %v9308_v22 = vpop.permute.xlu1 %5460  ;;  %v3728_v27 = vsel %vm552_vm6, %v3727_v52, %v9130_v6  ;;  %v3941_v6 = vsel %vm550_vm5, %v3940_v8, %v9112_v5 }
 0x646   : > { %v9329_v19 = vrot.slane %v10328_v25, %v6660_v37  ;;  %v3942_v48 = vsel %vm552_vm6, %v3941_v6, %v9149_v10  ;;  %v4985_v52 = vcombine.low %v9344_v0, %v9332_v55  ;;  %v4936_v25 = vcombine.high %v9240_v54, %v10177_v41 }
 0x647   : > { %4380 = vrot.lane.b32.xlu0 %v9301_v42, %s6448_s26  ;;  %4348 = vrot.lane.b32.xlu1 %v4263_v20, %s6445_s17  ;;  %v3729_v20 = vsel %vm554_vm7, %v3728_v27, %v9154_v1  ;;  %v10329_v1 = vcombine.high %v8668_v7, %v8671_v58  ;;  %v5161_v54 = vcombine.high %v9253_v62, %v10177_v41 }
 0x648   : > { %v3730_v4 = vsel %vm556_vm8, %v3729_v20, %v9178_v40  ;;  %v4723_v40 = vcombine.high %v9225_v33, %v10177_v41  ;;  %v9376_v27 = vrot.slane %v4985_v52, %v6660_v37  ;;  %v3990_v20 = vcombine.high %v9035_v45, %v10177_v41 }
 0x649   : > { %v9323_v39 = vpop.permute.xlu0 %5722  ;;  %v9334_v14 = vpop.permute.xlu1 %5690  ;;  %v3731_v5 = vsel %vm558_vm9, %v3730_v4, %v9219_v32  ;;  %v9357_v44 = vrot.slane %v10329_v1, %v6660_v37  ;;  %v3943_v32 = vsel %vm554_vm7, %v3942_v48, %v9168_v60  ;;  %v3975_v4 = vcombine.high %v9020_v30, %v10177_v41  ;;  %v6010_v1 = vld [vmem:[#allocation3 + $0x28] sm:$0xff] }
 0x64a   : > { %v3944_v7 = vsel %vm556_vm8, %v3943_v32, %v9194_v24  ;;  %v9414_v45 = vrot.slane %v3990_v20, %v6650_v18  ;;  %v10332_v52 = vcombine.high %v8743_v16, %v8746_v63  ;;  %v4105_v16 = vcombine.high %v9287_v13, %v10177_v41  ;;  %v10334_v20 = vld [vmem:[#allocation36_spill] sm:$0xff] }
 0x64b   : > { %4610 = vrot.lane.b32.xlu0 %v9329_v19, %s6448_s26  ;;  %4578 = vrot.lane.b32.xlu1 %v4493_v21, %s6445_s17  ;;  %v3945_v58 = vsel %vm558_vm9, %v3944_v7, %v9232_v50  ;;  %v10330_v50 = vcombine.high %v8695_v51, %v8698_v36  ;;  %v10331_v51 = vcombine.high %v8716_v12, %v8719_v56 }
 0x64c   : > { %v9423_v30 = vrot.slane %v3975_v4, %v6650_v18  ;;  %v10333_v13 = vcombine.high %v8764_v17, %v8767_v61 }
 0x64d   : > { %v3717_v53 = vpop.permute.xlu0 %3716  ;;  %v9362_v49 = vpop.permute.xlu1 %3684  ;;  %v9392_v6 = vrot.slane %v10330_v50, %v6660_v37  ;;  %v9411_v36 = vrot.slane %v10331_v51, %v6660_v37  ;;  %v10335_v51 = vld [vmem:[#allocation28_spill] sm:$0xff] }
 0x64e   : > { %v3732_v10 = vsel %vm560_vm10, %v3731_v5, %v3717_v53  ;;  %v5391_v53 = vcombine.high %v9266_v59, %v10177_v41  ;;  %v4021_v59 = vcombine.low %v9423_v30, %v9414_v45 }
 0x64f   : > { %v3736_v47 = vrot.slane %v3732_v10, 4  ;;  %4840 = vrot.lane.b32.xlu0 %v9357_v44, %s6448_s26  ;;  %4808 = vrot.lane.b32.xlu1 %v4723_v40, %s6445_s17  ;;  %v9432_v10 = vrot.slane %v10332_v52, %v6660_v37 }
 0x651   : > { %3740 = vst [vmem:[#allocation3 + $0x38] sm:$0x30] %v3736_v47  ;;  %v3931_v8 = vpop.permute.xlu0 %3930  ;;  %v9379_v60 = vpop.permute.xlu1 %3898  ;;  %v5621_v47 = vcombine.high %v9279_v26, %v10177_v41 }
 0x652   : > { %v3946_v33 = vsel %vm560_vm10, %v3945_v58, %v3931_v8  ;;  %v9450_v58 = vrot.slane %v4021_v59, %v6660_v37  ;;  %v4330_v8 = vcombine.high %v9301_v42, %v10177_v41  ;;  %v6312_v42 = vld [vmem:[#allocation2 + $0x4] sm:$0xff] }
 0x653   : > { %v3950_v21 = vrot.slane %v3946_v33, 2  ;;  %5046 = vrot.lane.b32.xlu0 %v9376_v27, %s6447_s24  ;;  %5014 = vrot.lane.b32.xlu1 %v4936_v25, %s6450_s27  ;;  %v9465_v25 = vrot.slane %v10333_v13, %v6660_v37  ;;  %v4873_v4 = vcombine.high %v6312_v42, %v10177_v41 }
 0x655   : > { %3954 = vst [vmem:[#allocation3 + $0x38] sm:$0xc0] %v3950_v21  ;;  %v9386_v24 = vpop.permute.xlu0 %4336  ;;  %v9396_v48 = vpop.permute.xlu1 %4136  ;;  %v6311_v21 = vld [vmem:[#allocation2 + $0x1c] sm:$0xff] }
 0x656   : > { %v4888_v50 = vcombine.high %v6311_v21, %v10177_v41 }
 0x657   : > { %5278 = vrot.lane.b32.xlu0 %v9392_v6, %s6448_s26  ;;  %5246 = vrot.lane.b32.xlu1 %v5161_v54, %s6445_s17  ;;  %v3933_v54 = vsel %vm548_vm4, %v10334_v20, %v9107_v11  ;;  %v10337_v11 = vcombine.high %v8804_v3, %v8810_v31  ;;  %v9503_v3 = vrot.slane %v4873_v4, %v6650_v18  ;;  %v10339_v31 = vld [vmem:[#allocation41_spill] sm:$0xff]  ;;  %v10342_v4 = vld [vmem:[#allocation27_spill] sm:$0xff] }
 0x658   : > { %v3934_v59 = vsel %vm550_vm5, %v3933_v54, %v9136_v23  ;;  %v4790_v23 = vcombine.high %v9357_v44, %v10177_v41  ;;  %v10341_v54 = vld [vmem:[#allocation24_spill] sm:$0xff] }
 0x659   : > { %v9405_v5 = vpop.permute.xlu0 %4566  ;;  %v9416_v62 = vpop.permute.xlu1 %4368  ;;  %v9488_v52 = vrot.slane %v10337_v11, %v6660_v37 }
 0x65b   : > { %5508 = vrot.lane.b32.xlu0 %v9411_v36, %s6448_s26  ;;  %5476 = vrot.lane.b32.xlu1 %v5391_v53, %s6445_s17  ;;  %v10336_v53 = vld [vmem:[#allocation31_spill] sm:$0xff] }
 0x65c   : > { %v6012_v12 = vld [vmem:[#allocation3 + $0x38] sm:$0xff]  ;;  %v3719_v61 = vsel %vm548_vm4, %v10336_v53, %v10335_v51 }
 0x65d   : > { %v9426_v56 = vpop.permute.xlu0 %4796  ;;  %v6225_v40 = vpack.c.bf16 %v6012_v12, %v6010_v1  ;;  %v9436_v32 = vpop.permute.xlu1 %4598  ;;  %v4560_v1 = vcombine.high %v9329_v19, %v10177_v41  ;;  %v3935_v19 = vsel %vm552_vm6, %v3934_v59, %v9164_v57  ;;  %v10340_v57 = vcombine.high %v10310_v2, %v10309_v29  ;;  %v10343_v53 = vld [vmem:[#allocation51_spill] sm:$0xff] }
 0x65e   : > { %v3936_v42 = vsel %vm554_vm7, %v3935_v19, %v10341_v54  ;;  %v5458_v54 = vcombine.high %v9411_v36, %v10177_v41  ;;  %v10348_v36 = vcombine.high %v8922_v34, %v8930_v9  ;;  %v4494_v34 = vcombine.high %v9488_v52, %v10177_v41 }
 0x65f   : > { %5738 = vrot.lane.b32.xlu0 %v9432_v10, %s6448_s26  ;;  %6226 = vmatprep.subr.bf16.mxu0 %v6225_v40  ;;  %v9491_v40 = vrot.slane %v4888_v50, %v6650_v18  ;;  %v4720_v50 = vrot.slane %v10340_v57, %v6660_v37  ;;  %v3937_v44 = vsel %vm556_vm8, %v3936_v42, %v9237_v43 }
 0x660   : > { %5706 = vrot.lane.b32.xlu1 %v5621_v47, %s6445_s17  ;;  %v10338_v47 = vld [vmem:[#allocation49_spill] sm:$0xff]  ;;  %v3938_v29 = vsel %vm558_vm9, %v3937_v44, %v9379_v60  ;;  %v5688_v44 = vcombine.high %v9432_v10, %v10177_v41  ;;  %v10349_v10 = vcombine.high %v8944_v15, %v8947_v28  ;;  %v4264_v15 = vcombine.high %v9465_v25, %v10177_v41 }
 0x661   : > { %v9443_v7 = vpop.permute.xlu0 %5034  ;;  %v9447_v63 = vpop.permute.xlu1 %4828  ;;  %v4919_v20 = vcombine.low %v9503_v3, %v9491_v40 }
 0x663   : > { %4152 = vrot.lane.b32.xlu0 %v4105_v16, %s6445_s17  ;;  %v3720_v16 = vsel %vm550_vm5, %v3719_v61, %v10338_v47  ;;  %v4927_v43 = vrot.slane %v4919_v20, %v6660_v37 }
 0x664   : > { %4120 = vrot.lane.b32.xlu1 %v9450_v58, %s6447_s24 }
 0x665   : > { %v9455_v26 = vpop.permute.xlu0 %5266  ;;  %v9459_v33 = vpop.permute.xlu1 %5234 }
 0x667   : > { %4384 = vrot.lane.b32.xlu0 %v4330_v8, %s6446_s19  ;;  %v3721_v8 = vsel %vm552_vm6, %v3720_v16, %v10339_v31 }
 0x668   : > { %4352 = vrot.lane.b32.xlu1 %v9465_v25, %s6448_s26  ;;  %v3722_v51 = vsel %vm554_vm7, %v3721_v8, %v10342_v4  ;;  %v10344_v8 = vld [vmem:[#allocation19_spill] sm:$0xff] }
 0x669   : > { %v9478_v17 = vpop.permute.xlu0 %5496  ;;  %v9482_v12 = vpop.permute.xlu1 %5464  ;;  %v3723_v2 = vsel %vm556_vm8, %v3722_v51, %v10343_v53  ;;  %v6009_v53 = vld [vmem:[#allocation3 + $0x20] sm:$0xff] }
 0x66a   : > { %v3724_v11 = vsel %vm558_vm9, %v3723_v2, %v9362_v49 }
 0x66b   : > { %4614 = vrot.lane.b32.xlu0 %v4560_v1, %s6446_s19  ;;  %v5003_v1 = vcombine.high %v9376_v27, %v10177_v41  ;;  %v5228_v27 = vcombine.high %v9392_v6, %v10177_v41  ;;  %v10346_v6 = vld [vmem:[#allocation45_spill] sm:$0xff] }
 0x66c   : > { %4582 = vrot.lane.b32.xlu1 %v9488_v52, %s6448_s26  ;;  %v10347_v4 = vcombine.high %v10317_v46, %v10346_v6  ;;  %v4986_v52 = vcombine.high %v9344_v0, %v9332_v55  ;;  %v10352_v0 = vld [vmem:[#allocation52_spill] sm:$0xff] }
 0x66d   : > { %v9507_v13 = vpop.permute.xlu0 %5726  ;;  %v9511_v21 = vpop.permute.xlu1 %5694 }
 0x66e   : > { %v5388_v51 = vrot.slane %v10347_v4, %v6660_v37 }
 0x66f   : > { %4844 = vrot.lane.b32.xlu0 %v4790_v23, %s6446_s19  ;;  %v10345_v23 = vcombine.high %v10314_v38, %v10344_v8 }
 0x670   : > { %4812 = vrot.lane.b32.xlu1 %v4720_v50, %s6448_s26 }
 0x671   : > { %v3903_v61 = vpop.permute.xlu0 %3902  ;;  %v3689_v47 = vpop.permute.xlu1 %3688  ;;  %v5158_v57 = vrot.slane %v10345_v23, %v6660_v37  ;;  %v5000_v23 = vrot.slane %v4986_v52, %v6660_v37 }
 0x672   : > { %v3939_v59 = vsel %vm560_vm10, %v3938_v29, %v3903_v61  ;;  %v3725_v19 = vsel %vm560_vm10, %v3724_v11, %v3689_v47  ;;  %v5618_v61 = vrot.slane %v10348_v36, %v6660_v37  ;;  %v4102_v11 = vrot.slane %v10349_v10, %v6660_v37 }
 0x673   : > { %v3949_v16 = vrot.slane %v3939_v59, 2  ;;  %5050 = vrot.lane.b32.xlu0 %v5003_v1, %s6445_s17  ;;  %v3735_v31 = vrot.slane %v3725_v19, 4  ;;  %v4039_v47 = vcombine.high %v9450_v58, %v10177_v41  ;;  %v4937_v58 = vcombine.high %v4927_v43, %v10177_v41 }
 0x674   : > { %5018 = vrot.lane.b32.xlu1 %v4927_v43, %s6447_s24  ;;  %v10350_v43 = vld [vmem:[#allocation15_spill] sm:$0xff]  ;;  %v4022_v36 = vcombine.high %v9423_v30, %v9414_v45  ;;  %v10355_v45 = vld [vmem:[#allocation22_spill] sm:$0xff] }
 0x675   : > { %3953 = vst [vmem:[#allocation3 + $0x30] sm:$0xc0] %v3949_v16  ;;  %v9540_v60 = vpop.permute.xlu0 %4140  ;;  %3739 = vst [vmem:[#allocation3 + $0x30] sm:$0x30] %v3735_v31  ;;  %v9544_v49 = vpop.permute.xlu1 %4108  ;;  %v4724_v31 = vcombine.high %v4720_v50, %v10177_v41  ;;  %v9623_v50 = vrot.slane %v10352_v0, %v6650_v18  ;;  %v4170_v30 = vsel %vm548_vm4, %v10355_v45, %v9396_v48  ;;  %v10361_v45 = vld [vmem:[#allocation46_spill] sm:$0xff] }
 0x677   : > { %5282 = vrot.lane.b32.xlu0 %v5228_v27, %s6446_s19  ;;  %v5162_v27 = vcombine.high %v5158_v57, %v10177_v41 }
 0x678   : > { %5250 = vrot.lane.b32.xlu1 %v5158_v57, %s6448_s26  ;;  %v10353_v57 = vld [vmem:[#allocation53_spill] sm:$0xff] }
 0x679   : > { %v9552_v20 = vpop.permute.xlu0 %4372  ;;  %v9556_v42 = vpop.permute.xlu1 %4340  ;;  %v5745_v4 = vsel %vm548_vm4, %v10353_v57, %v9334_v14 }
 0x67b   : > { %5512 = vrot.lane.b32.xlu0 %v5458_v54, %s6446_s19  ;;  %v10351_v54 = vld [vmem:[#allocation42_spill] sm:$0xff] }
 0x67c   : > { %5480 = vrot.lane.b32.xlu1 %v5388_v51, %s6448_s26  ;;  %v6011_v2 = vld [vmem:[#allocation3 + $0x30] sm:$0xff]  ;;  %v5752_v6 = vsel %vm548_vm4, %v10351_v54, %v10350_v43 }
 0x67d   : > { %v9564_v38 = vpop.permute.xlu0 %4602  ;;  %v9568_v29 = vpop.permute.xlu1 %4570  ;;  %v6227_v46 = vpack.c.bf16 %v6011_v2, %v6009_v53  ;;  %v5753_v55 = vsel %vm550_vm5, %v5752_v6, %v9323_v39  ;;  %v5622_v2 = vcombine.high %v5618_v61, %v10177_v41  ;;  %v5746_v39 = vsel %vm550_vm5, %v5745_v4, %v9511_v21  ;;  %v10356_v21 = vld [vmem:[#allocation21_spill] sm:$0xff] }
 0x67e   : > { %v4036_v6 = vrot.slane %v4022_v36, %v6660_v37 }
 0x67f   : > { %5742 = vrot.lane.b32.xlu0 %v5688_v44, %s6446_s19  ;;  %6228 = vmatpush1.bf16.msra.mxu0 %v6227_v46  ;;  %v5754_v44 = vsel %vm552_vm6, %v5753_v55, %v9507_v13  ;;  %v10354_v13 = vld [vmem:[#allocation26_spill] sm:$0xff] }
 0x680   : > { %5710 = vrot.lane.b32.xlu1 %v5618_v61, %s6448_s26  ;;  %v9645_v61 = vrot.slane %v10354_v13, %v6650_v18 }
 0x681   : > { %v9576_v1 = vpop.permute.xlu0 %4832  ;;  %v9582_v59 = vpop.permute.xlu1 %4800 }
 0x682   : > { %v5883_v52 = vcombine.low %v9645_v61, %v9623_v50 }
 0x683   : > { %4156 = vrot.lane.b32.xlu0 %v4102_v11, %s6448_s26 }
 0x684   : > { %4124 = vrot.lane.b32.xlu1 %v4039_v47, %s6445_s17  ;;  %v5392_v47 = vcombine.high %v5388_v51, %v10177_v41  ;;  %v4171_v51 = vsel %vm550_vm5, %v4170_v30, %v9540_v60  ;;  %v10358_v60 = vld [vmem:[#allocation30_spill] sm:$0xff] }
 0x685   : > { %v9588_v9 = vpop.permute.xlu0 %5038  ;;  %v9592_v16 = vpop.permute.xlu1 %5006  ;;  %v5794_v55 = vrot.slane %v10358_v60, %v6650_v18 }
 0x687   : > { %4586 = vrot.lane.b32.xlu0 %v4494_v34, %s6446_s19  ;;  %v5809_v34 = vrot.slane %v10356_v21, %v6650_v18 }
 0x688   : > { %4356 = vrot.lane.b32.xlu1 %v4264_v15, %s6446_s19 }
 0x689   : > { %v9598_v28 = vpop.permute.xlu0 %5270  ;;  %v9601_v19 = vpop.permute.xlu1 %5238 }
 0x68b   : > { %5022 = vrot.lane.b32.xlu0 %v4937_v58, %s6445_s17  ;;  %v4106_v58 = vcombine.high %v4102_v11, %v10177_v41 }
 0x68c   : > { %4816 = vrot.lane.b32.xlu1 %v4724_v31, %s6446_s19  ;;  %v4920_v31 = vcombine.high %v9503_v3, %v9491_v40  ;;  %v10359_v40 = vld [vmem:[#allocation17_spill] sm:$0xff]  ;;  %v10360_v3 = vld [vmem:[#allocation47_spill] sm:$0xff] }
 0x68d   : > { %v9608_v25 = vpop.permute.xlu0 %5500  ;;  %v9611_v8 = vpop.permute.xlu1 %5468  ;;  %v4387_v57 = vsel %vm548_vm4, %v10360_v3, %v10359_v40  ;;  %v5818_v40 = vcombine.high %v5794_v55, %v5809_v34 }
 0x68e   : > { %v4388_v4 = vsel %vm550_vm5, %v4387_v57, %v9386_v24  ;;  %v10362_v24 = vld [vmem:[#allocation32_spill] sm:$0xff] }
 0x68f   : > { %5254 = vrot.lane.b32.xlu0 %v5162_v27, %s6446_s19  ;;  %v10357_v27 = vld [vmem:[#allocation38_spill] sm:$0xff]  ;;  %v4389_v36 = vsel %vm552_vm6, %v4388_v4, %v9556_v42  ;;  %v4617_v30 = vsel %vm548_vm4, %v10362_v24, %v10361_v45  ;;  %v5884_v4 = vcombine.high %v9645_v61, %v9623_v50  ;;  %v10366_v45 = vld [vmem:[#allocation29_spill] sm:$0xff] }
 0x690   : > { %5054 = vrot.lane.b32.xlu1 %v5000_v23, %s6448_s26  ;;  %v4163_v48 = vsel %vm548_vm4, %v10357_v27, %v9544_v49  ;;  %v5817_v49 = vcombine.low %v5794_v55, %v5809_v34  ;;  %v4618_v42 = vsel %vm550_vm5, %v4617_v30, %v9405_v5  ;;  %v10365_v55 = vld [vmem:[#allocation55_spill] sm:$0xff] }
 0x691   : > { %v5731_v53 = vpop.permute.xlu0 %5730  ;;  %v5699_v10 = vpop.permute.xlu1 %5698  ;;  %v5068_v50 = vsel %vm548_vm4, %v10365_v55, %v9443_v7  ;;  %v5898_v30 = vrot.slane %v5884_v4, %v6660_v37  ;;  %v10370_v55 = vlaneseq }
 0x692   : > { %v9636_v46 = vsel %vm554_vm7, %v5754_v44, %v5731_v53  ;;  %v9640_v14 = vsel %vm552_vm6, %v5746_v39, %v5699_v10  ;;  %v5004_v53 = vcombine.high %v5000_v23, %v10177_v41  ;;  %v4934_v10 = vrot.slane %v4920_v31, %v6660_v37 }
 0x693   : > { %5714 = vrot.lane.b32.xlu0 %v5622_v2, %s6446_s19  ;;  %v9683_v2 = vrot.slane %v5883_v52, %v6660_v37  ;;  %v9697_v23 = vrot.slane %v5817_v49, %v6660_v37  ;;  %v5868_v49 = vcombine.high %v10352_v0, %v10177_v41  ;;  %v5853_v0 = vcombine.high %v10354_v13, %v10177_v41 }
 0x694   : > { %5484 = vrot.lane.b32.xlu1 %v5392_v47, %s6446_s19  ;;  %v5069_v61 = vsel %vm550_vm5, %v5068_v50, %v9588_v9  ;;  %v5061_v13 = vsel %vm548_vm4, %v10366_v45, %v9592_v16  ;;  %vm5999_vm11 = vcmp.lt.s32.totalorder %v10370_v55, 256 }
 0x695   : > { %v4145_v15 = vpop.permute.xlu0 %4144  ;;  %v4113_v54 = vpop.permute.xlu1 %4112  ;;  %v5915_v52 = vcombine.high %v9683_v2, %v10177_v41  ;;  %v5849_v57 = vcombine.high %v9697_v23, %v10177_v41  ;;  %v5867_v9 = vrot.slane %v5853_v0, %v6650_v18 }
 0x696   : > { %v9664_v43 = vsel %vm552_vm6, %v4171_v51, %v4145_v15  ;;  %v9670_v11 = vsel %vm550_vm5, %v4163_v48, %v4113_v54  ;;  %v4040_v15 = vcombine.high %v4036_v6, %v10177_v41  ;;  %v10363_v48 = vld [vmem:[#allocation39_spill] sm:$0xff]  ;;  %v10364_v54 = vld [vmem:[#allocation14_spill] sm:$0xff] }
 0x697   : > { %4160 = vrot.lane.b32.xlu0 %v4106_v58, %s6446_s19  ;;  %v4619_v58 = vsel %vm552_vm6, %v4618_v42, %v9568_v29  ;;  %v4847_v5 = vsel %vm548_vm4, %v10364_v54, %v10363_v48 }
 0x698   : > { %4128 = vrot.lane.b32.xlu1 %v4036_v6, %s6448_s26  ;;  %v5802_v6 = vcombine.high %v10356_v21, %v10177_v41  ;;  %v4848_v29 = vsel %vm550_vm5, %v4847_v5, %v9426_v56  ;;  %v4938_v21 = vcombine.high %v4934_v10, %v10177_v41  ;;  %v5787_v56 = vcombine.high %v10358_v60, %v10177_v41 }
 0x699   : > { %v9679_v44 = vpop.permute.xlu0 %4376  ;;  %v4345_v39 = vpop.permute.xlu1 %4344 }
 0x69a   : > { %v9689_v47 = vsel %vm554_vm7, %v4389_v36, %v4345_v39  ;;  %v5832_v39 = vrot.slane %v5818_v40, %v6660_v37  ;;  %v5801_v42 = vrot.slane %v5787_v56, %v6650_v18 }
 0x69b   : > { %5058 = vrot.lane.b32.xlu0 %v5004_v53, %s6446_s19  ;;  %v4849_v53 = vsel %vm552_vm6, %v4848_v29, %v9582_v59  ;;  %v5816_v59 = vrot.slane %v5802_v6, %v6650_v18  ;;  %v5916_v29 = vcombine.high %v5898_v30, %v10177_v41 }
 0x69c   : > { %5026 = vrot.lane.b32.xlu1 %v4934_v10, %s6448_s26  ;;  %v5882_v10 = vrot.slane %v5868_v49, %v6650_v18  ;;  %v5850_v5 = vcombine.high %v5832_v39, %v10177_v41  ;;  %v10369_v49 = vld [vmem:[#allocation50_spill] sm:$0xff] }
 0x69d   : > { %v9701_v51 = vpop.permute.xlu0 %4606  ;;  %v4575_v31 = vpop.permute.xlu1 %4574  ;;  %v5833_v16 = vcombine.low %v5801_v42, %v5816_v59 }
 0x69e   : > { %v9709_v27 = vsel %vm554_vm7, %v4619_v58, %v4575_v31  ;;  %v10367_v58 = vld [vmem:[#allocation58_spill] sm:$0xff]  ;;  %v10368_v31 = vld [vmem:[#allocation48_spill] sm:$0xff]  ;;  %v5899_v6 = vcombine.low %v5867_v9, %v5882_v10 }
 0x69f   : > { %4132 = vrot.lane.b32.xlu0 %v4040_v15, %s6446_s19 }
 0x6a0   : > { %5948 = vrot.lane.b32.xlu1 %v5915_v52, %s6451_s29  ;;  %v5285_v52 = vsel %vm548_vm4, %v10368_v31, %v10367_v58  ;;  %v5907_v56 = vrot.slane %v5899_v6, %v6660_v37 }
 0x6a1   : > { %v9720_v3 = vpop.permute.xlu0 %4836  ;;  %v4805_v36 = vpop.permute.xlu1 %4804  ;;  %v5286_v48 = vsel %vm550_vm5, %v5285_v52, %v9459_v33  ;;  %v5515_v33 = vsel %vm548_vm4, %v10369_v49, %v9308_v22  ;;  %v5991_v22 = vld [vmem:[%s6622_s28] sm:$0xcc] }
 0x6a2   : > { %v9734_v34 = vsel %vm554_vm7, %v4849_v53, %v4805_v36  ;;  %v5287_v40 = vsel %vm552_vm6, %v5286_v48, %v9601_v19  ;;  %v5516_v4 = vsel %vm550_vm5, %v5515_v33, %v9482_v12  ;;  %v5841_v19 = vrot.slane %v5833_v16, %v6660_v37  ;;  %5995 = vst [vmem:[#allocation3 + $0x60] sm:$0xc] %v5991_v22 }
 0x6a3   : > { %5920 = vrot.lane.b32.xlu0 %v5849_v57, %s6451_s29  ;;  %v5517_v36 = vsel %vm552_vm6, %v5516_v4, %v9611_v8  ;;  %v5834_v12 = vcombine.high %v5801_v42, %v5816_v59  ;;  %v6460_v8 = vmov 1.0  }
 0x6a4   : > { %5030 = vrot.lane.b32.xlu1 %v4938_v21, %s6446_s19  ;;  %6002 = vst.msk [vmem:[#allocation3 + $0x64] ss:$8 sm:$0x3] %vm5999_vm11, %v6460_v8  ;;  %v10375_v8 = vld [vmem:[#allocation33_spill] sm:$0xff] }
 0x6a5   : > { %v5043_v60 = vpop.permute.xlu0 %5042  ;;  %v5011_v7 = vpop.permute.xlu1 %5010 }
 0x6a6   : > { %v9752_v24 = vsel %vm552_vm6, %v5069_v61, %v5043_v60  ;;  %v9757_v15 = vsel %vm550_vm5, %v5061_v13, %v5011_v7  ;;  %v5851_v61 = vcombine.high %v5841_v19, %v10177_v41  ;;  %v5993_v60 = vcombine.high %v5991_v22, %v5991_v22 }
 0x6a7   : > { %5924 = vrot.lane.b32.xlu0 %v5832_v39, %s6449_s15  ;;  %v5900_v39 = vcombine.high %v5867_v9, %v5882_v10  ;;  %v5917_v13 = vcombine.high %v5907_v56, %v10177_v41 }
 0x6a8   : > { %5952 = vrot.lane.b32.xlu1 %v5898_v30, %s6449_s15  ;;  %5996 = vst [vmem:[#allocation3 + $0x68] sm:$0xc] %v5993_v60  ;;  %v5848_v30 = vrot.slane %v5834_v12, %v6660_v37  ;;  %v10374_v60 = vld [vmem:[#allocation20_spill] sm:$0xff] }
 0x6a9   : > { %v9767_v54 = vpop.permute.xlu0 %5274  ;;  %v5243_v18 = vpop.permute.xlu1 %5242  ;;  %v5914_v9 = vrot.slane %v5900_v39, %v6660_v37  ;;  %v4624_v39 = vsel %vm548_vm4, %v10375_v8, %v10374_v60 }
 0x6aa   : > { %v9774_v57 = vsel %vm554_vm7, %v5287_v40, %v5243_v18  ;;  %v5852_v31 = vcombine.high %v5848_v30, %v10177_v41 }
 0x6ab   : > { %5928 = vrot.lane.b32.xlu0 %v5850_v5, %s6450_s27  ;;  %v5918_v16 = vcombine.high %v5914_v9, %v10177_v41 }
 0x6ac   : > { %5956 = vrot.lane.b32.xlu1 %v5916_v29, %s6450_s27 }
 0x6ad   : > { %v9783_v53 = vpop.permute.xlu0 %5504  ;;  %v5473_v21 = vpop.permute.xlu1 %5472 }
 0x6ae   : > { %v9790_v0 = vsel %vm554_vm7, %v5517_v36, %v5473_v21  ;;  %v10371_v36 = vld [vmem:[#allocation25_spill] sm:$0xff]  ;;  %v10372_v21 = vld [vmem:[#allocation34_spill] sm:$0xff] }
 0x6af   : > { %5932 = vrot.lane.b32.xlu0 %v5841_v19, %s6447_s24 }
 0x6b0   : > { %5960 = vrot.lane.b32.xlu1 %v5907_v56, %s6447_s24  ;;  %v4394_v56 = vsel %vm548_vm4, %v10372_v21, %v10371_v36  ;;  %v10379_v21 = vld [vmem:[#allocation13_spill] sm:$0xff]  ;;  %s6371_s24 = scalar_lea.vmem %s9990_s21, 256 }
 0x6b1   : > { %v9796_v50 = vpop.permute.xlu0 %5734  ;;  %v5703_v45 = vpop.permute.xlu1 %5702  ;;  %p6372_p6 = scmp.ne.s32.totalorder %s9990_s21, %s6371_s24 }
 0x6b2   : > { %v9802_v7 = vsel %vm554_vm7, %v9640_v14, %v5703_v45 }
 0x6b3   : > { %5936 = vrot.lane.b32.xlu0 %v5851_v61, %s6445_s17  ;;  %p6373_p9 = pnand %p6372_p6, %p6569_p8 }
 0x6b4   : > { %5964 = vrot.lane.b32.xlu1 %v5917_v13, %s6445_s17  ;;  %v10376_v13 = vld [vmem:[#allocation23_spill] sm:$0xff]  ;;  %s9995_s17 = scalar_lea.hbm %s10039_s2, %s6220_s25 }
 0x6b5   : > { %v4149_v59 = vpop.permute.xlu0 %4148  ;;  %v4117_v10 = vpop.permute.xlu1 %4116  ;;  %p6374_p12 = pneg %p6373_p9 }
 0x6b6   : > { %v9809_v42 = vsel %vm554_vm7, %v9664_v43, %v4149_v59  ;;  %v9814_v58 = vsel %vm552_vm6, %v9670_v11, %v4117_v10  ;;  %v4625_v59 = vsel %vm550_vm5, %v4624_v39, %v10376_v13  ;;  %v10380_v13 = vld [vmem:[#allocation16_spill] sm:$0xff] }
 0x6b7   : > { %5940 = vrot.lane.b32.xlu0 %v5848_v30, %s6448_s26 }
 0x6b8   : > { %5968 = vrot.lane.b32.xlu1 %v5914_v9, %s6448_s26  ;;  %s6375_s26 = sshll.u32 %s6461_s13, 4  ;;  %s6376_s26 = int_to_ptr.vmem [resolvable:$false] %s6375_s26 }
 0x6b9   : > { %v4381_v14 = vpop.permute.xlu0 %4380  ;;  %v9819_v52 = vpop.permute.xlu1 %4348  ;;  %s6377_s15 = scalar_lea.vmem %s6376_s26, 512  ;;  %p6378_p13 = scmp.lt.s32.totalorder %s9990_s21, %s6376_s26 }
 0x6ba   : > { %p6379_p0 = scmp.lt.s32.totalorder %s6377_s15, %s6371_s24 }
 0x6bb   : > { %5944 = vrot.lane.b32.xlu0 %v5852_v31, %s6446_s19 }
 0x6bc   : > { %5972 = vrot.lane.b32.xlu1 %v5918_v16, %s6446_s19  ;;  %s6104_s19 = scalar_lea.sflag [#allocation6], %s6618_s22  ;;  %p6380_p5 = por %p6379_p0, %p6378_p13 }
 0x6bd   : > { %v4611_v37 = vpop.permute.xlu0 %4610  ;;  %v9824_v43 = vpop.permute.xlu1 %4578 }
 0x6be   : > { %p6381_p10 = pnand %p6380_p5, %p6374_p12 }
 0x6c1   : > { %v4841_v11 = vpop.permute.xlu0 %4840  ;;  %v9826_v48 = vpop.permute.xlu1 %4808 }
 0x6c5   : > { %v5047_v5 = vpop.permute.xlu0 %5046  ;;  %v5015_v40 = vpop.permute.xlu1 %5014 }
 0x6c6   : > { %v9830_v6 = vsel %vm554_vm7, %v9752_v24, %v5047_v5  ;;  %v9834_v18 = vsel %vm552_vm6, %v9757_v15, %v5015_v40  ;;  %v10373_v24 = vld [vmem:[#allocation18_spill] sm:$0xff]  ;;  %v10377_v5 = vld [vmem:[#allocation56_spill] sm:$0xff] }
 0x6c7   : > { %v4395_v22 = vsel %vm550_vm5, %v4394_v56, %v10373_v24  ;;  %v10378_v40 = vld [vmem:[#allocation40_spill] sm:$0xff] }
 0x6c8   : > { %v4396_v15 = vsel %vm552_vm6, %v4395_v22, %v9416_v62  ;;  %v4626_v62 = vsel %vm552_vm6, %v4625_v59, %v9436_v32 }
 0x6c9   : > { %v5279_v41 = vpop.permute.xlu0 %5278  ;;  %v9836_v29 = vpop.permute.xlu1 %5246  ;;  %v4397_v61 = vsel %vm554_vm7, %v4396_v15, %v9552_v20  ;;  %v4627_v20 = vsel %vm554_vm7, %v4626_v62, %v9564_v38 }
 0x6ca   : > { %v4398_v45 = vsel %vm556_vm8, %v4397_v61, %v9679_v44  ;;  %v4854_v44 = vsel %vm548_vm4, %v10378_v40, %v10377_v5  ;;  %v4628_v36 = vsel %vm556_vm8, %v4627_v20, %v9701_v51  ;;  %v10384_v20 = vld [vmem:[#allocation43_spill] sm:$0xff] }
 0x6cb   : > { %v4399_v30 = vsel %vm558_vm9, %v4398_v45, %v4381_v14  ;;  %v4855_v14 = vsel %vm550_vm5, %v4854_v44, %v10379_v21  ;;  %v4629_v56 = vsel %vm558_vm9, %v4628_v36, %v4611_v37 }
 0x6cc   : > { %v4856_v24 = vsel %vm552_vm6, %v4855_v14, %v9447_v63  ;;  %v10381_v63 = vld [vmem:[#allocation37_spill] sm:$0xff] }
 0x6cd   : > { %v5509_v49 = vpop.permute.xlu0 %5508  ;;  %v9838_v33 = vpop.permute.xlu1 %5476  ;;  %v4857_v15 = vsel %vm554_vm7, %v4856_v24, %v9576_v1  ;;  %v5292_v59 = vsel %vm548_vm4, %v10381_v63, %v10380_v13 }
 0x6ce   : > { %v4858_v51 = vsel %vm556_vm8, %v4857_v15, %v9720_v3 }
 0x6cf   : > { %v4859_v60 = vsel %vm558_vm9, %v4858_v51, %v4841_v11 }
 0x6d1   : > { %v5739_v4 = vpop.permute.xlu0 %5738 }
 0x6d2   : > { %v9840_v19 = vpop.permute.xlu1 %5706 }
 0x6d5   : > { %v9847_v55 = vpop.permute.xlu0 %4152 }
 0x6d6   : > { %v9851_v12 = vpop.permute.xlu1 %4120 }
 0x6d9   : > { %v4385_v10 = vpop.permute.xlu0 %4384 }
 0x6da   : > { %v4400_v9 = vsel %vm560_vm10, %v4399_v30, %v4385_v10  ;;  %v4353_v31 = vpop.permute.xlu1 %4352  ;;  %v10382_v30 = vld [vmem:[#allocation57_spill] sm:$0xff] }
 0x6db   : > { %v4404_v16 = vrot.slane %v4400_v9, 6  ;;  %v5293_v10 = vsel %vm550_vm5, %v5292_v59, %v10382_v30  ;;  %v10383_v9 = vld [vmem:[#allocation54_spill] sm:$0xff] }
 0x6dc   : > { %v5294_v3 = vsel %vm552_vm6, %v5293_v10, %v9455_v26 }
 0x6dd   : > { %4408 = vst [vmem:[#allocation3 + $0x48] sm:$0xc] %v4404_v16  ;;  %v4615_v32 = vpop.permute.xlu0 %4614  ;;  %v5295_v62 = vsel %vm554_vm7, %v5294_v3, %v9598_v28  ;;  %v5522_v16 = vsel %vm548_vm4, %v10384_v20, %v10383_v9  ;;  %v5519_v20 = vsel %vm556_vm8, %v9790_v0, %v9838_v33 }
 0x6de   : > { %v4630_v38 = vsel %vm560_vm10, %v4629_v56, %v4615_v32  ;;  %v4583_v22 = vpop.permute.xlu1 %4582  ;;  %v5296_v5 = vsel %vm556_vm8, %v5295_v62, %v9767_v54  ;;  %v5523_v40 = vsel %vm550_vm5, %v5522_v16, %v9295_v35 }
 0x6df   : > { %v4634_v61 = vrot.slane %v4630_v38, 4  ;;  %v5297_v44 = vsel %vm558_vm9, %v5296_v5, %v5279_v41  ;;  %v5524_v26 = vsel %vm552_vm6, %v5523_v40, %v9478_v17  ;;  %v5756_v17 = vsel %vm556_vm8, %v9636_v46, %v9796_v50 }
 0x6e0   : > { %v5525_v28 = vsel %vm554_vm7, %v5524_v26, %v9608_v25  ;;  %v5757_v15 = vsel %vm558_vm9, %v5756_v17, %v5739_v4 }
 0x6e1   : > { %4638 = vst [vmem:[#allocation3 + $0x48] sm:$0x30] %v4634_v61  ;;  %v4845_v8 = vpop.permute.xlu0 %4844  ;;  %v5526_v32 = vsel %vm556_vm8, %v5525_v28, %v9783_v53 }
 0x6e2   : > { %v4860_v37 = vsel %vm560_vm10, %v4859_v60, %v4845_v8  ;;  %v4813_v39 = vpop.permute.xlu1 %4812  ;;  %v5527_v54 = vsel %vm558_vm9, %v5526_v32, %v5509_v49  ;;  %v4621_v8 = vsel %vm556_vm8, %v9709_v27, %v9824_v43  ;;  %v4851_v27 = vsel %vm556_vm8, %v9734_v34, %v9826_v48 }
 0x6e3   : > { %v4864_v45 = vrot.slane %v4860_v37, 2  ;;  %v4391_v37 = vsel %vm556_vm8, %v9689_v47, %v9819_v52  ;;  %v4622_v46 = vsel %vm558_vm9, %v4621_v8, %v4583_v22  ;;  %v4852_v47 = vsel %vm558_vm9, %v4851_v27, %v4813_v39 }
 0x6e4   : > { %v4392_v4 = vsel %vm558_vm9, %v4391_v37, %v4353_v31  ;;  %v5289_v31 = vsel %vm556_vm8, %v9774_v57, %v9836_v29  ;;  %v5749_v39 = vsel %vm556_vm8, %v9802_v7, %v9840_v19  ;;  %v4174_v7 = vsel %vm556_vm8, %v9809_v42, %v9847_v55 }
 0x6e5   : > { %4868 = vst [vmem:[#allocation3 + $0x48] sm:$0xc0] %v4864_v45  ;;  %v9890_v1 = vpop.permute.xlu0 %5050  ;;  %v4166_v55 = vsel %vm554_vm7, %v9814_v58, %v9851_v12 }
 0x6e6   : > { %v9894_v11 = vpop.permute.xlu1 %5018 }
 0x6e9   : > { %v5283_v36 = vpop.permute.xlu0 %5282 }
 0x6ea   : > { %v5298_v21 = vsel %vm560_vm10, %v5297_v44, %v5283_v36  ;;  %v5251_v14 = vpop.permute.xlu1 %5250 }
 0x6eb   : > { %v5302_v56 = vrot.slane %v5298_v21, 6  ;;  %v5290_v3 = vsel %vm558_vm9, %v5289_v31, %v5251_v14  ;;  %v5072_v14 = vsel %vm556_vm8, %v9830_v6, %v9890_v1  ;;  %v5064_v6 = vsel %vm554_vm7, %v9834_v18, %v9894_v11 }
 0x6ed   : > { %5306 = vst [vmem:[#allocation3 + $0x58] sm:$0xc] %v5302_v56  ;;  %v5513_v35 = vpop.permute.xlu0 %5512 }
 0x6ee   : > { %v5528_v41 = vsel %vm560_vm10, %v5527_v54, %v5513_v35  ;;  %v5481_v24 = vpop.permute.xlu1 %5480 }
 0x6ef   : > { %v5532_v38 = vrot.slane %v5528_v41, 4  ;;  %v5520_v29 = vsel %vm558_vm9, %v5519_v20, %v5481_v24 }
 0x6f1   : > { %5536 = vst [vmem:[#allocation3 + $0x58] sm:$0x30] %v5532_v38  ;;  %v5743_v25 = vpop.permute.xlu0 %5742 }
 0x6f2   : > { %v5758_v61 = vsel %vm560_vm10, %v5757_v15, %v5743_v25  ;;  %v5711_v51 = vpop.permute.xlu1 %5710 }
 0x6f3   : > { %v5762_v53 = vrot.slane %v5758_v61, 2  ;;  %v5750_v16 = vsel %vm558_vm9, %v5749_v39, %v5711_v51 }
 0x6f5   : > { %5766 = vst [vmem:[#allocation3 + $0x58] sm:$0xc0] %v5762_v53  ;;  %v4157_v49 = vpop.permute.xlu0 %4156 }
 0x6f6   : > { %v4125_v60 = vpop.permute.xlu1 %4124  ;;  %v4175_v26 = vsel %vm558_vm9, %v4174_v7, %v4157_v49 }
 0x6f7   : > { %v4167_v54 = vsel %vm556_vm8, %v4166_v55, %v4125_v60 }
 0x6f9   : > { %v4587_v50 = vpop.permute.xlu0 %4586 }
 0x6fa   : > { %v4623_v45 = vsel %vm560_vm10, %v4622_v46, %v4587_v50  ;;  %v4357_v13 = vpop.permute.xlu1 %4356 }
 0x6fb   : > { %v4633_v63 = vrot.slane %v4623_v45, 4  ;;  %v4393_v59 = vsel %vm560_vm10, %v4392_v4, %v4357_v13 }
 0x6fc   : > { %v4403_v30 = vrot.slane %v4393_v59, 6 }
 0x6fd   : > { %4637 = vst [vmem:[#allocation3 + $0x40] sm:$0x30] %v4633_v63  ;;  %v5023_v43 = vpop.permute.xlu0 %5022 }
 0x6fe   : > { %4407 = vst [vmem:[#allocation3 + $0x40] sm:$0xc] %v4403_v30  ;;  %v4817_v52 = vpop.permute.xlu1 %4816  ;;  %v5065_v1 = vsel %vm556_vm8, %v5064_v6, %v5023_v43 }
 0x6ff   : > { %v4853_v22 = vsel %vm560_vm10, %v4852_v47, %v4817_v52 }
 0x700   : > { %v4863_v10 = vrot.slane %v4853_v22, 2 }
 0x701   : > { %v5255_v62 = vpop.permute.xlu0 %5254 }
 0x702   : > { %4867 = vst [vmem:[#allocation3 + $0x40] sm:$0xc0] %v4863_v10  ;;  %v5291_v9 = vsel %vm560_vm10, %v5290_v3, %v5255_v62  ;;  %v5055_v34 = vpop.permute.xlu1 %5054 }
 0x703   : > { %v5301_v48 = vrot.slane %v5291_v9, 6  ;;  %v5073_v28 = vsel %vm558_vm9, %v5072_v14, %v5055_v34 }
 0x705   : > { %5305 = vst [vmem:[#allocation3 + $0x50] sm:$0xc] %v5301_v48  ;;  %v5715_v57 = vpop.permute.xlu0 %5714 }
 0x706   : > { %v5751_v5 = vsel %vm560_vm10, %v5750_v16, %v5715_v57  ;;  %v5485_v40 = vpop.permute.xlu1 %5484  ;;  %v6004_v16 = vld [vmem:[#allocation7] sm:$0xff] }
 0x707   : > { %v5761_v44 = vrot.slane %v5751_v5, 2  ;;  %v5521_v36 = vsel %vm560_vm10, %v5520_v29, %v5485_v40 }
 0x708   : > { %v5531_v19 = vrot.slane %v5521_v36, 4 }
 0x709   : > { %5765 = vst [vmem:[#allocation3 + $0x50] sm:$0xc0] %v5761_v44  ;;  %v4161_v0 = vpop.permute.xlu0 %4160 }
 0x70a   : > { %5535 = vst [vmem:[#allocation3 + $0x50] sm:$0x30] %v5531_v19  ;;  %v4176_v33 = vsel %vm560_vm10, %v4175_v26, %v4161_v0  ;;  %v4129_v21 = vpop.permute.xlu1 %4128 }
 0x70b   : > { %4178 = vst [vmem:[#allocation3 + $0x48] sm:$0x3] %v4176_v33  ;;  %v4168_v35 = vsel %vm558_vm9, %v4167_v54, %v4129_v21 }
 0x70d   : > { %v5059_v56 = vpop.permute.xlu0 %5058 }
 0x70e   : > { %v5074_v32 = vsel %vm560_vm10, %v5073_v28, %v5059_v56  ;;  %v5027_v42 = vpop.permute.xlu1 %5026 }
 0x70f   : > { %5076 = vst [vmem:[#allocation3 + $0x58] sm:$0x3] %v5074_v32  ;;  %v5066_v15 = vsel %vm558_vm9, %v5065_v1, %v5027_v42 }
 0x711   : > { %v4133_v41 = vpop.permute.xlu0 %4132 }
 0x712   : > { %v4169_v24 = vsel %vm560_vm10, %v4168_v35, %v4133_v41  ;;  %v5949_v38 = vpop.permute.xlu1 %5948  ;;  %v6014_v12 = vld [vmem:[#allocation3 + $0x48] sm:$0xff] }
 0x713   : > { %4177 = vst [vmem:[#allocation3 + $0x40] sm:$0x3] %v4169_v24  ;;  %v5982_v63 = vsel %vm548_vm4, %v9683_v2, %v5949_v38 }
 0x715   : > { %v5921_v17 = vpop.permute.xlu0 %5920 }
 0x716   : > { %v5031_v58 = vpop.permute.xlu1 %5030  ;;  %v6016_v25 = vld [vmem:[#allocation3 + $0x58] sm:$0xff]  ;;  %v5975_v13 = vsel %vm548_vm4, %v9697_v23, %v5921_v17 }
 0x717   : > { %v5067_v61 = vsel %vm560_vm10, %v5066_v15, %v5031_v58  ;;  %v6229_v51 = vpack.c.bf16 %v6016_v25, %v6014_v12 }
 0x718   : > { %5075 = vst [vmem:[#allocation3 + $0x50] sm:$0x3] %v5067_v61 }
 0x719   : > { %v5925_v53 = vpop.permute.xlu0 %5924  ;;  %6230 = vmatprep.subr.bf16.mxu0 %v6229_v51 }
 0x71a   : > { %v5953_v49 = vpop.permute.xlu1 %5952  ;;  %v6013_v37 = vld [vmem:[#allocation3 + $0x40] sm:$0xff]  ;;  %v5976_v59 = vsel %vm550_vm5, %v5975_v13, %v5925_v53 }
 0x71b   : > { %v5983_v27 = vsel %vm550_vm5, %v5982_v63, %v5953_v49 }
 0x71d   : > { %v5929_v60 = vpop.permute.xlu0 %5928 }
 0x71e   : > { %v5957_v8 = vpop.permute.xlu1 %5956  ;;  %v5977_v43 = vsel %vm552_vm6, %v5976_v59, %v5929_v60 }
 0x71f   : > { %v6015_v46 = vld [vmem:[#allocation3 + $0x50] sm:$0xff]  ;;  %v5984_v52 = vsel %vm552_vm6, %v5983_v27, %v5957_v8 }
 0x720   : > { %v6231_v18 = vpack.c.bf16 %v6015_v46, %v6013_v37 }
 0x721   : > { %v5933_v11 = vpop.permute.xlu0 %5932 }
 0x722   : > { %6232 = vmatpush1.bf16.msra.mxu0 %v6231_v18  ;;  %v5961_v50 = vpop.permute.xlu1 %5960  ;;  %v5978_v22 = vsel %vm554_vm7, %v5977_v43, %v5933_v11 }
 0x723   : > { %v5985_v31 = vsel %vm554_vm7, %v5984_v52, %v5961_v50 }
 0x725   : > { %v5937_v4 = vpop.permute.xlu0 %5936 }
 0x726   : > { %v5965_v45 = vpop.permute.xlu1 %5964  ;;  %v5979_v10 = vsel %vm556_vm8, %v5978_v22, %v5937_v4 }
 0x727   : > { %v5986_v23 = vsel %vm556_vm8, %v5985_v31, %v5965_v45 }
 0x729   : > { %v5941_v30 = vpop.permute.xlu0 %5940 }
 0x72a   : > { %v5969_v47 = vpop.permute.xlu1 %5968  ;;  %v5980_v2 = vsel %vm558_vm9, %v5979_v10, %v5941_v30 }
 0x72b   : > { %v5987_v62 = vsel %vm558_vm9, %v5986_v23, %v5969_v47 }
 0x72d   : > { %v5945_v3 = vpop.permute.xlu0 %5944 }
 0x72e   : > { %v5981_v9 = vsel %vm560_vm10, %v5980_v2, %v5945_v3  ;;  %v5973_v34 = vpop.permute.xlu1 %5972 }
 0x72f   : > { %5989 = vst [vmem:[#allocation3 + $0x60] sm:$0x3] %v5981_v9  ;;  %v5988_v48 = vsel %vm560_vm10, %v5987_v62, %v5973_v34 }
 0x730   : > { %5990 = vst [vmem:[#allocation3 + $0x68] sm:$0x3] %v5988_v48 }
 0x736   : > { %v6017_v39 = vld [vmem:[#allocation3 + $0x60] sm:$0x1f] }
 0x737   : > { %v6018_v20 = vld [vmem:[#allocation3 + $0x68] sm:$0x1f] }
 0x738   : > { %6211 = vmatprep.subr.msk.mxu0 %vm6023_vm12, %v6018_v20 }
 0x739   : > { %6212 = vmatpush1.msk.msra.mxu0 %vm6023_vm12, %v6017_v39 }
 0x73a   : > { %6213 = vmatmul.mubr.msk.f32.vlgmr.msra.gmra.mrb[0].mxu0 %vm6019_vm13, %v6004_v16 }
 0x80d   : > { %v6096_v57 = vpop.f32.mrb[0].mxu0 }
 0x80e   : > { %6101 = vst [vmem:[%s172_s18] sm:$0xff] %v6096_v57  ;;  %v6098_v29 = vpop.f32.mrb[1].mxu0 }
 0x80f   : > { %6102 = vst [vmem:[%s172_s18 + $0x8] sm:$0xff] %v6098_v29 }
 0x810   : > { %6384 = shalt.err (!%p6381_p10)
}
 0x811   : > { %s6385_s22 = scalar_lea.hbm %s9995_s17, 256  ;;  %s6389_s30 = scalar_lea.hbm %s10039_s2, 512 }
 0x812   : > { %p6386_p1 = scmp.ne.s32.totalorder %s9995_s17, %s6385_s22  ;;  %p6390_p3 = scmp.lt.u32.totalorder %s9995_s17, %s10039_s2 }
 0x813   : > { %p6391_p11 = scmp.lt.u32.totalorder %s6389_s30, %s6385_s22  ;;  %p6393_p6 = scmp.lt.u32.totalorder %s6385_s22, %s9995_s17 }
 0x814   : > { %p6387_p2 = pnand %p6386_p1, %p6569_p8 }
 0x815   : > { %p6392_p4 = por %p6391_p11, %p6390_p3 }
 0x816   : > { %p6388_p7 = pneg %p6387_p2 }
 0x817   : > { %p6394_p9 = por %p6393_p6, %p6392_p4 }
 0x819   : > { %p6395_p12 = pnand %p6394_p9, %p6388_p7 }
 0x81b   : > { %6398 = shalt.err (!%p6395_p12)
}
 0x81c   : > { %6239 = dma.vmem_to_hbm [thread:$0]  (%p6569_p8), %s9990_s21, 256, %s9995_s17, %s6104_s19  }
 0x81d PF: > { %s6130_s5 = sand.u32 1, %s6429_s9   ;;  %p10385_p13 = scmp.ne.s32.totalorder %s10134_s16, 0 }
 0x81e   : > { %p10386_p0 = scmp.ge.s32.totalorder %s6441_s12, 2  ;;  %s6131_s6 = scalar_lea.sflag [#allocation6], %s6130_s5 }
 0x820   : > { %p6250_p5 = pnand %p10386_p0, %p10385_p13 }
 0x822   : > { %6424 = dma.done.wait (!%p6250_p5), %s6131_s6, 256  }
 0x823   : > { %6426 = vsyncadd (!%p6250_p5), %s6131_s6, 4294967040  ;;  %p16_p10 = scmp.ge.s32.totalorder %s6525_s20, 4   ;;  %s10387_s9 = smov %s6433_s10 }
 0x824   : > { %s10388_s10 = smov %s6437_s11  ;;  %s10389_s11 = smov %s6561_s7 }
 0x825   : > { %s10390_s12 = smov %s6525_s20  ;;  %18 = sbr.rel (!%p16_p10) target bundleno = 6 (0x6), region = 78 }
 0x82c   :  { %6136 = vsyncpa [#allocation5], 1 }
 0x82d   :  { %6138 = vsyncpa [#allocation5 + $0x1], 1 }
 0x82e   :  { %6139 = vsyncpa [#allocation8], 1 }
 0x82f   :  { %6140 = vsyncpa [#allocation6], 1 }
 0x830   :  { %6142 = vsyncpa [#allocation6 + $0x1], 1 }

</bundles_post_ra>
